<compile_context>
chip_gen: v6e
topology: v6e:2x2x1
jax: 0.10.0
libtpu: 0.0.40
codegen_flags: <defaults>
</compile_context>

<pallas_src>
import functools
import math

import jax
import jax.numpy as jnp
from jax.experimental import pallas as pl
from jax.experimental.pallas import tpu as pltpu


# ----------------------------- kernel ---------------------------------------


def _mha_block(t, wqkv_ref, bqkv_ref, wo3_ref, bo_ref, *, B, S, H, nh, dh):
    """torch.nn.MultiheadAttention(H, nh, batch_first=True) self-attention.

    t: (B*S, H) f32 activation, rows are batch-major (row = b*S + s).
    wqkv_ref: (H, 3H) bf16 fused in-projection; bqkv_ref: (1, 3H) f32.
    wo3_ref: (nh, dh, H) bf16 out-projection; bo_ref: (1, H) f32.
    """
    scale = 1.0 / math.sqrt(dh)
    # One big (B*S, H) @ (H, 3H) projection for the whole batch.
    qkv = jnp.dot(t.astype(jnp.bfloat16), wqkv_ref[...],
                  preferred_element_type=jnp.float32) + bqkv_ref[...]      # (B*S, 3H)
    wo3 = wo3_ref[...]
    outs = []
    for b in range(B):            # only the O(S^2) attention core is per batch
        r = b * S
        qb = qkv[r:r + S, 0 * H:1 * H] * scale                             # (S, H)
        kb = qkv[r:r + S, 1 * H:2 * H]
        vb = qkv[r:r + S, 2 * H:3 * H]
        # Heads to the leading (batch) dim; scores / softmax / weighted sum
        # are single batched dots over all heads at once.
        qh = jnp.stack([qb[:, h * dh:(h + 1) * dh] for h in range(nh)], axis=0)
        kh = jnp.stack([kb[:, h * dh:(h + 1) * dh] for h in range(nh)], axis=0)
        vh = jnp.stack([vb[:, h * dh:(h + 1) * dh] for h in range(nh)], axis=0)
        s = jnp.einsum('hqd,hkd->hqk', qh, kh,
                       preferred_element_type=jnp.float32)                 # (nh, S, S)
        s = s - jnp.max(s, axis=-1, keepdims=True)
        p = jnp.exp(s)
        p = p / jnp.sum(p, axis=-1, keepdims=True)
        o = jnp.einsum('hqk,hkd->hqd', p, vh,
                       preferred_element_type=jnp.float32)                 # (nh, S, dh)
        # Merge heads + output projection without a lane concat:
        #   out = sum_h o[h] @ Wo[h*dh:(h+1)*dh, :]
        ob = jnp.einsum('hqd,hdo->hqo', o.astype(jnp.bfloat16), wo3,
                        preferred_element_type=jnp.float32)                # (nh, S, H)
        outs.append(jnp.sum(ob, axis=0))                                   # (S, H)
    return jnp.concatenate(outs, axis=0) + bo_ref[...]                     # (B*S, H)


def fused_forward_kernel(*refs, B, S, H, nh, dh, n_groups, eps):
    assert len(refs) == 5 + 8 * n_groups + 8 + 1
    o_ref = refs[-1]
    x_ref, we_ref, be_ref, mmean_ref, bsel_ref = refs[:5]
    pos = 5

    # --- embed: per-position Linear(1, H) + relu, folded into the fused pass.
    t = jnp.maximum(x_ref[...] * we_ref[...] + be_ref[...], 0.0)           # (B*S, H)
    mmean = mmean_ref[...]

    # --- (attention -> linear+relu -> batchnorm) x n_groups, all in VMEM.
    for _ in range(n_groups):
        (wqkv_ref, bqkv_ref, wo3_ref, bo_ref,
         wl_ref, bl_ref, g_ref, bt_ref) = refs[pos:pos + 8]
        pos += 8
        t = _mha_block(t, wqkv_ref, bqkv_ref, wo3_ref, bo_ref,
                       B=B, S=S, H=H, nh=nh, dh=dh)
        t = jnp.maximum(
            jnp.dot(t.astype(jnp.bfloat16), wl_ref[...],
                    preferred_element_type=jnp.float32) + bl_ref[...], 0.0)
        # BatchNorm1d over channels S (training-mode batch stats, biased var).
        # mmean[i, j] = 1/(B*H) iff rows i and j belong to the same channel,
        # so mmean @ (per-row reductions) yields per-row channel statistics
        # without reshapes or strided gathers.
        row_sum = jnp.sum(t, axis=1, keepdims=True)                        # (B*S, 1)
        mean = jnp.dot(mmean, row_sum, preferred_element_type=jnp.float32)
        d = t - mean
        var = jnp.dot(mmean, jnp.sum(d * d, axis=1, keepdims=True),
                      preferred_element_type=jnp.float32)
        t = d * jax.lax.rsqrt(var + eps) * g_ref[...] + bt_ref[...]

    # --- last attention + head.
    (wqkv_ref, bqkv_ref, wo3_ref, bo_ref,
     w1_ref, b1_ref, w2_ref, b2_ref) = refs[pos:pos + 8]
    t = _mha_block(t, wqkv_ref, bqkv_ref, wo3_ref, bo_ref,
                   B=B, S=S, H=H, nh=nh, dh=dh)
    # relu(Linear(H -> 1)) as a VPU multiply + lane reduction over all B*S
    # rows at once (an N=1 matmul would waste the MXU output width).
    y = jnp.maximum(jnp.sum(t * w1_ref[...], axis=1, keepdims=True)
                    + b1_ref[...], 0.0)                                    # (B*S, 1)
    # flatten + Linear(S -> 1): per-batch contraction with one tiny selector
    # matmul (bsel is (B, B*S)) instead of B unrolled dots.
    o_ref[...] = (jnp.dot(bsel_ref[...], y * w2_ref[...],
                          preferred_element_type=jnp.float32) + b2_ref[...])


# ----------------------------- wrapper ---------------------------------------


def _full_spec(shape):
    rank = len(shape)
    return pl.BlockSpec(tuple(shape), lambda i, rank=rank: (0,) * rank)


def model_v2_forward(x, params, h, w):
    B = x.shape[0]
    S = h * w
    H = 32 * S
    nh = S                       # MultiheadAttention(hidden_size, num_heads=size)
    assert H % nh == 0, "hidden_size must be divisible by num_heads"
    dh = H // nh
    BS = B * S

    x_rows = x.reshape(BS, 1).astype(jnp.float32)      # one board value per row

    def rows(v):                 # (S,) / (S, k)  ->  per-row (B*S, k) expansion
        return jnp.tile(jnp.reshape(v, (S, -1)).astype(jnp.float32), (B, 1))

    # Per-row selector matrices (host-side constants); rows are batch-major.
    ridx = jnp.arange(BS)
    mmean = ((ridx[:, None] % S) == (ridx[None, :] % S)).astype(jnp.float32) / float(B * H)
    bsel = ((ridx[None, :] // S) == jnp.arange(B)[:, None]).astype(jnp.float32)

    def mha_args(p):
        wqkv = jnp.concatenate([p["wq"], p["wk"], p["wv"]], axis=1).astype(jnp.bfloat16)
        bqkv = jnp.concatenate([p["bq"], p["bk"], p["bv"]], axis=1)
        wo3 = p["wo"].reshape(nh, dh, H).astype(jnp.bfloat16)
        return [wqkv, bqkv, wo3, p["bo"]]

    args = [x_rows, rows(params["embed_w"]), rows(params["embed_b"]), mmean, bsel]

    groups = [(params["first_attention"], params["first_linear"], params["first_norm"])]
    groups += list(zip(params["attentions"], params["linears"], params["norms"]))
    for atn, lin, nrm_p in groups:
        args += mha_args(atn)
        args += [lin["w"].astype(jnp.bfloat16), lin["b"],
                 rows(nrm_p["gamma"]), rows(nrm_p["beta"])]

    args += mha_args(params["last_attention"])
    args += [jnp.reshape(params["last_linear"]["w"], (1, H)),   # (H,1) -> (1,H)
             params["last_linear"]["b"],                        # (1,1)
             rows(params["output"]["w"]),                       # (S,1) -> (B*S,1)
             params["output"]["b"]]                             # (1,1)

    kern = functools.partial(fused_forward_kernel, B=B, S=S, H=H, nh=nh, dh=dh,
                             n_groups=len(groups), eps=1e-5)

    return pl.pallas_call(
        kern,
        out_shape=jax.ShapeDtypeStruct((B, 1), jnp.float32),
        grid=(1,),
        in_specs=[_full_spec(a.shape) for a in args],
        out_specs=_full_spec((B, 1)),
        compiler_params=pltpu.CompilerParams(
            dimension_semantics=("arbitrary",),
            vmem_limit_bytes=48 * 1024 * 1024),
    )(*args)


# ----------------------------- params ----------------------------------------


def init_params(key, h, w):
    S = h * w
    H = 32 * S
    scale = 0.05

    def nrm(k, shape):
        return scale * jax.random.normal(k, shape, dtype=jnp.float32)

    keys = iter(jax.random.split(key, 64))

    def make_mha():
        return dict(
            wq=nrm(next(keys), (H, H)), wk=nrm(next(keys), (H, H)),
            wv=nrm(next(keys), (H, H)), wo=nrm(next(keys), (H, H)),
            bq=nrm(next(keys), (1, H)), bk=nrm(next(keys), (1, H)),
            bv=nrm(next(keys), (1, H)), bo=nrm(next(keys), (1, H)))

    def make_linear(din, dout):
        return dict(w=nrm(next(keys), (din, dout)), b=nrm(next(keys), (1, dout)))

    def make_norm():
        # PyTorch BatchNorm1d default init: weight=1, bias=0.
        return dict(gamma=jnp.ones((S,), jnp.float32), beta=jnp.zeros((S,), jnp.float32))

    return dict(
        embed_w=nrm(next(keys), (S, H)),     # stacked Linear(1, H) weights per position
        embed_b=nrm(next(keys), (S, H)),
        first_attention=make_mha(),
        first_linear=make_linear(H, H),
        first_norm=make_norm(),
        attentions=[make_mha()],             # n_layers = 1
        linears=[make_linear(H, H)],
        norms=[make_norm()],
        last_attention=make_mha(),
        last_linear=make_linear(H, 1),
        output=make_linear(S, 1),
    )


if __name__ == "__main__":
    h, w = 2, 2                  # board 2x2 -> size S=4, hidden H=128, heads=4
    B = 2
    key = jax.random.PRNGKey(0)
    pkey, xkey = jax.random.split(key)
    params = init_params(pkey, h, w)
    x = jax.random.uniform(xkey, (B, h, w), dtype=jnp.float32)
    out = model_v2_forward(x, params, h, w)
    jax.block_until_ready(out)
    assert out.shape == (B, 1) and out.dtype == jnp.float32
    print("KERNEL_OK")
</pallas_src>

<mosaic_0001>
module attributes {stable_mosaic.version = 11 : i64} {
  func.func @fused_forward_kernel(%arg0: i32, %arg1: memref<8x1xf32, #tpu.memory_space<vmem>>, %arg2: memref<8x128xf32, #tpu.memory_space<vmem>>, %arg3: memref<8x128xf32, #tpu.memory_space<vmem>>, %arg4: memref<8x8xf32, #tpu.memory_space<vmem>>, %arg5: memref<2x8xf32, #tpu.memory_space<vmem>>, %arg6: memref<128x384xbf16, #tpu.memory_space<vmem>>, %arg7: memref<1x384xf32, #tpu.memory_space<vmem>>, %arg8: memref<4x32x128xbf16, #tpu.memory_space<vmem>>, %arg9: memref<1x128xf32, #tpu.memory_space<vmem>>, %arg10: memref<128x128xbf16, #tpu.memory_space<vmem>>, %arg11: memref<1x128xf32, #tpu.memory_space<vmem>>, %arg12: memref<8x1xf32, #tpu.memory_space<vmem>>, %arg13: memref<8x1xf32, #tpu.memory_space<vmem>>, %arg14: memref<128x384xbf16, #tpu.memory_space<vmem>>, %arg15: memref<1x384xf32, #tpu.memory_space<vmem>>, %arg16: memref<4x32x128xbf16, #tpu.memory_space<vmem>>, %arg17: memref<1x128xf32, #tpu.memory_space<vmem>>, %arg18: memref<128x128xbf16, #tpu.memory_space<vmem>>, %arg19: memref<1x128xf32, #tpu.memory_space<vmem>>, %arg20: memref<8x1xf32, #tpu.memory_space<vmem>>, %arg21: memref<8x1xf32, #tpu.memory_space<vmem>>, %arg22: memref<128x384xbf16, #tpu.memory_space<vmem>>, %arg23: memref<1x384xf32, #tpu.memory_space<vmem>>, %arg24: memref<4x32x128xbf16, #tpu.memory_space<vmem>>, %arg25: memref<1x128xf32, #tpu.memory_space<vmem>>, %arg26: memref<1x128xf32, #tpu.memory_space<vmem>>, %arg27: memref<1x1xf32, #tpu.memory_space<vmem>>, %arg28: memref<8x1xf32, #tpu.memory_space<vmem>>, %arg29: memref<1x1xf32, #tpu.memory_space<vmem>>, %arg30: memref<2x1xf32, #tpu.memory_space<vmem>>) attributes {dimension_semantics = [#tpu.dimension_semantics<arbitrary>], iteration_bounds = array<i64: 1>, scalar_prefetch = 0 : i64, scratch_operands = 0 : i64, tpu.core_type = #tpu.core_type<tc>, window_params = [{pipeline_mode = #tpu.pipeline_mode<synchronous>, transform_indices = @transform_0, window_bounds = array<i64: 8, 1>}, {pipeline_mode = #tpu.pipeline_mode<synchronous>, transform_indices = @transform_1, window_bounds = array<i64: 8, 128>}, {pipeline_mode = #tpu.pipeline_mode<synchronous>, transform_indices = @transform_2, window_bounds = array<i64: 8, 128>}, {pipeline_mode = #tpu.pipeline_mode<synchronous>, transform_indices = @transform_3, window_bounds = array<i64: 8, 8>}, {pipeline_mode = #tpu.pipeline_mode<synchronous>, transform_indices = @transform_4, window_bounds = array<i64: 2, 8>}, {pipeline_mode = #tpu.pipeline_mode<synchronous>, transform_indices = @transform_5, window_bounds = array<i64: 128, 384>}, {pipeline_mode = #tpu.pipeline_mode<synchronous>, transform_indices = @transform_6, window_bounds = array<i64: 1, 384>}, {pipeline_mode = #tpu.pipeline_mode<synchronous>, transform_indices = @transform_7, window_bounds = array<i64: 4, 32, 128>}, {pipeline_mode = #tpu.pipeline_mode<synchronous>, transform_indices = @transform_8, window_bounds = array<i64: 1, 128>}, {pipeline_mode = #tpu.pipeline_mode<synchronous>, transform_indices = @transform_9, window_bounds = array<i64: 128, 128>}, {pipeline_mode = #tpu.pipeline_mode<synchronous>, transform_indices = @transform_10, window_bounds = array<i64: 1, 128>}, {pipeline_mode = #tpu.pipeline_mode<synchronous>, transform_indices = @transform_11, window_bounds = array<i64: 8, 1>}, {pipeline_mode = #tpu.pipeline_mode<synchronous>, transform_indices = @transform_12, window_bounds = array<i64: 8, 1>}, {pipeline_mode = #tpu.pipeline_mode<synchronous>, transform_indices = @transform_13, window_bounds = array<i64: 128, 384>}, {pipeline_mode = #tpu.pipeline_mode<synchronous>, transform_indices = @transform_14, window_bounds = array<i64: 1, 384>}, {pipeline_mode = #tpu.pipeline_mode<synchronous>, transform_indices = @transform_15, window_bounds = array<i64: 4, 32, 128>}, {pipeline_mode = #tpu.pipeline_mode<synchronous>, transform_indices = @transform_16, window_bounds = array<i64: 1, 128>}, {pipeline_mode = #tpu.pipeline_mode<synchronous>, transform_indices = @transform_17, window_bounds = array<i64: 128, 128>}, {pipeline_mode = #tpu.pipeline_mode<synchronous>, transform_indices = @transform_18, window_bounds = array<i64: 1, 128>}, {pipeline_mode = #tpu.pipeline_mode<synchronous>, transform_indices = @transform_19, window_bounds = array<i64: 8, 1>}, {pipeline_mode = #tpu.pipeline_mode<synchronous>, transform_indices = @transform_20, window_bounds = array<i64: 8, 1>}, {pipeline_mode = #tpu.pipeline_mode<synchronous>, transform_indices = @transform_21, window_bounds = array<i64: 128, 384>}, {pipeline_mode = #tpu.pipeline_mode<synchronous>, transform_indices = @transform_22, window_bounds = array<i64: 1, 384>}, {pipeline_mode = #tpu.pipeline_mode<synchronous>, transform_indices = @transform_23, window_bounds = array<i64: 4, 32, 128>}, {pipeline_mode = #tpu.pipeline_mode<synchronous>, transform_indices = @transform_24, window_bounds = array<i64: 1, 128>}, {pipeline_mode = #tpu.pipeline_mode<synchronous>, transform_indices = @transform_25, window_bounds = array<i64: 1, 128>}, {pipeline_mode = #tpu.pipeline_mode<synchronous>, transform_indices = @transform_26, window_bounds = array<i64: 1, 1>}, {pipeline_mode = #tpu.pipeline_mode<synchronous>, transform_indices = @transform_27, window_bounds = array<i64: 8, 1>}, {pipeline_mode = #tpu.pipeline_mode<synchronous>, transform_indices = @transform_28, window_bounds = array<i64: 1, 1>}, {pipeline_mode = #tpu.pipeline_mode<synchronous>, transform_indices = @transform_29, window_bounds = array<i64: 2, 1>}]} {
    %c0 = arith.constant 0 : index
    %c0_0 = arith.constant 0 : index
    %0 = vector.load %arg1[%c0, %c0_0] : memref<8x1xf32, #tpu.memory_space<vmem>>, vector<8x1xf32>
    %c0_1 = arith.constant 0 : index
    %c0_2 = arith.constant 0 : index
    %1 = vector.load %arg2[%c0_1, %c0_2] : memref<8x128xf32, #tpu.memory_space<vmem>>, vector<8x128xf32>
    %2 = vector.broadcast %0 : vector<8x1xf32> to vector<8x128xf32>
    %3 = arith.mulf %2, %1 : vector<8x128xf32>
    %c0_3 = arith.constant 0 : index
    %c0_4 = arith.constant 0 : index
    %4 = vector.load %arg3[%c0_3, %c0_4] : memref<8x128xf32, #tpu.memory_space<vmem>>, vector<8x128xf32>
    %5 = arith.addf %3, %4 : vector<8x128xf32>
    %cst = arith.constant 0.000000e+00 : f32
    %6 = vector.broadcast %cst : f32 to vector<8x128xf32>
    %7 = arith.maximumf %5, %6 : vector<8x128xf32>
    %c0_5 = arith.constant 0 : index
    %c0_6 = arith.constant 0 : index
    %8 = vector.load %arg4[%c0_5, %c0_6] : memref<8x8xf32, #tpu.memory_space<vmem>>, vector<8x8xf32>
    %9 = arith.truncf %7 : vector<8x128xf32> to vector<8x128xbf16>
    %c0_7 = arith.constant 0 : index
    %c0_8 = arith.constant 0 : index
    %10 = vector.load %arg6[%c0_7, %c0_8] : memref<128x384xbf16, #tpu.memory_space<vmem>>, vector<128x384xbf16>
    %cst_9 = arith.constant dense<0.000000e+00> : vector<8x384xf32>
    %11 = tpu.matmul %9, %10, %cst_9 {dimension_numbers = #tpu.dot_dimension_numbers<[1], [0], [0], [1], [0, 0, 1, 1], [], []>} : vector<8x128xbf16>, vector<128x384xbf16>, vector<8x384xf32> -> vector<8x384xf32>
    %c0_10 = arith.constant 0 : index
    %c0_11 = arith.constant 0 : index
    %12 = vector.load %arg7[%c0_10, %c0_11] : memref<1x384xf32, #tpu.memory_space<vmem>>, vector<1x384xf32>
    %13 = vector.broadcast %12 : vector<1x384xf32> to vector<8x384xf32>
    %14 = arith.addf %11, %13 : vector<8x384xf32>
    %c0_12 = arith.constant 0 : index
    %c0_13 = arith.constant 0 : index
    %c0_14 = arith.constant 0 : index
    %15 = vector.load %arg8[%c0_12, %c0_13, %c0_14] : memref<4x32x128xbf16, #tpu.memory_space<vmem>>, vector<4x32x128xbf16>
    %16 = vector.extract_strided_slice %14 {offsets = [0, 0], sizes = [4, 128], strides = [1, 1]} : vector<8x384xf32> to vector<4x128xf32>
    %cst_15 = arith.constant 0.176776692 : f32
    %17 = vector.broadcast %cst_15 : f32 to vector<4x128xf32>
    %18 = arith.mulf %16, %17 : vector<4x128xf32>
    %19 = vector.extract_strided_slice %14 {offsets = [0, 128], sizes = [4, 128], strides = [1, 1]} : vector<8x384xf32> to vector<4x128xf32>
    %20 = vector.extract_strided_slice %14 {offsets = [0, 256], sizes = [4, 128], strides = [1, 1]} : vector<8x384xf32> to vector<4x128xf32>
    %21 = vector.extract_strided_slice %18 {offsets = [0, 0], sizes = [4, 32], strides = [1, 1]} : vector<4x128xf32> to vector<4x32xf32>
    %22 = vector.extract_strided_slice %18 {offsets = [0, 32], sizes = [4, 32], strides = [1, 1]} : vector<4x128xf32> to vector<4x32xf32>
    %23 = vector.extract_strided_slice %18 {offsets = [0, 64], sizes = [4, 32], strides = [1, 1]} : vector<4x128xf32> to vector<4x32xf32>
    %24 = vector.extract_strided_slice %18 {offsets = [0, 96], sizes = [4, 32], strides = [1, 1]} : vector<4x128xf32> to vector<4x32xf32>
    %25 = vector.shape_cast %21 : vector<4x32xf32> to vector<1x4x32xf32>
    %26 = vector.shape_cast %22 : vector<4x32xf32> to vector<1x4x32xf32>
    %27 = vector.shape_cast %23 : vector<4x32xf32> to vector<1x4x32xf32>
    %28 = vector.shape_cast %24 : vector<4x32xf32> to vector<1x4x32xf32>
    %29 = tpu.concatenate %25, %26, %27, %28 in 0 : vector<1x4x32xf32>, vector<1x4x32xf32>, vector<1x4x32xf32>, vector<1x4x32xf32> -> vector<4x4x32xf32>
    %30 = vector.extract_strided_slice %19 {offsets = [0, 0], sizes = [4, 32], strides = [1, 1]} : vector<4x128xf32> to vector<4x32xf32>
    %31 = vector.extract_strided_slice %19 {offsets = [0, 32], sizes = [4, 32], strides = [1, 1]} : vector<4x128xf32> to vector<4x32xf32>
    %32 = vector.extract_strided_slice %19 {offsets = [0, 64], sizes = [4, 32], strides = [1, 1]} : vector<4x128xf32> to vector<4x32xf32>
    %33 = vector.extract_strided_slice %19 {offsets = [0, 96], sizes = [4, 32], strides = [1, 1]} : vector<4x128xf32> to vector<4x32xf32>
    %34 = vector.shape_cast %30 : vector<4x32xf32> to vector<1x4x32xf32>
    %35 = vector.shape_cast %31 : vector<4x32xf32> to vector<1x4x32xf32>
    %36 = vector.shape_cast %32 : vector<4x32xf32> to vector<1x4x32xf32>
    %37 = vector.shape_cast %33 : vector<4x32xf32> to vector<1x4x32xf32>
    %38 = tpu.concatenate %34, %35, %36, %37 in 0 : vector<1x4x32xf32>, vector<1x4x32xf32>, vector<1x4x32xf32>, vector<1x4x32xf32> -> vector<4x4x32xf32>
    %39 = vector.extract_strided_slice %20 {offsets = [0, 0], sizes = [4, 32], strides = [1, 1]} : vector<4x128xf32> to vector<4x32xf32>
    %40 = vector.extract_strided_slice %20 {offsets = [0, 32], sizes = [4, 32], strides = [1, 1]} : vector<4x128xf32> to vector<4x32xf32>
    %41 = vector.extract_strided_slice %20 {offsets = [0, 64], sizes = [4, 32], strides = [1, 1]} : vector<4x128xf32> to vector<4x32xf32>
    %42 = vector.extract_strided_slice %20 {offsets = [0, 96], sizes = [4, 32], strides = [1, 1]} : vector<4x128xf32> to vector<4x32xf32>
    %43 = vector.shape_cast %39 : vector<4x32xf32> to vector<1x4x32xf32>
    %44 = vector.shape_cast %40 : vector<4x32xf32> to vector<1x4x32xf32>
    %45 = vector.shape_cast %41 : vector<4x32xf32> to vector<1x4x32xf32>
    %46 = vector.shape_cast %42 : vector<4x32xf32> to vector<1x4x32xf32>
    %47 = tpu.concatenate %43, %44, %45, %46 in 0 : vector<1x4x32xf32>, vector<1x4x32xf32>, vector<1x4x32xf32>, vector<1x4x32xf32> -> vector<4x4x32xf32>
    "tpu.trace_start"() <{level = 10 : i32, message = "hqd,hkd->hqk"}> : () -> ()
    %cst_16 = arith.constant dense<0.000000e+00> : vector<4x4x4xf32>
    %48 = tpu.matmul %29, %38, %cst_16 {dimension_numbers = #tpu.dot_dimension_numbers<[2], [2], [1], [1], [0, 0, 0, 1, 1, 1], [0], [0]>} : vector<4x4x32xf32>, vector<4x4x32xf32>, vector<4x4x4xf32> -> vector<4x4x4xf32>
    "tpu.trace_stop"() : () -> ()
    %cst_17 = arith.constant dense<0xFF800000> : vector<4x4xf32>
    %49 = vector.multi_reduction <maximumf>, %48, %cst_17 [2] : vector<4x4x4xf32> to vector<4x4xf32>
    %50 = vector.shape_cast %49 : vector<4x4xf32> to vector<4x4x1xf32>
    %51 = vector.broadcast %50 : vector<4x4x1xf32> to vector<4x4x4xf32>
    %52 = arith.subf %48, %51 : vector<4x4x4xf32>
    %53 = math.exp %52 : vector<4x4x4xf32>
    %cst_18 = arith.constant dense<0.000000e+00> : vector<4x4xf32>
    %54 = vector.multi_reduction <add>, %53, %cst_18 [2] : vector<4x4x4xf32> to vector<4x4xf32>
    %55 = vector.shape_cast %54 : vector<4x4xf32> to vector<4x4x1xf32>
    %56 = vector.broadcast %55 : vector<4x4x1xf32> to vector<4x4x4xf32>
    %57 = arith.divf %53, %56 : vector<4x4x4xf32>
    "tpu.trace_start"() <{level = 10 : i32, message = "hqk,hkd->hqd"}> : () -> ()
    %cst_19 = arith.constant dense<0.000000e+00> : vector<4x4x32xf32>
    %58 = tpu.matmul %57, %47, %cst_19 {dimension_numbers = #tpu.dot_dimension_numbers<[2], [1], [1], [2], [0, 0, 0, 1, 1, 2], [0], [0]>} : vector<4x4x4xf32>, vector<4x4x32xf32>, vector<4x4x32xf32> -> vector<4x4x32xf32>
    "tpu.trace_stop"() : () -> ()
    %59 = arith.truncf %58 : vector<4x4x32xf32> to vector<4x4x32xbf16>
    "tpu.trace_start"() <{level = 10 : i32, message = "hqd,hdo->hqo"}> : () -> ()
    %cst_20 = arith.constant dense<0.000000e+00> : vector<4x4x128xf32>
    %60 = tpu.matmul %59, %15, %cst_20 {dimension_numbers = #tpu.dot_dimension_numbers<[2], [1], [1], [2], [0, 0, 0, 1, 1, 2], [0], [0]>} : vector<4x4x32xbf16>, vector<4x32x128xbf16>, vector<4x4x128xf32> -> vector<4x4x128xf32>
    "tpu.trace_stop"() : () -> ()
    %cst_21 = arith.constant dense<0.000000e+00> : vector<4x128xf32>
    %61 = vector.multi_reduction <add>, %60, %cst_21 [0] : vector<4x4x128xf32> to vector<4x128xf32>
    %62 = vector.extract_strided_slice %14 {offsets = [4, 0], sizes = [4, 128], strides = [1, 1]} : vector<8x384xf32> to vector<4x128xf32>
    %cst_22 = arith.constant 0.176776692 : f32
    %63 = vector.broadcast %cst_22 : f32 to vector<4x128xf32>
    %64 = arith.mulf %62, %63 : vector<4x128xf32>
    %65 = vector.extract_strided_slice %14 {offsets = [4, 128], sizes = [4, 128], strides = [1, 1]} : vector<8x384xf32> to vector<4x128xf32>
    %66 = vector.extract_strided_slice %14 {offsets = [4, 256], sizes = [4, 128], strides = [1, 1]} : vector<8x384xf32> to vector<4x128xf32>
    %67 = vector.extract_strided_slice %64 {offsets = [0, 0], sizes = [4, 32], strides = [1, 1]} : vector<4x128xf32> to vector<4x32xf32>
    %68 = vector.extract_strided_slice %64 {offsets = [0, 32], sizes = [4, 32], strides = [1, 1]} : vector<4x128xf32> to vector<4x32xf32>
    %69 = vector.extract_strided_slice %64 {offsets = [0, 64], sizes = [4, 32], strides = [1, 1]} : vector<4x128xf32> to vector<4x32xf32>
    %70 = vector.extract_strided_slice %64 {offsets = [0, 96], sizes = [4, 32], strides = [1, 1]} : vector<4x128xf32> to vector<4x32xf32>
    %71 = vector.shape_cast %67 : vector<4x32xf32> to vector<1x4x32xf32>
    %72 = vector.shape_cast %68 : vector<4x32xf32> to vector<1x4x32xf32>
    %73 = vector.shape_cast %69 : vector<4x32xf32> to vector<1x4x32xf32>
    %74 = vector.shape_cast %70 : vector<4x32xf32> to vector<1x4x32xf32>
    %75 = tpu.concatenate %71, %72, %73, %74 in 0 : vector<1x4x32xf32>, vector<1x4x32xf32>, vector<1x4x32xf32>, vector<1x4x32xf32> -> vector<4x4x32xf32>
    %76 = vector.extract_strided_slice %65 {offsets = [0, 0], sizes = [4, 32], strides = [1, 1]} : vector<4x128xf32> to vector<4x32xf32>
    %77 = vector.extract_strided_slice %65 {offsets = [0, 32], sizes = [4, 32], strides = [1, 1]} : vector<4x128xf32> to vector<4x32xf32>
    %78 = vector.extract_strided_slice %65 {offsets = [0, 64], sizes = [4, 32], strides = [1, 1]} : vector<4x128xf32> to vector<4x32xf32>
    %79 = vector.extract_strided_slice %65 {offsets = [0, 96], sizes = [4, 32], strides = [1, 1]} : vector<4x128xf32> to vector<4x32xf32>
    %80 = vector.shape_cast %76 : vector<4x32xf32> to vector<1x4x32xf32>
    %81 = vector.shape_cast %77 : vector<4x32xf32> to vector<1x4x32xf32>
    %82 = vector.shape_cast %78 : vector<4x32xf32> to vector<1x4x32xf32>
    %83 = vector.shape_cast %79 : vector<4x32xf32> to vector<1x4x32xf32>
    %84 = tpu.concatenate %80, %81, %82, %83 in 0 : vector<1x4x32xf32>, vector<1x4x32xf32>, vector<1x4x32xf32>, vector<1x4x32xf32> -> vector<4x4x32xf32>
    %85 = vector.extract_strided_slice %66 {offsets = [0, 0], sizes = [4, 32], strides = [1, 1]} : vector<4x128xf32> to vector<4x32xf32>
    %86 = vector.extract_strided_slice %66 {offsets = [0, 32], sizes = [4, 32], strides = [1, 1]} : vector<4x128xf32> to vector<4x32xf32>
    %87 = vector.extract_strided_slice %66 {offsets = [0, 64], sizes = [4, 32], strides = [1, 1]} : vector<4x128xf32> to vector<4x32xf32>
    %88 = vector.extract_strided_slice %66 {offsets = [0, 96], sizes = [4, 32], strides = [1, 1]} : vector<4x128xf32> to vector<4x32xf32>
    %89 = vector.shape_cast %85 : vector<4x32xf32> to vector<1x4x32xf32>
    %90 = vector.shape_cast %86 : vector<4x32xf32> to vector<1x4x32xf32>
    %91 = vector.shape_cast %87 : vector<4x32xf32> to vector<1x4x32xf32>
    %92 = vector.shape_cast %88 : vector<4x32xf32> to vector<1x4x32xf32>
    %93 = tpu.concatenate %89, %90, %91, %92 in 0 : vector<1x4x32xf32>, vector<1x4x32xf32>, vector<1x4x32xf32>, vector<1x4x32xf32> -> vector<4x4x32xf32>
    "tpu.trace_start"() <{level = 10 : i32, message = "hqd,hkd->hqk"}> : () -> ()
    %cst_23 = arith.constant dense<0.000000e+00> : vector<4x4x4xf32>
    %94 = tpu.matmul %75, %84, %cst_23 {dimension_numbers = #tpu.dot_dimension_numbers<[2], [2], [1], [1], [0, 0, 0, 1, 1, 1], [0], [0]>} : vector<4x4x32xf32>, vector<4x4x32xf32>, vector<4x4x4xf32> -> vector<4x4x4xf32>
    "tpu.trace_stop"() : () -> ()
    %cst_24 = arith.constant dense<0xFF800000> : vector<4x4xf32>
    %95 = vector.multi_reduction <maximumf>, %94, %cst_24 [2] : vector<4x4x4xf32> to vector<4x4xf32>
    %96 = vector.shape_cast %95 : vector<4x4xf32> to vector<4x4x1xf32>
    %97 = vector.broadcast %96 : vector<4x4x1xf32> to vector<4x4x4xf32>
    %98 = arith.subf %94, %97 : vector<4x4x4xf32>
    %99 = math.exp %98 : vector<4x4x4xf32>
    %cst_25 = arith.constant dense<0.000000e+00> : vector<4x4xf32>
    %100 = vector.multi_reduction <add>, %99, %cst_25 [2] : vector<4x4x4xf32> to vector<4x4xf32>
    %101 = vector.shape_cast %100 : vector<4x4xf32> to vector<4x4x1xf32>
    %102 = vector.broadcast %101 : vector<4x4x1xf32> to vector<4x4x4xf32>
    %103 = arith.divf %99, %102 : vector<4x4x4xf32>
    "tpu.trace_start"() <{level = 10 : i32, message = "hqk,hkd->hqd"}> : () -> ()
    %cst_26 = arith.constant dense<0.000000e+00> : vector<4x4x32xf32>
    %104 = tpu.matmul %103, %93, %cst_26 {dimension_numbers = #tpu.dot_dimension_numbers<[2], [1], [1], [2], [0, 0, 0, 1, 1, 2], [0], [0]>} : vector<4x4x4xf32>, vector<4x4x32xf32>, vector<4x4x32xf32> -> vector<4x4x32xf32>
    "tpu.trace_stop"() : () -> ()
    %105 = arith.truncf %104 : vector<4x4x32xf32> to vector<4x4x32xbf16>
    "tpu.trace_start"() <{level = 10 : i32, message = "hqd,hdo->hqo"}> : () -> ()
    %cst_27 = arith.constant dense<0.000000e+00> : vector<4x4x128xf32>
    %106 = tpu.matmul %105, %15, %cst_27 {dimension_numbers = #tpu.dot_dimension_numbers<[2], [1], [1], [2], [0, 0, 0, 1, 1, 2], [0], [0]>} : vector<4x4x32xbf16>, vector<4x32x128xbf16>, vector<4x4x128xf32> -> vector<4x4x128xf32>
    "tpu.trace_stop"() : () -> ()
    %cst_28 = arith.constant dense<0.000000e+00> : vector<4x128xf32>
    %107 = vector.multi_reduction <add>, %106, %cst_28 [0] : vector<4x4x128xf32> to vector<4x128xf32>
    %108 = tpu.concatenate %61, %107 in 0 : vector<4x128xf32>, vector<4x128xf32> -> vector<8x128xf32>
    %c0_29 = arith.constant 0 : index
    %c0_30 = arith.constant 0 : index
    %109 = vector.load %arg9[%c0_29, %c0_30] : memref<1x128xf32, #tpu.memory_space<vmem>>, vector<1x128xf32>
    %110 = vector.broadcast %109 : vector<1x128xf32> to vector<8x128xf32>
    %111 = arith.addf %108, %110 : vector<8x128xf32>
    %112 = arith.truncf %111 : vector<8x128xf32> to vector<8x128xbf16>
    %c0_31 = arith.constant 0 : index
    %c0_32 = arith.constant 0 : index
    %113 = vector.load %arg10[%c0_31, %c0_32] : memref<128x128xbf16, #tpu.memory_space<vmem>>, vector<128x128xbf16>
    %cst_33 = arith.constant dense<0.000000e+00> : vector<8x128xf32>
    %114 = tpu.matmul %112, %113, %cst_33 {dimension_numbers = #tpu.dot_dimension_numbers<[1], [0], [0], [1], [0, 0, 1, 1], [], []>} : vector<8x128xbf16>, vector<128x128xbf16>, vector<8x128xf32> -> vector<8x128xf32>
    %c0_34 = arith.constant 0 : index
    %c0_35 = arith.constant 0 : index
    %115 = vector.load %arg11[%c0_34, %c0_35] : memref<1x128xf32, #tpu.memory_space<vmem>>, vector<1x128xf32>
    %116 = vector.broadcast %115 : vector<1x128xf32> to vector<8x128xf32>
    %117 = arith.addf %114, %116 : vector<8x128xf32>
    %cst_36 = arith.constant 0.000000e+00 : f32
    %118 = vector.broadcast %cst_36 : f32 to vector<8x128xf32>
    %119 = arith.maximumf %117, %118 : vector<8x128xf32>
    %cst_37 = arith.constant dense<0.000000e+00> : vector<8xf32>
    %120 = vector.multi_reduction <add>, %119, %cst_37 [1] : vector<8x128xf32> to vector<8xf32>
    %121 = vector.shape_cast %120 : vector<8xf32> to vector<8x1xf32>
    %cst_38 = arith.constant dense<0.000000e+00> : vector<8x1xf32>
    %122 = tpu.matmul %8, %121, %cst_38 {dimension_numbers = #tpu.dot_dimension_numbers<[1], [0], [0], [1], [0, 0, 1, 1], [], []>} : vector<8x8xf32>, vector<8x1xf32>, vector<8x1xf32> -> vector<8x1xf32>
    %123 = vector.broadcast %122 : vector<8x1xf32> to vector<8x128xf32>
    %124 = arith.subf %119, %123 : vector<8x128xf32>
    %125 = arith.mulf %124, %124 : vector<8x128xf32>
    %cst_39 = arith.constant dense<0.000000e+00> : vector<8xf32>
    %126 = vector.multi_reduction <add>, %125, %cst_39 [1] : vector<8x128xf32> to vector<8xf32>
    %127 = vector.shape_cast %126 : vector<8xf32> to vector<8x1xf32>
    %cst_40 = arith.constant dense<0.000000e+00> : vector<8x1xf32>
    %128 = tpu.matmul %8, %127, %cst_40 {dimension_numbers = #tpu.dot_dimension_numbers<[1], [0], [0], [1], [0, 0, 1, 1], [], []>} : vector<8x8xf32>, vector<8x1xf32>, vector<8x1xf32> -> vector<8x1xf32>
    %cst_41 = arith.constant 9.99999974E-6 : f32
    %129 = vector.broadcast %cst_41 : f32 to vector<8x1xf32>
    %130 = arith.addf %128, %129 : vector<8x1xf32>
    %131 = math.rsqrt %130 : vector<8x1xf32>
    %132 = vector.broadcast %131 : vector<8x1xf32> to vector<8x128xf32>
    %133 = arith.mulf %124, %132 : vector<8x128xf32>
    %c0_42 = arith.constant 0 : index
    %c0_43 = arith.constant 0 : index
    %134 = vector.load %arg12[%c0_42, %c0_43] : memref<8x1xf32, #tpu.memory_space<vmem>>, vector<8x1xf32>
    %135 = vector.broadcast %134 : vector<8x1xf32> to vector<8x128xf32>
    %136 = arith.mulf %133, %135 : vector<8x128xf32>
    %c0_44 = arith.constant 0 : index
    %c0_45 = arith.constant 0 : index
    %137 = vector.load %arg13[%c0_44, %c0_45] : memref<8x1xf32, #tpu.memory_space<vmem>>, vector<8x1xf32>
    %138 = vector.broadcast %137 : vector<8x1xf32> to vector<8x128xf32>
    %139 = arith.addf %136, %138 : vector<8x128xf32>
    %140 = arith.truncf %139 : vector<8x128xf32> to vector<8x128xbf16>
    %c0_46 = arith.constant 0 : index
    %c0_47 = arith.constant 0 : index
    %141 = vector.load %arg14[%c0_46, %c0_47] : memref<128x384xbf16, #tpu.memory_space<vmem>>, vector<128x384xbf16>
    %cst_48 = arith.constant dense<0.000000e+00> : vector<8x384xf32>
    %142 = tpu.matmul %140, %141, %cst_48 {dimension_numbers = #tpu.dot_dimension_numbers<[1], [0], [0], [1], [0, 0, 1, 1], [], []>} : vector<8x128xbf16>, vector<128x384xbf16>, vector<8x384xf32> -> vector<8x384xf32>
    %c0_49 = arith.constant 0 : index
    %c0_50 = arith.constant 0 : index
    %143 = vector.load %arg15[%c0_49, %c0_50] : memref<1x384xf32, #tpu.memory_space<vmem>>, vector<1x384xf32>
    %144 = vector.broadcast %143 : vector<1x384xf32> to vector<8x384xf32>
    %145 = arith.addf %142, %144 : vector<8x384xf32>
    %c0_51 = arith.constant 0 : index
    %c0_52 = arith.constant 0 : index
    %c0_53 = arith.constant 0 : index
    %146 = vector.load %arg16[%c0_51, %c0_52, %c0_53] : memref<4x32x128xbf16, #tpu.memory_space<vmem>>, vector<4x32x128xbf16>
    %147 = vector.extract_strided_slice %145 {offsets = [0, 0], sizes = [4, 128], strides = [1, 1]} : vector<8x384xf32> to vector<4x128xf32>
    %cst_54 = arith.constant 0.176776692 : f32
    %148 = vector.broadcast %cst_54 : f32 to vector<4x128xf32>
    %149 = arith.mulf %147, %148 : vector<4x128xf32>
    %150 = vector.extract_strided_slice %145 {offsets = [0, 128], sizes = [4, 128], strides = [1, 1]} : vector<8x384xf32> to vector<4x128xf32>
    %151 = vector.extract_strided_slice %145 {offsets = [0, 256], sizes = [4, 128], strides = [1, 1]} : vector<8x384xf32> to vector<4x128xf32>
    %152 = vector.extract_strided_slice %149 {offsets = [0, 0], sizes = [4, 32], strides = [1, 1]} : vector<4x128xf32> to vector<4x32xf32>
    %153 = vector.extract_strided_slice %149 {offsets = [0, 32], sizes = [4, 32], strides = [1, 1]} : vector<4x128xf32> to vector<4x32xf32>
    %154 = vector.extract_strided_slice %149 {offsets = [0, 64], sizes = [4, 32], strides = [1, 1]} : vector<4x128xf32> to vector<4x32xf32>
    %155 = vector.extract_strided_slice %149 {offsets = [0, 96], sizes = [4, 32], strides = [1, 1]} : vector<4x128xf32> to vector<4x32xf32>
    %156 = vector.shape_cast %152 : vector<4x32xf32> to vector<1x4x32xf32>
    %157 = vector.shape_cast %153 : vector<4x32xf32> to vector<1x4x32xf32>
    %158 = vector.shape_cast %154 : vector<4x32xf32> to vector<1x4x32xf32>
    %159 = vector.shape_cast %155 : vector<4x32xf32> to vector<1x4x32xf32>
    %160 = tpu.concatenate %156, %157, %158, %159 in 0 : vector<1x4x32xf32>, vector<1x4x32xf32>, vector<1x4x32xf32>, vector<1x4x32xf32> -> vector<4x4x32xf32>
    %161 = vector.extract_strided_slice %150 {offsets = [0, 0], sizes = [4, 32], strides = [1, 1]} : vector<4x128xf32> to vector<4x32xf32>
    %162 = vector.extract_strided_slice %150 {offsets = [0, 32], sizes = [4, 32], strides = [1, 1]} : vector<4x128xf32> to vector<4x32xf32>
    %163 = vector.extract_strided_slice %150 {offsets = [0, 64], sizes = [4, 32], strides = [1, 1]} : vector<4x128xf32> to vector<4x32xf32>
    %164 = vector.extract_strided_slice %150 {offsets = [0, 96], sizes = [4, 32], strides = [1, 1]} : vector<4x128xf32> to vector<4x32xf32>
    %165 = vector.shape_cast %161 : vector<4x32xf32> to vector<1x4x32xf32>
    %166 = vector.shape_cast %162 : vector<4x32xf32> to vector<1x4x32xf32>
    %167 = vector.shape_cast %163 : vector<4x32xf32> to vector<1x4x32xf32>
    %168 = vector.shape_cast %164 : vector<4x32xf32> to vector<1x4x32xf32>
    %169 = tpu.concatenate %165, %166, %167, %168 in 0 : vector<1x4x32xf32>, vector<1x4x32xf32>, vector<1x4x32xf32>, vector<1x4x32xf32> -> vector<4x4x32xf32>
    %170 = vector.extract_strided_slice %151 {offsets = [0, 0], sizes = [4, 32], strides = [1, 1]} : vector<4x128xf32> to vector<4x32xf32>
    %171 = vector.extract_strided_slice %151 {offsets = [0, 32], sizes = [4, 32], strides = [1, 1]} : vector<4x128xf32> to vector<4x32xf32>
    %172 = vector.extract_strided_slice %151 {offsets = [0, 64], sizes = [4, 32], strides = [1, 1]} : vector<4x128xf32> to vector<4x32xf32>
    %173 = vector.extract_strided_slice %151 {offsets = [0, 96], sizes = [4, 32], strides = [1, 1]} : vector<4x128xf32> to vector<4x32xf32>
    %174 = vector.shape_cast %170 : vector<4x32xf32> to vector<1x4x32xf32>
    %175 = vector.shape_cast %171 : vector<4x32xf32> to vector<1x4x32xf32>
    %176 = vector.shape_cast %172 : vector<4x32xf32> to vector<1x4x32xf32>
    %177 = vector.shape_cast %173 : vector<4x32xf32> to vector<1x4x32xf32>
    %178 = tpu.concatenate %174, %175, %176, %177 in 0 : vector<1x4x32xf32>, vector<1x4x32xf32>, vector<1x4x32xf32>, vector<1x4x32xf32> -> vector<4x4x32xf32>
    "tpu.trace_start"() <{level = 10 : i32, message = "hqd,hkd->hqk"}> : () -> ()
    %cst_55 = arith.constant dense<0.000000e+00> : vector<4x4x4xf32>
    %179 = tpu.matmul %160, %169, %cst_55 {dimension_numbers = #tpu.dot_dimension_numbers<[2], [2], [1], [1], [0, 0, 0, 1, 1, 1], [0], [0]>} : vector<4x4x32xf32>, vector<4x4x32xf32>, vector<4x4x4xf32> -> vector<4x4x4xf32>
    "tpu.trace_stop"() : () -> ()
    %cst_56 = arith.constant dense<0xFF800000> : vector<4x4xf32>
    %180 = vector.multi_reduction <maximumf>, %179, %cst_56 [2] : vector<4x4x4xf32> to vector<4x4xf32>
    %181 = vector.shape_cast %180 : vector<4x4xf32> to vector<4x4x1xf32>
    %182 = vector.broadcast %181 : vector<4x4x1xf32> to vector<4x4x4xf32>
    %183 = arith.subf %179, %182 : vector<4x4x4xf32>
    %184 = math.exp %183 : vector<4x4x4xf32>
    %cst_57 = arith.constant dense<0.000000e+00> : vector<4x4xf32>
    %185 = vector.multi_reduction <add>, %184, %cst_57 [2] : vector<4x4x4xf32> to vector<4x4xf32>
    %186 = vector.shape_cast %185 : vector<4x4xf32> to vector<4x4x1xf32>
    %187 = vector.broadcast %186 : vector<4x4x1xf32> to vector<4x4x4xf32>
    %188 = arith.divf %184, %187 : vector<4x4x4xf32>
    "tpu.trace_start"() <{level = 10 : i32, message = "hqk,hkd->hqd"}> : () -> ()
    %cst_58 = arith.constant dense<0.000000e+00> : vector<4x4x32xf32>
    %189 = tpu.matmul %188, %178, %cst_58 {dimension_numbers = #tpu.dot_dimension_numbers<[2], [1], [1], [2], [0, 0, 0, 1, 1, 2], [0], [0]>} : vector<4x4x4xf32>, vector<4x4x32xf32>, vector<4x4x32xf32> -> vector<4x4x32xf32>
    "tpu.trace_stop"() : () -> ()
    %190 = arith.truncf %189 : vector<4x4x32xf32> to vector<4x4x32xbf16>
    "tpu.trace_start"() <{level = 10 : i32, message = "hqd,hdo->hqo"}> : () -> ()
    %cst_59 = arith.constant dense<0.000000e+00> : vector<4x4x128xf32>
    %191 = tpu.matmul %190, %146, %cst_59 {dimension_numbers = #tpu.dot_dimension_numbers<[2], [1], [1], [2], [0, 0, 0, 1, 1, 2], [0], [0]>} : vector<4x4x32xbf16>, vector<4x32x128xbf16>, vector<4x4x128xf32> -> vector<4x4x128xf32>
    "tpu.trace_stop"() : () -> ()
    %cst_60 = arith.constant dense<0.000000e+00> : vector<4x128xf32>
    %192 = vector.multi_reduction <add>, %191, %cst_60 [0] : vector<4x4x128xf32> to vector<4x128xf32>
    %193 = vector.extract_strided_slice %145 {offsets = [4, 0], sizes = [4, 128], strides = [1, 1]} : vector<8x384xf32> to vector<4x128xf32>
    %cst_61 = arith.constant 0.176776692 : f32
    %194 = vector.broadcast %cst_61 : f32 to vector<4x128xf32>
    %195 = arith.mulf %193, %194 : vector<4x128xf32>
    %196 = vector.extract_strided_slice %145 {offsets = [4, 128], sizes = [4, 128], strides = [1, 1]} : vector<8x384xf32> to vector<4x128xf32>
    %197 = vector.extract_strided_slice %145 {offsets = [4, 256], sizes = [4, 128], strides = [1, 1]} : vector<8x384xf32> to vector<4x128xf32>
    %198 = vector.extract_strided_slice %195 {offsets = [0, 0], sizes = [4, 32], strides = [1, 1]} : vector<4x128xf32> to vector<4x32xf32>
    %199 = vector.extract_strided_slice %195 {offsets = [0, 32], sizes = [4, 32], strides = [1, 1]} : vector<4x128xf32> to vector<4x32xf32>
    %200 = vector.extract_strided_slice %195 {offsets = [0, 64], sizes = [4, 32], strides = [1, 1]} : vector<4x128xf32> to vector<4x32xf32>
    %201 = vector.extract_strided_slice %195 {offsets = [0, 96], sizes = [4, 32], strides = [1, 1]} : vector<4x128xf32> to vector<4x32xf32>
    %202 = vector.shape_cast %198 : vector<4x32xf32> to vector<1x4x32xf32>
    %203 = vector.shape_cast %199 : vector<4x32xf32> to vector<1x4x32xf32>
    %204 = vector.shape_cast %200 : vector<4x32xf32> to vector<1x4x32xf32>
    %205 = vector.shape_cast %201 : vector<4x32xf32> to vector<1x4x32xf32>
    %206 = tpu.concatenate %202, %203, %204, %205 in 0 : vector<1x4x32xf32>, vector<1x4x32xf32>, vector<1x4x32xf32>, vector<1x4x32xf32> -> vector<4x4x32xf32>
    %207 = vector.extract_strided_slice %196 {offsets = [0, 0], sizes = [4, 32], strides = [1, 1]} : vector<4x128xf32> to vector<4x32xf32>
    %208 = vector.extract_strided_slice %196 {offsets = [0, 32], sizes = [4, 32], strides = [1, 1]} : vector<4x128xf32> to vector<4x32xf32>
    %209 = vector.extract_strided_slice %196 {offsets = [0, 64], sizes = [4, 32], strides = [1, 1]} : vector<4x128xf32> to vector<4x32xf32>
    %210 = vector.extract_strided_slice %196 {offsets = [0, 96], sizes = [4, 32], strides = [1, 1]} : vector<4x128xf32> to vector<4x32xf32>
    %211 = vector.shape_cast %207 : vector<4x32xf32> to vector<1x4x32xf32>
    %212 = vector.shape_cast %208 : vector<4x32xf32> to vector<1x4x32xf32>
    %213 = vector.shape_cast %209 : vector<4x32xf32> to vector<1x4x32xf32>
    %214 = vector.shape_cast %210 : vector<4x32xf32> to vector<1x4x32xf32>
    %215 = tpu.concatenate %211, %212, %213, %214 in 0 : vector<1x4x32xf32>, vector<1x4x32xf32>, vector<1x4x32xf32>, vector<1x4x32xf32> -> vector<4x4x32xf32>
    %216 = vector.extract_strided_slice %197 {offsets = [0, 0], sizes = [4, 32], strides = [1, 1]} : vector<4x128xf32> to vector<4x32xf32>
    %217 = vector.extract_strided_slice %197 {offsets = [0, 32], sizes = [4, 32], strides = [1, 1]} : vector<4x128xf32> to vector<4x32xf32>
    %218 = vector.extract_strided_slice %197 {offsets = [0, 64], sizes = [4, 32], strides = [1, 1]} : vector<4x128xf32> to vector<4x32xf32>
    %219 = vector.extract_strided_slice %197 {offsets = [0, 96], sizes = [4, 32], strides = [1, 1]} : vector<4x128xf32> to vector<4x32xf32>
    %220 = vector.shape_cast %216 : vector<4x32xf32> to vector<1x4x32xf32>
    %221 = vector.shape_cast %217 : vector<4x32xf32> to vector<1x4x32xf32>
    %222 = vector.shape_cast %218 : vector<4x32xf32> to vector<1x4x32xf32>
    %223 = vector.shape_cast %219 : vector<4x32xf32> to vector<1x4x32xf32>
    %224 = tpu.concatenate %220, %221, %222, %223 in 0 : vector<1x4x32xf32>, vector<1x4x32xf32>, vector<1x4x32xf32>, vector<1x4x32xf32> -> vector<4x4x32xf32>
    "tpu.trace_start"() <{level = 10 : i32, message = "hqd,hkd->hqk"}> : () -> ()
    %cst_62 = arith.constant dense<0.000000e+00> : vector<4x4x4xf32>
    %225 = tpu.matmul %206, %215, %cst_62 {dimension_numbers = #tpu.dot_dimension_numbers<[2], [2], [1], [1], [0, 0, 0, 1, 1, 1], [0], [0]>} : vector<4x4x32xf32>, vector<4x4x32xf32>, vector<4x4x4xf32> -> vector<4x4x4xf32>
    "tpu.trace_stop"() : () -> ()
    %cst_63 = arith.constant dense<0xFF800000> : vector<4x4xf32>
    %226 = vector.multi_reduction <maximumf>, %225, %cst_63 [2] : vector<4x4x4xf32> to vector<4x4xf32>
    %227 = vector.shape_cast %226 : vector<4x4xf32> to vector<4x4x1xf32>
    %228 = vector.broadcast %227 : vector<4x4x1xf32> to vector<4x4x4xf32>
    %229 = arith.subf %225, %228 : vector<4x4x4xf32>
    %230 = math.exp %229 : vector<4x4x4xf32>
    %cst_64 = arith.constant dense<0.000000e+00> : vector<4x4xf32>
    %231 = vector.multi_reduction <add>, %230, %cst_64 [2] : vector<4x4x4xf32> to vector<4x4xf32>
    %232 = vector.shape_cast %231 : vector<4x4xf32> to vector<4x4x1xf32>
    %233 = vector.broadcast %232 : vector<4x4x1xf32> to vector<4x4x4xf32>
    %234 = arith.divf %230, %233 : vector<4x4x4xf32>
    "tpu.trace_start"() <{level = 10 : i32, message = "hqk,hkd->hqd"}> : () -> ()
    %cst_65 = arith.constant dense<0.000000e+00> : vector<4x4x32xf32>
    %235 = tpu.matmul %234, %224, %cst_65 {dimension_numbers = #tpu.dot_dimension_numbers<[2], [1], [1], [2], [0, 0, 0, 1, 1, 2], [0], [0]>} : vector<4x4x4xf32>, vector<4x4x32xf32>, vector<4x4x32xf32> -> vector<4x4x32xf32>
    "tpu.trace_stop"() : () -> ()
    %236 = arith.truncf %235 : vector<4x4x32xf32> to vector<4x4x32xbf16>
    "tpu.trace_start"() <{level = 10 : i32, message = "hqd,hdo->hqo"}> : () -> ()
    %cst_66 = arith.constant dense<0.000000e+00> : vector<4x4x128xf32>
    %237 = tpu.matmul %236, %146, %cst_66 {dimension_numbers = #tpu.dot_dimension_numbers<[2], [1], [1], [2], [0, 0, 0, 1, 1, 2], [0], [0]>} : vector<4x4x32xbf16>, vector<4x32x128xbf16>, vector<4x4x128xf32> -> vector<4x4x128xf32>
    "tpu.trace_stop"() : () -> ()
    %cst_67 = arith.constant dense<0.000000e+00> : vector<4x128xf32>
    %238 = vector.multi_reduction <add>, %237, %cst_67 [0] : vector<4x4x128xf32> to vector<4x128xf32>
    %239 = tpu.concatenate %192, %238 in 0 : vector<4x128xf32>, vector<4x128xf32> -> vector<8x128xf32>
    %c0_68 = arith.constant 0 : index
    %c0_69 = arith.constant 0 : index
    %240 = vector.load %arg17[%c0_68, %c0_69] : memref<1x128xf32, #tpu.memory_space<vmem>>, vector<1x128xf32>
    %241 = vector.broadcast %240 : vector<1x128xf32> to vector<8x128xf32>
    %242 = arith.addf %239, %241 : vector<8x128xf32>
    %243 = arith.truncf %242 : vector<8x128xf32> to vector<8x128xbf16>
    %c0_70 = arith.constant 0 : index
    %c0_71 = arith.constant 0 : index
    %244 = vector.load %arg18[%c0_70, %c0_71] : memref<128x128xbf16, #tpu.memory_space<vmem>>, vector<128x128xbf16>
    %cst_72 = arith.constant dense<0.000000e+00> : vector<8x128xf32>
    %245 = tpu.matmul %243, %244, %cst_72 {dimension_numbers = #tpu.dot_dimension_numbers<[1], [0], [0], [1], [0, 0, 1, 1], [], []>} : vector<8x128xbf16>, vector<128x128xbf16>, vector<8x128xf32> -> vector<8x128xf32>
    %c0_73 = arith.constant 0 : index
    %c0_74 = arith.constant 0 : index
    %246 = vector.load %arg19[%c0_73, %c0_74] : memref<1x128xf32, #tpu.memory_space<vmem>>, vector<1x128xf32>
    %247 = vector.broadcast %246 : vector<1x128xf32> to vector<8x128xf32>
    %248 = arith.addf %245, %247 : vector<8x128xf32>
    %cst_75 = arith.constant 0.000000e+00 : f32
    %249 = vector.broadcast %cst_75 : f32 to vector<8x128xf32>
    %250 = arith.maximumf %248, %249 : vector<8x128xf32>
    %cst_76 = arith.constant dense<0.000000e+00> : vector<8xf32>
    %251 = vector.multi_reduction <add>, %250, %cst_76 [1] : vector<8x128xf32> to vector<8xf32>
    %252 = vector.shape_cast %251 : vector<8xf32> to vector<8x1xf32>
    %cst_77 = arith.constant dense<0.000000e+00> : vector<8x1xf32>
    %253 = tpu.matmul %8, %252, %cst_77 {dimension_numbers = #tpu.dot_dimension_numbers<[1], [0], [0], [1], [0, 0, 1, 1], [], []>} : vector<8x8xf32>, vector<8x1xf32>, vector<8x1xf32> -> vector<8x1xf32>
    %254 = vector.broadcast %253 : vector<8x1xf32> to vector<8x128xf32>
    %255 = arith.subf %250, %254 : vector<8x128xf32>
    %256 = arith.mulf %255, %255 : vector<8x128xf32>
    %cst_78 = arith.constant dense<0.000000e+00> : vector<8xf32>
    %257 = vector.multi_reduction <add>, %256, %cst_78 [1] : vector<8x128xf32> to vector<8xf32>
    %258 = vector.shape_cast %257 : vector<8xf32> to vector<8x1xf32>
    %cst_79 = arith.constant dense<0.000000e+00> : vector<8x1xf32>
    %259 = tpu.matmul %8, %258, %cst_79 {dimension_numbers = #tpu.dot_dimension_numbers<[1], [0], [0], [1], [0, 0, 1, 1], [], []>} : vector<8x8xf32>, vector<8x1xf32>, vector<8x1xf32> -> vector<8x1xf32>
    %cst_80 = arith.constant 9.99999974E-6 : f32
    %260 = vector.broadcast %cst_80 : f32 to vector<8x1xf32>
    %261 = arith.addf %259, %260 : vector<8x1xf32>
    %262 = math.rsqrt %261 : vector<8x1xf32>
    %263 = vector.broadcast %262 : vector<8x1xf32> to vector<8x128xf32>
    %264 = arith.mulf %255, %263 : vector<8x128xf32>
    %c0_81 = arith.constant 0 : index
    %c0_82 = arith.constant 0 : index
    %265 = vector.load %arg20[%c0_81, %c0_82] : memref<8x1xf32, #tpu.memory_space<vmem>>, vector<8x1xf32>
    %266 = vector.broadcast %265 : vector<8x1xf32> to vector<8x128xf32>
    %267 = arith.mulf %264, %266 : vector<8x128xf32>
    %c0_83 = arith.constant 0 : index
    %c0_84 = arith.constant 0 : index
    %268 = vector.load %arg21[%c0_83, %c0_84] : memref<8x1xf32, #tpu.memory_space<vmem>>, vector<8x1xf32>
    %269 = vector.broadcast %268 : vector<8x1xf32> to vector<8x128xf32>
    %270 = arith.addf %267, %269 : vector<8x128xf32>
    %271 = arith.truncf %270 : vector<8x128xf32> to vector<8x128xbf16>
    %c0_85 = arith.constant 0 : index
    %c0_86 = arith.constant 0 : index
    %272 = vector.load %arg22[%c0_85, %c0_86] : memref<128x384xbf16, #tpu.memory_space<vmem>>, vector<128x384xbf16>
    %cst_87 = arith.constant dense<0.000000e+00> : vector<8x384xf32>
    %273 = tpu.matmul %271, %272, %cst_87 {dimension_numbers = #tpu.dot_dimension_numbers<[1], [0], [0], [1], [0, 0, 1, 1], [], []>} : vector<8x128xbf16>, vector<128x384xbf16>, vector<8x384xf32> -> vector<8x384xf32>
    %c0_88 = arith.constant 0 : index
    %c0_89 = arith.constant 0 : index
    %274 = vector.load %arg23[%c0_88, %c0_89] : memref<1x384xf32, #tpu.memory_space<vmem>>, vector<1x384xf32>
    %275 = vector.broadcast %274 : vector<1x384xf32> to vector<8x384xf32>
    %276 = arith.addf %273, %275 : vector<8x384xf32>
    %c0_90 = arith.constant 0 : index
    %c0_91 = arith.constant 0 : index
    %c0_92 = arith.constant 0 : index
    %277 = vector.load %arg24[%c0_90, %c0_91, %c0_92] : memref<4x32x128xbf16, #tpu.memory_space<vmem>>, vector<4x32x128xbf16>
    %278 = vector.extract_strided_slice %276 {offsets = [0, 0], sizes = [4, 128], strides = [1, 1]} : vector<8x384xf32> to vector<4x128xf32>
    %cst_93 = arith.constant 0.176776692 : f32
    %279 = vector.broadcast %cst_93 : f32 to vector<4x128xf32>
    %280 = arith.mulf %278, %279 : vector<4x128xf32>
    %281 = vector.extract_strided_slice %276 {offsets = [0, 128], sizes = [4, 128], strides = [1, 1]} : vector<8x384xf32> to vector<4x128xf32>
    %282 = vector.extract_strided_slice %276 {offsets = [0, 256], sizes = [4, 128], strides = [1, 1]} : vector<8x384xf32> to vector<4x128xf32>
    %283 = vector.extract_strided_slice %280 {offsets = [0, 0], sizes = [4, 32], strides = [1, 1]} : vector<4x128xf32> to vector<4x32xf32>
    %284 = vector.extract_strided_slice %280 {offsets = [0, 32], sizes = [4, 32], strides = [1, 1]} : vector<4x128xf32> to vector<4x32xf32>
    %285 = vector.extract_strided_slice %280 {offsets = [0, 64], sizes = [4, 32], strides = [1, 1]} : vector<4x128xf32> to vector<4x32xf32>
    %286 = vector.extract_strided_slice %280 {offsets = [0, 96], sizes = [4, 32], strides = [1, 1]} : vector<4x128xf32> to vector<4x32xf32>
    %287 = vector.shape_cast %283 : vector<4x32xf32> to vector<1x4x32xf32>
    %288 = vector.shape_cast %284 : vector<4x32xf32> to vector<1x4x32xf32>
    %289 = vector.shape_cast %285 : vector<4x32xf32> to vector<1x4x32xf32>
    %290 = vector.shape_cast %286 : vector<4x32xf32> to vector<1x4x32xf32>
    %291 = tpu.concatenate %287, %288, %289, %290 in 0 : vector<1x4x32xf32>, vector<1x4x32xf32>, vector<1x4x32xf32>, vector<1x4x32xf32> -> vector<4x4x32xf32>
    %292 = vector.extract_strided_slice %281 {offsets = [0, 0], sizes = [4, 32], strides = [1, 1]} : vector<4x128xf32> to vector<4x32xf32>
    %293 = vector.extract_strided_slice %281 {offsets = [0, 32], sizes = [4, 32], strides = [1, 1]} : vector<4x128xf32> to vector<4x32xf32>
    %294 = vector.extract_strided_slice %281 {offsets = [0, 64], sizes = [4, 32], strides = [1, 1]} : vector<4x128xf32> to vector<4x32xf32>
    %295 = vector.extract_strided_slice %281 {offsets = [0, 96], sizes = [4, 32], strides = [1, 1]} : vector<4x128xf32> to vector<4x32xf32>
    %296 = vector.shape_cast %292 : vector<4x32xf32> to vector<1x4x32xf32>
    %297 = vector.shape_cast %293 : vector<4x32xf32> to vector<1x4x32xf32>
    %298 = vector.shape_cast %294 : vector<4x32xf32> to vector<1x4x32xf32>
    %299 = vector.shape_cast %295 : vector<4x32xf32> to vector<1x4x32xf32>
    %300 = tpu.concatenate %296, %297, %298, %299 in 0 : vector<1x4x32xf32>, vector<1x4x32xf32>, vector<1x4x32xf32>, vector<1x4x32xf32> -> vector<4x4x32xf32>
    %301 = vector.extract_strided_slice %282 {offsets = [0, 0], sizes = [4, 32], strides = [1, 1]} : vector<4x128xf32> to vector<4x32xf32>
    %302 = vector.extract_strided_slice %282 {offsets = [0, 32], sizes = [4, 32], strides = [1, 1]} : vector<4x128xf32> to vector<4x32xf32>
    %303 = vector.extract_strided_slice %282 {offsets = [0, 64], sizes = [4, 32], strides = [1, 1]} : vector<4x128xf32> to vector<4x32xf32>
    %304 = vector.extract_strided_slice %282 {offsets = [0, 96], sizes = [4, 32], strides = [1, 1]} : vector<4x128xf32> to vector<4x32xf32>
    %305 = vector.shape_cast %301 : vector<4x32xf32> to vector<1x4x32xf32>
    %306 = vector.shape_cast %302 : vector<4x32xf32> to vector<1x4x32xf32>
    %307 = vector.shape_cast %303 : vector<4x32xf32> to vector<1x4x32xf32>
    %308 = vector.shape_cast %304 : vector<4x32xf32> to vector<1x4x32xf32>
    %309 = tpu.concatenate %305, %306, %307, %308 in 0 : vector<1x4x32xf32>, vector<1x4x32xf32>, vector<1x4x32xf32>, vector<1x4x32xf32> -> vector<4x4x32xf32>
    "tpu.trace_start"() <{level = 10 : i32, message = "hqd,hkd->hqk"}> : () -> ()
    %cst_94 = arith.constant dense<0.000000e+00> : vector<4x4x4xf32>
    %310 = tpu.matmul %291, %300, %cst_94 {dimension_numbers = #tpu.dot_dimension_numbers<[2], [2], [1], [1], [0, 0, 0, 1, 1, 1], [0], [0]>} : vector<4x4x32xf32>, vector<4x4x32xf32>, vector<4x4x4xf32> -> vector<4x4x4xf32>
    "tpu.trace_stop"() : () -> ()
    %cst_95 = arith.constant dense<0xFF800000> : vector<4x4xf32>
    %311 = vector.multi_reduction <maximumf>, %310, %cst_95 [2] : vector<4x4x4xf32> to vector<4x4xf32>
    %312 = vector.shape_cast %311 : vector<4x4xf32> to vector<4x4x1xf32>
    %313 = vector.broadcast %312 : vector<4x4x1xf32> to vector<4x4x4xf32>
    %314 = arith.subf %310, %313 : vector<4x4x4xf32>
    %315 = math.exp %314 : vector<4x4x4xf32>
    %cst_96 = arith.constant dense<0.000000e+00> : vector<4x4xf32>
    %316 = vector.multi_reduction <add>, %315, %cst_96 [2] : vector<4x4x4xf32> to vector<4x4xf32>
    %317 = vector.shape_cast %316 : vector<4x4xf32> to vector<4x4x1xf32>
    %318 = vector.broadcast %317 : vector<4x4x1xf32> to vector<4x4x4xf32>
    %319 = arith.divf %315, %318 : vector<4x4x4xf32>
    "tpu.trace_start"() <{level = 10 : i32, message = "hqk,hkd->hqd"}> : () -> ()
    %cst_97 = arith.constant dense<0.000000e+00> : vector<4x4x32xf32>
    %320 = tpu.matmul %319, %309, %cst_97 {dimension_numbers = #tpu.dot_dimension_numbers<[2], [1], [1], [2], [0, 0, 0, 1, 1, 2], [0], [0]>} : vector<4x4x4xf32>, vector<4x4x32xf32>, vector<4x4x32xf32> -> vector<4x4x32xf32>
    "tpu.trace_stop"() : () -> ()
    %321 = arith.truncf %320 : vector<4x4x32xf32> to vector<4x4x32xbf16>
    "tpu.trace_start"() <{level = 10 : i32, message = "hqd,hdo->hqo"}> : () -> ()
    %cst_98 = arith.constant dense<0.000000e+00> : vector<4x4x128xf32>
    %322 = tpu.matmul %321, %277, %cst_98 {dimension_numbers = #tpu.dot_dimension_numbers<[2], [1], [1], [2], [0, 0, 0, 1, 1, 2], [0], [0]>} : vector<4x4x32xbf16>, vector<4x32x128xbf16>, vector<4x4x128xf32> -> vector<4x4x128xf32>
    "tpu.trace_stop"() : () -> ()
    %cst_99 = arith.constant dense<0.000000e+00> : vector<4x128xf32>
    %323 = vector.multi_reduction <add>, %322, %cst_99 [0] : vector<4x4x128xf32> to vector<4x128xf32>
    %324 = vector.extract_strided_slice %276 {offsets = [4, 0], sizes = [4, 128], strides = [1, 1]} : vector<8x384xf32> to vector<4x128xf32>
    %cst_100 = arith.constant 0.176776692 : f32
    %325 = vector.broadcast %cst_100 : f32 to vector<4x128xf32>
    %326 = arith.mulf %324, %325 : vector<4x128xf32>
    %327 = vector.extract_strided_slice %276 {offsets = [4, 128], sizes = [4, 128], strides = [1, 1]} : vector<8x384xf32> to vector<4x128xf32>
    %328 = vector.extract_strided_slice %276 {offsets = [4, 256], sizes = [4, 128], strides = [1, 1]} : vector<8x384xf32> to vector<4x128xf32>
    %329 = vector.extract_strided_slice %326 {offsets = [0, 0], sizes = [4, 32], strides = [1, 1]} : vector<4x128xf32> to vector<4x32xf32>
    %330 = vector.extract_strided_slice %326 {offsets = [0, 32], sizes = [4, 32], strides = [1, 1]} : vector<4x128xf32> to vector<4x32xf32>
    %331 = vector.extract_strided_slice %326 {offsets = [0, 64], sizes = [4, 32], strides = [1, 1]} : vector<4x128xf32> to vector<4x32xf32>
    %332 = vector.extract_strided_slice %326 {offsets = [0, 96], sizes = [4, 32], strides = [1, 1]} : vector<4x128xf32> to vector<4x32xf32>
    %333 = vector.shape_cast %329 : vector<4x32xf32> to vector<1x4x32xf32>
    %334 = vector.shape_cast %330 : vector<4x32xf32> to vector<1x4x32xf32>
    %335 = vector.shape_cast %331 : vector<4x32xf32> to vector<1x4x32xf32>
    %336 = vector.shape_cast %332 : vector<4x32xf32> to vector<1x4x32xf32>
    %337 = tpu.concatenate %333, %334, %335, %336 in 0 : vector<1x4x32xf32>, vector<1x4x32xf32>, vector<1x4x32xf32>, vector<1x4x32xf32> -> vector<4x4x32xf32>
    %338 = vector.extract_strided_slice %327 {offsets = [0, 0], sizes = [4, 32], strides = [1, 1]} : vector<4x128xf32> to vector<4x32xf32>
    %339 = vector.extract_strided_slice %327 {offsets = [0, 32], sizes = [4, 32], strides = [1, 1]} : vector<4x128xf32> to vector<4x32xf32>
    %340 = vector.extract_strided_slice %327 {offsets = [0, 64], sizes = [4, 32], strides = [1, 1]} : vector<4x128xf32> to vector<4x32xf32>
    %341 = vector.extract_strided_slice %327 {offsets = [0, 96], sizes = [4, 32], strides = [1, 1]} : vector<4x128xf32> to vector<4x32xf32>
    %342 = vector.shape_cast %338 : vector<4x32xf32> to vector<1x4x32xf32>
    %343 = vector.shape_cast %339 : vector<4x32xf32> to vector<1x4x32xf32>
    %344 = vector.shape_cast %340 : vector<4x32xf32> to vector<1x4x32xf32>
    %345 = vector.shape_cast %341 : vector<4x32xf32> to vector<1x4x32xf32>
    %346 = tpu.concatenate %342, %343, %344, %345 in 0 : vector<1x4x32xf32>, vector<1x4x32xf32>, vector<1x4x32xf32>, vector<1x4x32xf32> -> vector<4x4x32xf32>
    %347 = vector.extract_strided_slice %328 {offsets = [0, 0], sizes = [4, 32], strides = [1, 1]} : vector<4x128xf32> to vector<4x32xf32>
    %348 = vector.extract_strided_slice %328 {offsets = [0, 32], sizes = [4, 32], strides = [1, 1]} : vector<4x128xf32> to vector<4x32xf32>
    %349 = vector.extract_strided_slice %328 {offsets = [0, 64], sizes = [4, 32], strides = [1, 1]} : vector<4x128xf32> to vector<4x32xf32>
    %350 = vector.extract_strided_slice %328 {offsets = [0, 96], sizes = [4, 32], strides = [1, 1]} : vector<4x128xf32> to vector<4x32xf32>
    %351 = vector.shape_cast %347 : vector<4x32xf32> to vector<1x4x32xf32>
    %352 = vector.shape_cast %348 : vector<4x32xf32> to vector<1x4x32xf32>
    %353 = vector.shape_cast %349 : vector<4x32xf32> to vector<1x4x32xf32>
    %354 = vector.shape_cast %350 : vector<4x32xf32> to vector<1x4x32xf32>
    %355 = tpu.concatenate %351, %352, %353, %354 in 0 : vector<1x4x32xf32>, vector<1x4x32xf32>, vector<1x4x32xf32>, vector<1x4x32xf32> -> vector<4x4x32xf32>
    "tpu.trace_start"() <{level = 10 : i32, message = "hqd,hkd->hqk"}> : () -> ()
    %cst_101 = arith.constant dense<0.000000e+00> : vector<4x4x4xf32>
    %356 = tpu.matmul %337, %346, %cst_101 {dimension_numbers = #tpu.dot_dimension_numbers<[2], [2], [1], [1], [0, 0, 0, 1, 1, 1], [0], [0]>} : vector<4x4x32xf32>, vector<4x4x32xf32>, vector<4x4x4xf32> -> vector<4x4x4xf32>
    "tpu.trace_stop"() : () -> ()
    %cst_102 = arith.constant dense<0xFF800000> : vector<4x4xf32>
    %357 = vector.multi_reduction <maximumf>, %356, %cst_102 [2] : vector<4x4x4xf32> to vector<4x4xf32>
    %358 = vector.shape_cast %357 : vector<4x4xf32> to vector<4x4x1xf32>
    %359 = vector.broadcast %358 : vector<4x4x1xf32> to vector<4x4x4xf32>
    %360 = arith.subf %356, %359 : vector<4x4x4xf32>
    %361 = math.exp %360 : vector<4x4x4xf32>
    %cst_103 = arith.constant dense<0.000000e+00> : vector<4x4xf32>
    %362 = vector.multi_reduction <add>, %361, %cst_103 [2] : vector<4x4x4xf32> to vector<4x4xf32>
    %363 = vector.shape_cast %362 : vector<4x4xf32> to vector<4x4x1xf32>
    %364 = vector.broadcast %363 : vector<4x4x1xf32> to vector<4x4x4xf32>
    %365 = arith.divf %361, %364 : vector<4x4x4xf32>
    "tpu.trace_start"() <{level = 10 : i32, message = "hqk,hkd->hqd"}> : () -> ()
    %cst_104 = arith.constant dense<0.000000e+00> : vector<4x4x32xf32>
    %366 = tpu.matmul %365, %355, %cst_104 {dimension_numbers = #tpu.dot_dimension_numbers<[2], [1], [1], [2], [0, 0, 0, 1, 1, 2], [0], [0]>} : vector<4x4x4xf32>, vector<4x4x32xf32>, vector<4x4x32xf32> -> vector<4x4x32xf32>
    "tpu.trace_stop"() : () -> ()
    %367 = arith.truncf %366 : vector<4x4x32xf32> to vector<4x4x32xbf16>
    "tpu.trace_start"() <{level = 10 : i32, message = "hqd,hdo->hqo"}> : () -> ()
    %cst_105 = arith.constant dense<0.000000e+00> : vector<4x4x128xf32>
    %368 = tpu.matmul %367, %277, %cst_105 {dimension_numbers = #tpu.dot_dimension_numbers<[2], [1], [1], [2], [0, 0, 0, 1, 1, 2], [0], [0]>} : vector<4x4x32xbf16>, vector<4x32x128xbf16>, vector<4x4x128xf32> -> vector<4x4x128xf32>
    "tpu.trace_stop"() : () -> ()
    %cst_106 = arith.constant dense<0.000000e+00> : vector<4x128xf32>
    %369 = vector.multi_reduction <add>, %368, %cst_106 [0] : vector<4x4x128xf32> to vector<4x128xf32>
    %370 = tpu.concatenate %323, %369 in 0 : vector<4x128xf32>, vector<4x128xf32> -> vector<8x128xf32>
    %c0_107 = arith.constant 0 : index
    %c0_108 = arith.constant 0 : index
    %371 = vector.load %arg25[%c0_107, %c0_108] : memref<1x128xf32, #tpu.memory_space<vmem>>, vector<1x128xf32>
    %372 = vector.broadcast %371 : vector<1x128xf32> to vector<8x128xf32>
    %373 = arith.addf %370, %372 : vector<8x128xf32>
    %c0_109 = arith.constant 0 : index
    %c0_110 = arith.constant 0 : index
    %374 = vector.load %arg26[%c0_109, %c0_110] : memref<1x128xf32, #tpu.memory_space<vmem>>, vector<1x128xf32>
    %375 = vector.broadcast %374 : vector<1x128xf32> to vector<8x128xf32>
    %376 = arith.mulf %373, %375 : vector<8x128xf32>
    %cst_111 = arith.constant dense<0.000000e+00> : vector<8xf32>
    %377 = vector.multi_reduction <add>, %376, %cst_111 [1] : vector<8x128xf32> to vector<8xf32>
    %378 = vector.shape_cast %377 : vector<8xf32> to vector<8x1xf32>
    %c0_112 = arith.constant 0 : index
    %c0_113 = arith.constant 0 : index
    %379 = vector.load %arg27[%c0_112, %c0_113] : memref<1x1xf32, #tpu.memory_space<vmem>>, vector<1x1xf32>
    %380 = vector.broadcast %379 : vector<1x1xf32> to vector<8x1xf32>
    %381 = arith.addf %378, %380 : vector<8x1xf32>
    %cst_114 = arith.constant 0.000000e+00 : f32
    %382 = vector.broadcast %cst_114 : f32 to vector<8x1xf32>
    %383 = arith.maximumf %381, %382 : vector<8x1xf32>
    %c0_115 = arith.constant 0 : index
    %c0_116 = arith.constant 0 : index
    %384 = vector.load %arg5[%c0_115, %c0_116] : memref<2x8xf32, #tpu.memory_space<vmem>>, vector<2x8xf32>
    %c0_117 = arith.constant 0 : index
    %c0_118 = arith.constant 0 : index
    %385 = vector.load %arg28[%c0_117, %c0_118] : memref<8x1xf32, #tpu.memory_space<vmem>>, vector<8x1xf32>
    %386 = arith.mulf %383, %385 : vector<8x1xf32>
    %cst_119 = arith.constant dense<0.000000e+00> : vector<2x1xf32>
    %387 = tpu.matmul %384, %386, %cst_119 {dimension_numbers = #tpu.dot_dimension_numbers<[1], [0], [0], [1], [0, 0, 1, 1], [], []>} : vector<2x8xf32>, vector<8x1xf32>, vector<2x1xf32> -> vector<2x1xf32>
    %c0_120 = arith.constant 0 : index
    %c0_121 = arith.constant 0 : index
    %388 = vector.load %arg29[%c0_120, %c0_121] : memref<1x1xf32, #tpu.memory_space<vmem>>, vector<1x1xf32>
    %389 = vector.broadcast %388 : vector<1x1xf32> to vector<2x1xf32>
    %390 = arith.addf %387, %389 : vector<2x1xf32>
    %c0_122 = arith.constant 0 : index
    %c0_123 = arith.constant 0 : index
    %391 = vector.load %arg30[%c0_122, %c0_123] : memref<2x1xf32, #tpu.memory_space<vmem>>, vector<2x1xf32>
    tpu.vector_store %arg30[%c0_122, %c0_123], %390 {strides = array<i32>} : memref<2x1xf32, #tpu.memory_space<vmem>>, vector<2x1xf32>,
    return
  }
  func.func @transform_0(%arg0: i32) -> (i32, i32) {
    %c0_i32 = arith.constant 0 : i32
    %c0_i32_0 = arith.constant 0 : i32
    %c0_i32_1 = arith.constant 0 : i32
    return %c0_i32, %c0_i32_0 : i32, i32
  }
  func.func @transform_1(%arg0: i32) -> (i32, i32) {
    %c0_i32 = arith.constant 0 : i32
    %c0_i32_0 = arith.constant 0 : i32
    %c0_i32_1 = arith.constant 0 : i32
    return %c0_i32, %c0_i32_0 : i32, i32
  }
  func.func @transform_2(%arg0: i32) -> (i32, i32) {
    %c0_i32 = arith.constant 0 : i32
    %c0_i32_0 = arith.constant 0 : i32
    %c0_i32_1 = arith.constant 0 : i32
    return %c0_i32, %c0_i32_0 : i32, i32
  }
  func.func @transform_3(%arg0: i32) -> (i32, i32) {
    %c0_i32 = arith.constant 0 : i32
    %c0_i32_0 = arith.constant 0 : i32
    %c0_i32_1 = arith.constant 0 : i32
    return %c0_i32, %c0_i32_0 : i32, i32
  }
  func.func @transform_4(%arg0: i32) -> (i32, i32) {
    %c0_i32 = arith.constant 0 : i32
    %c0_i32_0 = arith.constant 0 : i32
    %c0_i32_1 = arith.constant 0 : i32
    return %c0_i32, %c0_i32_0 : i32, i32
  }
  func.func @transform_5(%arg0: i32) -> (i32, i32) {
    %c0_i32 = arith.constant 0 : i32
    %c0_i32_0 = arith.constant 0 : i32
    %c0_i32_1 = arith.constant 0 : i32
    return %c0_i32, %c0_i32_0 : i32, i32
  }
  func.func @transform_6(%arg0: i32) -> (i32, i32) {
    %c0_i32 = arith.constant 0 : i32
    %c0_i32_0 = arith.constant 0 : i32
    %c0_i32_1 = arith.constant 0 : i32
    return %c0_i32, %c0_i32_0 : i32, i32
  }
  func.func @transform_7(%arg0: i32) -> (i32, i32, i32) {
    %c0_i32 = arith.constant 0 : i32
    %c0_i32_0 = arith.constant 0 : i32
    %c0_i32_1 = arith.constant 0 : i32
    %c0_i32_2 = arith.constant 0 : i32
    return %c0_i32, %c0_i32_0, %c0_i32_1 : i32, i32, i32
  }
  func.func @transform_8(%arg0: i32) -> (i32, i32) {
    %c0_i32 = arith.constant 0 : i32
    %c0_i32_0 = arith.constant 0 : i32
    %c0_i32_1 = arith.constant 0 : i32
    return %c0_i32, %c0_i32_0 : i32, i32
  }
  func.func @transform_9(%arg0: i32) -> (i32, i32) {
    %c0_i32 = arith.constant 0 : i32
    %c0_i32_0 = arith.constant 0 : i32
    %c0_i32_1 = arith.constant 0 : i32
    return %c0_i32, %c0_i32_0 : i32, i32
  }
  func.func @transform_10(%arg0: i32) -> (i32, i32) {
    %c0_i32 = arith.constant 0 : i32
    %c0_i32_0 = arith.constant 0 : i32
    %c0_i32_1 = arith.constant 0 : i32
    return %c0_i32, %c0_i32_0 : i32, i32
  }
  func.func @transform_11(%arg0: i32) -> (i32, i32) {
    %c0_i32 = arith.constant 0 : i32
    %c0_i32_0 = arith.constant 0 : i32
    %c0_i32_1 = arith.constant 0 : i32
    return %c0_i32, %c0_i32_0 : i32, i32
  }
  func.func @transform_12(%arg0: i32) -> (i32, i32) {
    %c0_i32 = arith.constant 0 : i32
    %c0_i32_0 = arith.constant 0 : i32
    %c0_i32_1 = arith.constant 0 : i32
    return %c0_i32, %c0_i32_0 : i32, i32
  }
  func.func @transform_13(%arg0: i32) -> (i32, i32) {
    %c0_i32 = arith.constant 0 : i32
    %c0_i32_0 = arith.constant 0 : i32
    %c0_i32_1 = arith.constant 0 : i32
    return %c0_i32, %c0_i32_0 : i32, i32
  }
  func.func @transform_14(%arg0: i32) -> (i32, i32) {
    %c0_i32 = arith.constant 0 : i32
    %c0_i32_0 = arith.constant 0 : i32
    %c0_i32_1 = arith.constant 0 : i32
    return %c0_i32, %c0_i32_0 : i32, i32
  }
  func.func @transform_15(%arg0: i32) -> (i32, i32, i32) {
    %c0_i32 = arith.constant 0 : i32
    %c0_i32_0 = arith.constant 0 : i32
    %c0_i32_1 = arith.constant 0 : i32
    %c0_i32_2 = arith.constant 0 : i32
    return %c0_i32, %c0_i32_0, %c0_i32_1 : i32, i32, i32
  }
  func.func @transform_16(%arg0: i32) -> (i32, i32) {
    %c0_i32 = arith.constant 0 : i32
    %c0_i32_0 = arith.constant 0 : i32
    %c0_i32_1 = arith.constant 0 : i32
    return %c0_i32, %c0_i32_0 : i32, i32
  }
  func.func @transform_17(%arg0: i32) -> (i32, i32) {
    %c0_i32 = arith.constant 0 : i32
    %c0_i32_0 = arith.constant 0 : i32
    %c0_i32_1 = arith.constant 0 : i32
    return %c0_i32, %c0_i32_0 : i32, i32
  }
  func.func @transform_18(%arg0: i32) -> (i32, i32) {
    %c0_i32 = arith.constant 0 : i32
    %c0_i32_0 = arith.constant 0 : i32
    %c0_i32_1 = arith.constant 0 : i32
    return %c0_i32, %c0_i32_0 : i32, i32
  }
  func.func @transform_19(%arg0: i32) -> (i32, i32) {
    %c0_i32 = arith.constant 0 : i32
    %c0_i32_0 = arith.constant 0 : i32
    %c0_i32_1 = arith.constant 0 : i32
    return %c0_i32, %c0_i32_0 : i32, i32
  }
  func.func @transform_20(%arg0: i32) -> (i32, i32) {
    %c0_i32 = arith.constant 0 : i32
    %c0_i32_0 = arith.constant 0 : i32
    %c0_i32_1 = arith.constant 0 : i32
    return %c0_i32, %c0_i32_0 : i32, i32
  }
  func.func @transform_21(%arg0: i32) -> (i32, i32) {
    %c0_i32 = arith.constant 0 : i32
    %c0_i32_0 = arith.constant 0 : i32
    %c0_i32_1 = arith.constant 0 : i32
    return %c0_i32, %c0_i32_0 : i32, i32
  }
  func.func @transform_22(%arg0: i32) -> (i32, i32) {
    %c0_i32 = arith.constant 0 : i32
    %c0_i32_0 = arith.constant 0 : i32
    %c0_i32_1 = arith.constant 0 : i32
    return %c0_i32, %c0_i32_0 : i32, i32
  }
  func.func @transform_23(%arg0: i32) -> (i32, i32, i32) {
    %c0_i32 = arith.constant 0 : i32
    %c0_i32_0 = arith.constant 0 : i32
    %c0_i32_1 = arith.constant 0 : i32
    %c0_i32_2 = arith.constant 0 : i32
    return %c0_i32, %c0_i32_0, %c0_i32_1 : i32, i32, i32
  }
  func.func @transform_24(%arg0: i32) -> (i32, i32) {
    %c0_i32 = arith.constant 0 : i32
    %c0_i32_0 = arith.constant 0 : i32
    %c0_i32_1 = arith.constant 0 : i32
    return %c0_i32, %c0_i32_0 : i32, i32
  }
  func.func @transform_25(%arg0: i32) -> (i32, i32) {
    %c0_i32 = arith.constant 0 : i32
    %c0_i32_0 = arith.constant 0 : i32
    %c0_i32_1 = arith.constant 0 : i32
    return %c0_i32, %c0_i32_0 : i32, i32
  }
  func.func @transform_26(%arg0: i32) -> (i32, i32) {
    %c0_i32 = arith.constant 0 : i32
    %c0_i32_0 = arith.constant 0 : i32
    %c0_i32_1 = arith.constant 0 : i32
    return %c0_i32, %c0_i32_0 : i32, i32
  }
  func.func @transform_27(%arg0: i32) -> (i32, i32) {
    %c0_i32 = arith.constant 0 : i32
    %c0_i32_0 = arith.constant 0 : i32
    %c0_i32_1 = arith.constant 0 : i32
    return %c0_i32, %c0_i32_0 : i32, i32
  }
  func.func @transform_28(%arg0: i32) -> (i32, i32) {
    %c0_i32 = arith.constant 0 : i32
    %c0_i32_0 = arith.constant 0 : i32
    %c0_i32_1 = arith.constant 0 : i32
    return %c0_i32, %c0_i32_0 : i32, i32
  }
  func.func @transform_29(%arg0: i32) -> (i32, i32) {
    %c0_i32 = arith.constant 0 : i32
    %c0_i32_0 = arith.constant 0 : i32
    %c0_i32_1 = arith.constant 0 : i32
    return %c0_i32, %c0_i32_0 : i32, i32
  }
}

</mosaic_0001>

<bundles_post_ra>
// kernel: tpu_custom_call.1
= control target key start
LH: loop header
LB: loop body
LE: loop exit
PB: predicated region body
PF: predicated region fallthrough
CT: control target
= control target key end

     0   :  { %s8658_s6 = smov 1   ;;  %s8659_s10 = smov 2   ;;  %s9760_s0 = inlined_call_operand.smem [shape: u32[30], index: -1, kind: input, shape index: {}] }
   0x1   :  { %s8717_s5 = sld [smem:[%s9760_s0]]   ;;  %s8660_s14 = smov 3  }
   0x2   :  { %s8722_s9 = sld [smem:[%s9760_s0 + %s8658_s6]]   ;;  %s8661_s18 = smov 4  }
   0x3   :  { %s8727_s13 = sld [smem:[%s9760_s0 + %s8659_s10]]   ;;  %s8662_s22 = smov 5  }
   0x4   :  { %s8732_s17 = sld [smem:[%s9760_s0 + %s8660_s14]]   ;;  %s8663_s26 = smov 6  }
   0x5   :  { %s8737_s21 = sld [smem:[%s9760_s0 + %s8661_s18]]   ;;  %s8664_s30 = smov 7  }
   0x6   :  { %s8742_s25 = sld [smem:[%s9760_s0 + %s8662_s22]]   ;;  %s8665_s4 = smov 8  }
   0x7   :  { %s8747_s29 = sld [smem:[%s9760_s0 + %s8663_s26]]   ;;  %s8666_s10 = smov 9  }
   0x8   :  { %s8752_s3 = sld [smem:[%s9760_s0 + %s8664_s30]]   ;;  %s8667_s15 = smov 10  }
   0x9   :  { %s8757_s8 = sld [smem:[%s9760_s0 + %s8665_s4]]   ;;  %s8668_s20 = smov 11  }
   0xa   :  { %s8762_s14 = sld [smem:[%s9760_s0 + %s8666_s10]]   ;;  %s8669_s26 = smov 12  }
   0xb   :  { %s8767_s19 = sld [smem:[%s9760_s0 + %s8667_s15]]   ;;  %s8670_s1 = smov 13  }
   0xc   :  { %s8772_s24 = sld [smem:[%s9760_s0 + %s8668_s20]]   ;;  %s8671_s7 = smov 14  }
   0xd   :  { %9762 = sst [smem:[#allocation31_spill]] %s8747_s29  ;;  %s8672_s15 = smov 15  }
   0xe   :  { %9763 = sst [smem:[#allocation32_spill]] %s8752_s3  ;;  %s8673_s22 = smov 16  }
   0xf   :  { %s8777_s30 = sld [smem:[%s9760_s0 + %s8669_s26]]   ;;  %s8674_s28 = smov 17  }
  0x10   :  { %s8782_s6 = sld [smem:[%s9760_s0 + %s8670_s1]]   ;;  %s8684_s16 = smov 27  }
  0x11   :  { %s8787_s12 = sld [smem:[%s9760_s0 + %s8671_s7]]   ;;  %s8675_s7 = smov 18  }
  0x12   :  { %9764 = sst [smem:[#allocation33_spill]] %s8772_s24  ;;  %s8685_s23 = smov 29  }
  0x13   :  { %s8792_s20 = sld [smem:[%s9760_s0 + %s8672_s15]]   ;;  %s8676_s15 = smov 19  }
  0x14   :  { %s8797_s27 = sld [smem:[%s9760_s0 + %s8673_s22]]   ;;  %s8677_s22 = smov 20  }
  0x15   :  { %9765 = sst [smem:[#allocation34_spill]] %s8777_s30  ;;  %s8686_s1 = smov 28  }
  0x16   :  { %s8802_s4 = sld [smem:[%s9760_s0 + %s8674_s28]]   ;;  %s8678_s28 = smov 21  }
  0x17   :  { %9766 = sst [smem:[#allocation35_spill]] %s8787_s12 }
  0x18   :  { %s8807_s12 = sld [smem:[%s9760_s0 + %s8675_s7]]   ;;  %s8679_s7 = smov 22  }
  0x19   :  { %s8812_s30 = sld [smem:[%s9760_s0 + %s8676_s15]]   ;;  %s8680_s15 = smov 23  }
  0x1a   :  { %9767 = sst [smem:[#allocation36_spill]] %s8797_s27 }
  0x1b   :  { %s8817_s27 = sld [smem:[%s9760_s0 + %s8677_s22]]   ;;  %s8681_s22 = smov 24  }
  0x1c   :  { %s8822_s24 = sld [smem:[%s9760_s0 + %s8678_s28]]   ;;  %s8682_s28 = smov 25  }
  0x1d   :  { %s8842_s3 = sld [smem:[%s9760_s0 + %s8682_s28]]  }
  0x1e   :  { %9768 = sst [smem:[#allocation37_spill]] %s8807_s12 }
  0x1f   :  { %9769 = sst [smem:[#allocation38_spill]] %s8812_s30 }
  0x20   :  { %s8827_s12 = sld [smem:[%s9760_s0 + %s8679_s7]]   ;;  %s8683_s7 = smov 26  }
  0x21   :  { %9770 = sst [smem:[#allocation39_spill]] %s8817_s27 }
  0x22   :  { %s8832_s30 = sld [smem:[%s9760_s0 + %s8680_s15]]  }
  0x23   :  { %s8837_s27 = sld [smem:[%s9760_s0 + %s8681_s22]]  }
  0x24   :  { %9773 = sst [smem:[#allocation42_spill]] %s8842_s3 }
  0x25   :  { %s8850_s29 = sld [smem:[%s9760_s0 + %s8684_s16]]  }
  0x26   :  { %9771 = sst [smem:[#allocation40_spill]] %s8827_s12 }
  0x27   :  { %s7066_s12 = sld [smem:[%s9760_s0 + %s8683_s7]]  }
  0x28   :  { %s7068_s3 = sld [smem:[%s9760_s0 + %s8686_s1]]  }
  0x29   :  { %9772 = sst [smem:[#allocation41_spill]] %s8837_s27 }
  0x2a   :  { %s8855_s27 = sld [smem:[%s9760_s0 + %s8685_s23]]  }
  0x2d   :  { %v64_v0 = vstv %s7066_s12 }
  0x2e   :  { %65 = vst [vmem:[#allocation2] sm:$0x1] %v64_v0  ;;  %v66_v1 = vstv %s7068_s3 }
  0x2f   :  { %67 = vst [vmem:[#allocation3] sm:$0x1] %v66_v1 }
  0x30   :  { %68 = vsyncpa [#allocation5], 0 }
  0x31   :  { %69 = vsyncpa [#allocation7], 0 }
  0x32   :  { %70 = vsyncpa [#allocation10], 0 }
  0x33   :  { %71 = vsyncpa [#allocation13], 0 }
  0x34   :  { %72 = vsyncpa [#allocation16], 0 }
  0x35   :  { %73 = vsyncpa [#allocation19], 0 }
  0x36   :  { %74 = vsyncpa [#allocation22], 0  ;;  %s8687_s7 = smov [#allocation6]   ;;  %s8688_s11 = smov [#allocation9]  }
  0x37   :  { %s93_s10 = sshll.u32 %s8687_s7, 4  ;;  %s113_s16 = sshll.u32 %s8688_s11, 4  ;;  %s94_s10 = int_to_ptr.vmem [resolvable:$true] %s93_s10  ;;  %s114_s16 = int_to_ptr.vmem [resolvable:$true] %s113_s16 }
  0x38   :  { %s8392_s15 = scalar_lea.vmem %s94_s10, 128  ;;  %p8397_p1 = scmp.lt.s32.totalorder %s94_s10, %s94_s10 }
  0x39   :  { %p8393_p0 = scmp.ne.s32.totalorder %s94_s10, %s8392_s15  ;;  %p8398_p2 = scmp.lt.s32.totalorder %s8392_s15, %s8392_s15 }
  0x3b   :  { %p8399_p3 = por %p8398_p2, %p8397_p1 }
  0x3d   :  { %p8400_p4 = pnand %p8399_p3, %p8393_p0 }
  0x3f   :  { %8403 = shalt.err (!%p8400_p4)
}
  0x40   :  { %96 = dma.hbm_to_vmem [thread:$0]  %s8727_s13, 128, %s94_s10, [#allocation7]  }
  0x41   :  { %s8412_s0 = scalar_lea.vmem %s114_s16, 32  ;;  %p8417_p6 = scmp.lt.s32.totalorder %s114_s16, %s114_s16 }
  0x42   :  { %p8413_p5 = scmp.ne.s32.totalorder %s114_s16, %s8412_s0  ;;  %p8418_p7 = scmp.lt.s32.totalorder %s8412_s0, %s8412_s0 }
  0x44   :  { %p8419_p8 = por %p8418_p7, %p8417_p6 }
  0x46   :  { %p8420_p9 = pnand %p8419_p8, %p8413_p5 }
  0x48   :  { %8423 = shalt.err (!%p8420_p9)
}
  0x49   :  { %116 = dma.hbm_to_vmem [thread:$0]  %s8737_s21, 32, %s114_s16, [#allocation10]  }
  0x4a   :  { %s8689_s3 = smov [#allocation12]   ;;  %s8690_s18 = smov [#allocation15]  }
  0x4b   :  { %s139_s12 = sshll.u32 %s8689_s3, 4  ;;  %s161_s23 = sshll.u32 %s8690_s18, 4  ;;  %s140_s12 = int_to_ptr.vmem [resolvable:$true] %s139_s12  ;;  %s162_s23 = int_to_ptr.vmem [resolvable:$true] %s161_s23 }
  0x4c   :  { %s8432_s22 = scalar_lea.vmem %s140_s12, 16  ;;  %s8436_s26 = scalar_lea.vmem %s140_s12, 32 }
  0x4d   :  { %p8433_p10 = scmp.ne.s32.totalorder %s140_s12, %s8432_s22  ;;  %p8437_p11 = scmp.lt.s32.totalorder %s140_s12, %s140_s12 }
  0x4e   :  { %p8438_p12 = scmp.lt.s32.totalorder %s8436_s26, %s8432_s22 }
  0x50   :  { %p8439_p13 = por %p8438_p12, %p8437_p11 }
  0x52   :  { %p8440_p0 = pnand %p8439_p13, %p8433_p10 }
  0x54   :  { %8443 = shalt.err (!%p8440_p0)
}
  0x55   :  { %142 = dma.hbm_to_vmem [thread:$0]  %s8757_s8, 16, %s140_s12, [#allocation13]  }
  0x56   :  { %s8452_s13 = scalar_lea.vmem %s162_s23, 16  ;;  %s8456_s1 = scalar_lea.vmem %s162_s23, 32 }
  0x57   :  { %p8453_p1 = scmp.ne.s32.totalorder %s162_s23, %s8452_s13  ;;  %p8457_p2 = scmp.lt.s32.totalorder %s162_s23, %s162_s23 }
  0x58   :  { %p8458_p3 = scmp.lt.s32.totalorder %s8456_s1, %s8452_s13 }
  0x5a   :  { %p8459_p4 = por %p8458_p3, %p8457_p2 }
  0x5c   :  { %p8460_p5 = pnand %p8459_p4, %p8453_p1 }
  0x5e   :  { %8463 = shalt.err (!%p8460_p5)
}
  0x5f   :  { %164 = dma.hbm_to_vmem [thread:$0]  %s8767_s19, 16, %s162_s23, [#allocation16]  }
  0x60   :  { %s8691_s21 = smov [#allocation18]  }
  0x61   :  { %s188_s28 = sshll.u32 %s8691_s21, 4  ;;  %s189_s28 = int_to_ptr.vmem [resolvable:$true] %s188_s28 }
  0x62   :  { %s8472_s2 = scalar_lea.vmem %s189_s28, 1024  ;;  %p8477_p7 = scmp.lt.s32.totalorder %s189_s28, %s189_s28 }
  0x63   :  { %p8473_p6 = scmp.ne.s32.totalorder %s189_s28, %s8472_s2  ;;  %p8478_p8 = scmp.lt.s32.totalorder %s8472_s2, %s8472_s2 }
  0x65   :  { %p8479_p9 = por %p8478_p8, %p8477_p7 }
  0x67   :  { %p8480_p10 = pnand %p8479_p9, %p8473_p6 }
  0x69   :  { %8483 = shalt.err (!%p8480_p10)
}
  0x6a   :  { %s8692_s8 = smov 64   ;;  %s8693_s7 = smov 4  }
  0x6b   :  { %194 = dma.hbm_to_vmem [thread:$0]  %s8792_s20, 1024, %s189_s28, [#allocation19], %s8692_s8, %s8692_s8, %s8693_s7  }
  0x6c   :  { %s8694_s10 = smov [#allocation21]   ;;  %s8695_s19 = smov [#allocation4]  }
  0x6d   :  { %s220_s11 = sshll.u32 %s8694_s10, 4  ;;  %s83_s16 = sshll.u32 %s8695_s19, 4  ;;  %s221_s11 = int_to_ptr.vmem [resolvable:$true] %s220_s11  ;;  %s84_s16 = int_to_ptr.vmem [resolvable:$true] %s83_s16 }
  0x6e   :  { %s8492_s15 = scalar_lea.vmem %s221_s11, 3072  ;;  %p8497_p12 = scmp.lt.s32.totalorder %s221_s11, %s221_s11 }
  0x6f   :  { %p8493_p11 = scmp.ne.s32.totalorder %s221_s11, %s8492_s15  ;;  %p8498_p13 = scmp.lt.s32.totalorder %s8492_s15, %s8492_s15 }
  0x71   :  { %p8499_p0 = por %p8498_p13, %p8497_p12 }
  0x73   :  { %p8500_p1 = pnand %p8499_p0, %p8493_p11 }
  0x75   :  { %8503 = shalt.err (!%p8500_p1)
}
  0x76   :  { %s8696_s0 = smov 192   ;;  %s8697_s3 = smov 12  }
  0x77   :  { %226 = dma.hbm_to_vmem [thread:$0]  %s8822_s24, 3072, %s221_s11, [#allocation22], %s8696_s0, %s8696_s0, %s8697_s3  }
  0x78   :  { %s8512_s20 = scalar_lea.vmem %s84_s16, 128  ;;  %p8517_p3 = scmp.lt.s32.totalorder %s84_s16, %s84_s16 }
  0x79   :  { %p8513_p2 = scmp.ne.s32.totalorder %s84_s16, %s8512_s20  ;;  %p8518_p4 = scmp.lt.s32.totalorder %s8512_s20, %s8512_s20 }
  0x7b   :  { %p8519_p5 = por %p8518_p4, %p8517_p3 }
  0x7d   :  { %p8520_p6 = pnand %p8519_p5, %p8513_p2 }
  0x7f   :  { %8523 = shalt.err (!%p8520_p6)
}
  0x80   :  { %86 = dma.hbm_to_vmem [thread:$0]  %s8722_s9, 128, %s84_s16, [#allocation5]  }
  0x81   :  { %s8698_s12 = smov [#allocation8]   ;;  %s8699_s23 = smov [#allocation11]  }
  0x82   :  { %s103_s18 = sshll.u32 %s8698_s12, 4  ;;  %s122_s22 = sshll.u32 %s8699_s23, 4  ;;  %s104_s18 = int_to_ptr.vmem [resolvable:$true] %s103_s18  ;;  %s123_s22 = int_to_ptr.vmem [resolvable:$true] %s122_s22 }
  0x83   :  { %s8532_s26 = scalar_lea.vmem %s104_s18, 128  ;;  %p8537_p8 = scmp.lt.s32.totalorder %s104_s18, %s104_s18 }
  0x84   :  { %p8533_p7 = scmp.ne.s32.totalorder %s104_s18, %s8532_s26  ;;  %p8538_p9 = scmp.lt.s32.totalorder %s8532_s26, %s8532_s26 }
  0x86   :  { %p8539_p10 = por %p8538_p9, %p8537_p8 }
  0x88   :  { %p8540_p11 = pnand %p8539_p10, %p8533_p7 }
  0x8a   :  { %8543 = shalt.err (!%p8540_p11)
}
  0x8b   :  { %106 = dma.hbm_to_vmem [thread:$0]  %s8732_s17, 128, %s104_s18, [#allocation7]  }
  0x8c   :  { %s8552_s24 = scalar_lea.vmem %s123_s22, 3072  ;;  %p8557_p13 = scmp.lt.s32.totalorder %s123_s22, %s123_s22 }
  0x8d   :  { %p8553_p12 = scmp.ne.s32.totalorder %s123_s22, %s8552_s24  ;;  %p8558_p0 = scmp.lt.s32.totalorder %s8552_s24, %s8552_s24 }
  0x8f   :  { %p8559_p1 = por %p8558_p0, %p8557_p13 }
  0x91   :  { %p8560_p2 = pnand %p8559_p1, %p8553_p12 }
  0x93   :  { %8563 = shalt.err (!%p8560_p2)
}
  0x94   :  { %128 = dma.hbm_to_vmem [thread:$0]  %s8742_s25, 3072, %s123_s22, [#allocation10], %s8696_s0, %s8696_s0, %s8697_s3  }
  0x95   :  { %s8700_s9 = smov [#allocation14]   ;;  %s8701_s1 = smov [#allocation17]  }
  0x96   :  { %s148_s13 = sshll.u32 %s8700_s9, 4  ;;  %s174_s21 = sshll.u32 %s8701_s1, 4  ;;  %s149_s13 = int_to_ptr.vmem [resolvable:$true] %s148_s13  ;;  %s175_s21 = int_to_ptr.vmem [resolvable:$true] %s174_s21 }
  0x97   :  { %s8572_s28 = scalar_lea.vmem %s149_s13, 1024  ;;  %p8577_p4 = scmp.lt.s32.totalorder %s149_s13, %s149_s13 }
  0x98   :  { %p8573_p3 = scmp.ne.s32.totalorder %s149_s13, %s8572_s28  ;;  %p8578_p5 = scmp.lt.s32.totalorder %s8572_s28, %s8572_s28 }
  0x9a   :  { %p8579_p6 = por %p8578_p5, %p8577_p4 }
  0x9c   :  { %p8580_p7 = pnand %p8579_p6, %p8573_p3 }
  0x9e   :  { %8583 = shalt.err (!%p8580_p7)
}
  0x9f   :  { %154 = dma.hbm_to_vmem [thread:$0]  %s8762_s14, 1024, %s149_s13, [#allocation13], %s8692_s8, %s8692_s8, %s8693_s7  }
  0xa0   :  { %s8592_s17 = scalar_lea.vmem %s175_s21, 3072  ;;  %p8597_p9 = scmp.lt.s32.totalorder %s175_s21, %s175_s21 }
  0xa1   :  { %p8593_p8 = scmp.ne.s32.totalorder %s175_s21, %s8592_s17  ;;  %p8598_p10 = scmp.lt.s32.totalorder %s8592_s17, %s8592_s17 }
  0xa3   :  { %p8599_p11 = por %p8598_p10, %p8597_p9 }
  0xa5   :  { %p8600_p12 = pnand %p8599_p11, %p8593_p8 }
  0xa7   :  { %8603 = shalt.err (!%p8600_p12)
}
  0xa8   :  { %180 = dma.hbm_to_vmem [thread:$0]  %s8782_s6, 3072, %s175_s21, [#allocation16], %s8696_s0, %s8696_s0, %s8697_s3  }
  0xa9   :  { %s8702_s25 = smov [#allocation20]   ;;  %s8703_s10 = smov [#allocation23]  }
  0xaa   :  { %s202_s2 = sshll.u32 %s8702_s25, 4  ;;  %s234_s11 = sshll.u32 %s8703_s10, 4  ;;  %s203_s2 = int_to_ptr.vmem [resolvable:$true] %s202_s2  ;;  %s235_s11 = int_to_ptr.vmem [resolvable:$true] %s234_s11 }
  0xab   :  { %s8612_s19 = scalar_lea.vmem %s203_s2, 1024  ;;  %p8617_p0 = scmp.lt.s32.totalorder %s203_s2, %s203_s2 }
  0xac   :  { %p8613_p13 = scmp.ne.s32.totalorder %s203_s2, %s8612_s19  ;;  %p8618_p1 = scmp.lt.s32.totalorder %s8612_s19, %s8612_s19 }
  0xae   :  { %p8619_p2 = por %p8618_p1, %p8617_p0 }
  0xb0   :  { %p8620_p3 = pnand %p8619_p2, %p8613_p13 }
  0xb2   :  { %8623 = shalt.err (!%p8620_p3)
}
  0xb3   :  { %208 = dma.hbm_to_vmem [thread:$0]  %s8802_s4, 1024, %s203_s2, [#allocation19], %s8692_s8, %s8692_s8, %s8693_s7  }
  0xb4   :  { %s8632_s14 = scalar_lea.vmem %s235_s11, 1024  ;;  %p8637_p5 = scmp.lt.s32.totalorder %s235_s11, %s235_s11 }
  0xb5   :  { %p8633_p4 = scmp.ne.s32.totalorder %s235_s11, %s8632_s14  ;;  %p8638_p6 = scmp.lt.s32.totalorder %s8632_s14, %s8632_s14 }
  0xb7   :  { %p8639_p7 = por %p8638_p6, %p8637_p5 }
  0xb9   :  { %p8640_p8 = pnand %p8639_p7, %p8633_p4 }
  0xbb   :  { %8643 = shalt.err (!%p8640_p8)
}
  0xbc   :  { %240 = dma.hbm_to_vmem [thread:$0]  %s8832_s30, 1024, %s235_s11, [#allocation22], %s8692_s8, %s8692_s8, %s8693_s7  }
  0xbd   :  { %8644 = dma.done.wait [#allocation5], 128  }
  0xbe   :  { %8645 = vsyncadd [#allocation5], 4294967168 }
  0xbf   :  { %8646 = dma.done.wait [#allocation7], 256  }
  0xc0   :  { %8647 = vsyncadd [#allocation7], 4294967040 }
  0xc1   :  { %8648 = dma.done.wait [#allocation10], 3104  }
  0xc2   :  { %8649 = vsyncadd [#allocation10], 4294964192 }
  0xc3   :  { %8650 = dma.done.wait [#allocation13], 1040  }
  0xc4   :  { %8651 = vsyncadd [#allocation13], 4294966256 }
  0xc5   :  { %8652 = dma.done.wait [#allocation16], 3088  }
  0xc6   :  { %8653 = vsyncadd [#allocation16], 4294964208 }
  0xc7   :  { %8654 = dma.done.wait [#allocation19], 2048  }
  0xc8   :  { %8655 = vsyncadd [#allocation19], 4294965248 }
  0xc9   :  { %8656 = dma.done.wait [#allocation22], 4096  }
  0xca   :  { %8657 = vsyncadd [#allocation22], 4294963200  ;;  %v8704_v2 = vmov 0   ;;  %v8705_v3 = vmov 0.0   ;;  %v291_v4 = vld [vmem:[%s8717_s5] sm:$0xff]  ;;  %vm8706_vm0 = vmmov 0   ;;  %v338_v36 = vlaneseq }
  0xcb   :  { %8146 = vset.pattern.permute.xlu0 %v8704_v2  ;;  %7538 = vmatprep.subr.bf16.mxu1 %v8705_v3  ;;  %v8148_v5 = vld [vmem:[#allocation11 + $0xac] ss:$12 sps:$4 sm:$0xff]   ;;  %v8150_v6 = vld [vmem:[#allocation11 + $0xa8] ss:$12 sps:$4 sm:$0xff]   ;;  %v8151_v7 = vld [vmem:[#allocation11 + $0xb0] ss:$12 sps:$4 sm:$0xff]  }
  0xcc   :  { %513 = vmatprep.mubr.bf16.mxu0 %v8704_v2  ;;  %8147 = vset.pattern.permute.xlu1 %v8704_v2  ;;  %v8152_v8 = vld [vmem:[#allocation11 + $0x94] ss:$12 sps:$4 sm:$0xff]   ;;  %v8154_v9 = vld [vmem:[#allocation11 + $0x90] ss:$12 sps:$4 sm:$0xff]   ;;  %v8155_v10 = vld [vmem:[#allocation11 + $0x98] ss:$12 sps:$4 sm:$0xff]  }
  0xcd   :  { %295 = vperm.xlu0 %8146, %v291_v4   ;;  %481 = vmatprep.subr.bf16.mxu0 %v8148_v5  ;;  %v8156_v11 = vld [vmem:[#allocation11 + $0x7c] ss:$12 sps:$4 sm:$0xff]   ;;  %v8158_v12 = vld [vmem:[#allocation11 + $0x78] ss:$12 sps:$4 sm:$0xff]   ;;  %v8159_v13 = vld [vmem:[#allocation11 + $0x80] ss:$12 sps:$4 sm:$0xff]  }
  0xce   :  { %482 = vmatpush1.bf16.msra.mxu0 %v8150_v6  ;;  %7539 = vmatpush3.bf16.msra.mxu1 %v8151_v7  ;;  %v8160_v14 = vld [vmem:[#allocation11 + $0x64] ss:$12 sps:$4 sm:$0xff]   ;;  %v8162_v15 = vld [vmem:[#allocation11 + $0x60] ss:$12 sps:$4 sm:$0xff]   ;;  %v8163_v16 = vld [vmem:[#allocation11 + $0x68] ss:$12 sps:$4 sm:$0xff]  }
  0xcf   :  { %483 = vmatprep.subr.bf16.mxu0 %v8152_v8  ;;  %7540 = vmatprep.subr.bf16.mxu1 %v8705_v3  ;;  %v8164_v17 = vld [vmem:[#allocation11 + $0x4c] ss:$12 sps:$4 sm:$0xff]   ;;  %v8166_v18 = vld [vmem:[#allocation11 + $0x48] ss:$12 sps:$4 sm:$0xff]   ;;  %v8167_v19 = vld [vmem:[#allocation11 + $0x50] ss:$12 sps:$4 sm:$0xff]  }
  0xd0   :  { %7554 = vmatprep.mubr.msk.bf16.mxu1 %vm8706_vm0, %v8705_v3  ;;  %v8168_v20 = vld [vmem:[#allocation11 + $0x34] ss:$12 sps:$4 sm:$0xff]   ;;  %v8170_v21 = vld [vmem:[#allocation11 + $0x30] ss:$12 sps:$4 sm:$0xff]   ;;  %v8171_v22 = vld [vmem:[#allocation11 + $0x38] ss:$12 sps:$4 sm:$0xff]  }
  0xd1   :  { %v8172_v23 = vld [vmem:[#allocation11 + $0x1c] ss:$12 sps:$4 sm:$0xff]   ;;  %v8174_v24 = vld [vmem:[#allocation11 + $0x18] ss:$12 sps:$4 sm:$0xff]   ;;  %v8175_v25 = vld [vmem:[#allocation11 + $0x20] ss:$12 sps:$4 sm:$0xff]  }
  0xd2   :  { %484 = vmatpush1.bf16.msra.mxu0 %v8154_v9  ;;  %7541 = vmatpush3.bf16.msra.mxu1 %v8155_v10  ;;  %v8176_v26 = vld [vmem:[#allocation11 + $0x4] ss:$12 sps:$4 sm:$0xff]   ;;  %v8178_v27 = vld [vmem:[#allocation11] ss:$12 sps:$4 sm:$0xff]   ;;  %v8179_v28 = vld [vmem:[#allocation11 + $0x8] ss:$12 sps:$4 sm:$0xff]  }
  0xd3   :  { %485 = vmatprep.subr.bf16.mxu0 %v8156_v11  ;;  %7542 = vmatprep.subr.bf16.mxu1 %v8705_v3  ;;  %s9774_s5 = sld [smem:[#allocation31_spill]]  ;;  %v292_v29 = vld [vmem:[#allocation4] sm:$0xff]  ;;  %v299_v30 = vld [vmem:[#allocation6] sm:$0xff]  ;;  %v339_v37 = vshrl.u32 %v338_v36, 7  ;;  %vm600_vm1 = vcmask 261120   ;;  %s8707_s30 = smov 96  }
  0xd4   :  { %s8708_s6 = smov 32   ;;  %vm946_vm2 = vcmask 1043456   ;;  %vm897_vm3 = vcmask 27648   ;;  %vm942_vm4 = vcmask 31744   ;;  %s9775_s4 = sld [smem:[#allocation32_spill]]  ;;  %vm2437_vm5 = vcmask 64512  }
  0xd5   :  { %v8914_v38 = vsub.s32 0, %v339_v37  ;;  %v8917_v40 = vsub.s32 1, %v339_v37  ;;  %v8946_v55 = vsub.s32 2, %v339_v37  ;;  %s9776_s7 = sld [smem:[#allocation33_spill]]  ;;  %vm7028_vm6 = vcmask 1024  }
  0xd6   :  { %486 = vmatpush1.bf16.msra.mxu0 %v8158_v12  ;;  %7543 = vmatpush3.bf16.msra.mxu1 %v8159_v13  ;;  %s9777_s16 = sld [smem:[#allocation34_spill]] }
  0xd7   :  { %487 = vmatprep.subr.bf16.mxu0 %v8160_v14  ;;  %7544 = vmatprep.subr.bf16.mxu1 %v8705_v3  ;;  %s9778_s15 = sld [smem:[#allocation35_spill]] }
  0xd8   :  { %s9779_s0 = sld [smem:[#allocation36_spill]] }
  0xd9   :  { %v336_v39 = vld [vmem:[%s9774_s5] sm:$0x7]  ;;  %s9780_s3 = sld [smem:[#allocation37_spill]] }
  0xda   :  { %488 = vmatpush1.bf16.msra.mxu0 %v8162_v15  ;;  %7545 = vmatpush3.bf16.msra.mxu1 %v8163_v16  ;;  %v341_v41 = vrot.slane %v336_v39, %v8914_v38  ;;  %v345_v42 = vrot.slane %v336_v39, %v8917_v40  ;;  %v349_v58 = vrot.slane %v336_v39, %v8946_v55  ;;  %s9781_s20 = sld [smem:[#allocation38_spill]] }
  0xdb   :  { %489 = vmatprep.subr.bf16.mxu0 %v8164_v17  ;;  %7546 = vmatprep.subr.bf16.mxu1 %v8705_v3  ;;  %s9782_s12 = sld [smem:[#allocation39_spill]] }
  0xdc   :  { %s9783_s18 = sld [smem:[#allocation40_spill]] }
  0xdd   :  { %s9785_s23 = sld [smem:[#allocation42_spill]] }
  0xde   :  { %490 = vmatpush1.bf16.msra.mxu0 %v8166_v18  ;;  %7547 = vmatpush3.bf16.msra.mxu1 %v8167_v19 }
  0xdf   :  { %491 = vmatprep.subr.bf16.mxu0 %v8168_v20  ;;  %7548 = vmatprep.subr.bf16.mxu1 %v8705_v3 }
  0xe2   :  { %492 = vmatpush1.bf16.msra.mxu0 %v8170_v21  ;;  %7549 = vmatpush3.bf16.msra.mxu1 %v8171_v22 }
  0xe3   :  { %493 = vmatprep.subr.bf16.mxu0 %v8172_v23  ;;  %7550 = vmatprep.subr.bf16.mxu1 %v8705_v3 }
  0xe6   :  { %494 = vmatpush1.bf16.msra.mxu0 %v8174_v24  ;;  %7551 = vmatpush3.bf16.msra.mxu1 %v8175_v25 }
  0xe7   :  { %495 = vmatprep.subr.bf16.mxu0 %v8176_v26  ;;  %7552 = vmatprep.subr.bf16.mxu1 %v8705_v3 }
  0xea   :  { %496 = vmatpush1.bf16.msra.mxu0 %v8178_v27  ;;  %7553 = vmatpush3.bf16.msra.mxu1 %v8179_v28 }
  0xeb   :  { %7558 = vmatprep.subr.mxu0 %v8705_v3  ;;  %7563 = vmatprep.subr.mxu1 %v8705_v3 }
 0x148   :  { %v296_v31 = vpop.permute.xlu0 %295 }
 0x149   :  { %v298_v32 = vmul.f32 %v296_v31, %v292_v29 }
 0x14b   :  { %v300_v33 = vadd.f32 %v299_v30, %v298_v32 }
 0x14d   :  { %v301_v34 = vmax.f32 %v300_v33, 0.0 }
 0x14f   :  { %v303_v35 = vpack.c.bf16 %v301_v34, %v301_v34 }
 0x151   :  { %514 = vmatmul.mubr.bf16.vlgmr.msra.gmra.mxu0 %v303_v35  ;;  %7555 = vmatmul.mubr.bf16.vlgmr.msra.gmra.mxu1 %v303_v35 }
 0x152   :  { %7560 = vmatprep.mubr.msk.f32.mxu0 %vm8706_vm0, %v8705_v3  ;;  %7565 = vmatprep.mubr.msk.f32.mxu1 %vm8706_vm0, %v8705_v3 }
 0x211   :  { %v515_v43 = vpop.f32.mrf.mxu0  ;;  %v556_v44 = vpop.f32.mrf.mxu1 }
 0x212   :  { %v516_v45 = vadd.f32 %v515_v43, %v341_v41  ;;  %v8970_v61 = vadd.f32 %v556_v44, %v349_v58 }
 0x213   :  { %v517_v46 = vpop.f32.mrf.mxu0  ;;  %v7556_v47 = vpop.f32.mrf.mxu1 }
 0x214   :  { %v8921_v48 = vmul.f32 0.17677669, %v516_v45  ;;  %v8923_v49 = vadd.f32 %v517_v46, %v345_v42  ;;  %v9016_v45 = vld [vmem:[%s9775_s4 + $0x8] sm:$0xff]   ;;  %v9021_v47 = vld [vmem:[%s9775_s4] sm:$0xff]  }
 0x215   :  { %v519_v50 = vpop.f32.mrf.mxu0  ;;  %v559_v51 = vpop.f32.mrf.mxu1 }
 0x216   :  { %587 = vrot.lane.b32.xlu0 %v8923_v49, %s8707_s30  ;;  %7559 = vmatpush3.xpose.msk.msra.mxu0 %vm600_vm1, %v8923_v49 }
 0x217   :  { %580 = vrot.lane.b32.xlu1 %v8921_v48, %s8707_s30  ;;  %v520_v52 = vpop.f32.mrf.mxu0  ;;  %v7557_v53 = vpop.f32.mrf.mxu1  ;;  %7568 = vmatprep.subr.mxu0 %v8705_v3 }
 0x218   :  { %v9034_v53 = vld [vmem:[%s9775_s4 + $0x18] sm:$0xff]  }
 0x219   :  { %7561 = vmatmul.mubr.msk.f32.vlgmr.msra.gmra.mxu0 %vm600_vm1, %v8921_v48 }
 0x21a   :  { %591 = vrot.lane.b32.xlu0 %v8923_v49, %s8708_s6  ;;  %7570 = vmatprep.mubr.msk.f32.mxu0 %vm8706_vm0, %v8705_v3 }
 0x21b   :  { %589 = vrot.lane.b32.xlu1 %v8923_v49, %s8692_s8 }
 0x21e   :  { %584 = vrot.lane.b32.xlu0 %v8921_v48, %s8708_s6 }
 0x21f   :  { %582 = vrot.lane.b32.xlu1 %v8921_v48, %s8692_s8 }
 0x288   :  { %v8944_v54 = vpop.permute.xlu0 %587 }
 0x289   :  { %v8948_v56 = vpop.permute.xlu1 %580  ;;  %7564 = vmatpush3.xpose.msk.msra.mxu1 %vm600_vm1, %v8944_v54 }
 0x28a   :  { %7573 = vmatprep.subr.mxu1 %v8705_v3 }
 0x28c   :  { %v8953_v57 = vpop.permute.xlu0 %591  ;;  %7566 = vmatmul.mubr.msk.f32.vlgmr.msra.gmra.mxu1 %vm600_vm1, %v8948_v56 }
 0x28d   :  { %v8958_v59 = vpop.permute.xlu1 %589  ;;  %7574 = vmatpush3.xpose.msk.msra.mxu1 %vm600_vm1, %v8953_v57  ;;  %7575 = vmatprep.mubr.msk.f32.mxu1 %vm8706_vm0, %v8705_v3 }
 0x28e   :  { %7569 = vmatpush3.xpose.msk.msra.mxu0 %vm600_vm1, %v8958_v59  ;;  %7583 = vmatprep.subr.mxu1 %v8705_v3 }
 0x28f   :  { %7578 = vmatprep.subr.mxu0 %v8705_v3 }
 0x290   :  { %v8968_v60 = vpop.permute.xlu0 %584 }
 0x291   :  { %v8972_v62 = vpop.permute.xlu1 %582  ;;  %7576 = vmatmul.mubr.msk.f32.vlgmr.msra.gmra.mxu1 %vm600_vm1, %v8968_v60 }
 0x292   :  { %7571 = vmatmul.mubr.msk.f32.vlgmr.msra.gmra.mxu0 %vm600_vm1, %v8972_v62  ;;  %7585 = vmatprep.mubr.msk.f32.mxu1 %vm8706_vm0, %v8705_v3 }
 0x293   :  { %7579 = vmatpush3.msk.msra.mxu0 %vm946_vm2, %v8970_v61  ;;  %7580 = vmatprep.mubr.msk.f32.mxu0 %vm8706_vm0, %v8705_v3 }
 0x294   :  { %7588 = vmatprep.subr.mxu0 %v8705_v3 }
 0x2d9   :  { %v671_v63 = vpop.f32.mrf.mxu0 }
 0x2da   :  { %v898_v0 = vsel %vm897_vm3, %v671_v63, -inf }
 0x2db   :  { %899 = vmax.xlane.f32.xlu1 %v898_v0  ;;  %v7562_v1 = vpop.f32.mrf.mxu0 }
 0x2dc   :  { %v9047_v1 = vld [vmem:[%s9775_s4 + $0x28] sm:$0xff]  }
 0x34c   :  { %v745_v4 = vpop.f32.mrf.mxu1 }
 0x34d   :  { %v901_v5 = vsel %vm897_vm3, %v745_v4, -inf }
 0x34e   :  { %902 = vmax.xlane.f32.xlu0 %v901_v5  ;;  %v7567_v6 = vpop.f32.mrf.mxu1 }
 0x34f   :  { %v9052_v6 = vld [vmem:[%s9775_s4 + $0x20] sm:$0xff]  }
 0x351   :  { %v893_v7 = vpop.f32.mrf.mxu1 }
 0x352   :  { %v819_v8 = vpop.f32.mrf.mxu0  ;;  %v907_v9 = vsel %vm897_vm3, %v893_v7, -inf }
 0x353   :  { %v7577_v10 = vpop.f32.mrf.mxu1  ;;  %908 = vmax.xlane.f32.xlu1 %v907_v9  ;;  %v904_v11 = vsel %vm897_vm3, %v819_v8, -inf }
 0x354   :  { %905 = vmax.xlane.f32.xlu0 %v904_v11  ;;  %v7572_v12 = vpop.f32.mrf.mxu0  ;;  %v9065_v11 = vld [vmem:[%s9775_s4 + $0x30] sm:$0xff]  }
 0x364   :  { %v900_v13 = vpop.xlane.xlu1 %899 }
 0x365   :  { %v910_v14 = vsub.f32 %v671_v63, %v900_v13  ;;  %v9042_v63 = vld [vmem:[%s9775_s4 + $0x10] sm:$0xff]  }
 0x367   :  { %v914_v15 = vmul.f32 1.442695, %v910_v14 }
 0x369   :  { %8284 = vpow2.f32 %v914_v15  ;;  %v1476_v15 = vrot.slane %v8923_v49, 4  ;;  %v1627_v49 = vrot.slane %v8972_v62, 4  ;;  %v1704_v62 = vrot.slane %v8953_v57, 4 }
 0x376   :  { %v8285_v16 = vpop.eup %8284 }
 0x377   :  { %v922_v17 = vsel %vm897_vm3, %v8285_v16, 0.0 }
 0x378   :  { %923 = vadd.xlane.f32.xlu0 %v922_v17  ;;  %v1628_v17 = vrot.slane %v8958_v59, 4 }
 0x3d7   :  { %v903_v18 = vpop.xlane.xlu0 %902 }
 0x3d8   :  { %v911_v19 = vsub.f32 %v745_v4, %v903_v18  ;;  %v1823_v18 = vrot.slane %v8970_v61, 4 }
 0x3da   :  { %v916_v20 = vmul.f32 1.442695, %v911_v19  ;;  %v1552_v19 = vrot.slane %v8944_v54, 4  ;;  %v1703_v54 = vrot.slane %v8968_v60, 4 }
 0x3dc   :  { %8286 = vpow2.f32 %v916_v20  ;;  %v909_v29 = vpop.xlane.xlu1 %908 }
 0x3dd   :  { %v906_v21 = vpop.xlane.xlu0 %905  ;;  %v913_v30 = vsub.f32 %v893_v7, %v909_v29 }
 0x3de   :  { %v912_v22 = vsub.f32 %v819_v8, %v906_v21  ;;  %v9060_v8 = vld [vmem:[%s9775_s4 + $0x38] sm:$0xff]  }
 0x3df   :  { %v920_v31 = vmul.f32 1.442695, %v913_v30 }
 0x3e0   :  { %v918_v23 = vmul.f32 1.442695, %v912_v22 }
 0x3e2   :  { %8288 = vpow2.f32 %v918_v23 }
 0x3e9   :  { %v8287_v24 = vpop.eup %8286 }
 0x3ea   :  { %v925_v25 = vsel %vm897_vm3, %v8287_v24, 0.0 }
 0x3eb   :  { %926 = vadd.xlane.f32.xlu1 %v925_v25 }
 0x3ef   :  { %v8289_v26 = vpop.eup %8288 }
 0x3f0   :  { %v928_v27 = vsel %vm897_vm3, %v8289_v26, 0.0 }
 0x3f1   :  { %929 = vadd.xlane.f32.xlu0 %v928_v27 }
 0x3fc   :  { %596 = vrot.lane.b32.xlu1 %v8970_v61, %s8692_s8 }
 0x401   :  { %v924_v28 = vpop.xlane.xlu0 %923 }
 0x402   :  { %8290 = vrcp.f32 %v924_v28 }
 0x403   :  { %8292 = vpow2.f32 %v920_v31 }
 0x407   :  { %594 = vrot.lane.b32.xlu0 %v8970_v61, %s8707_s30 }
 0x40f   :  { %v8291_v32 = vpop.eup %8290 }
 0x410   :  { %v935_v33 = vmul.f32 %v8291_v32, %v8285_v16  ;;  %v8293_v34 = vpop.eup %8292  ;;  %v1475_v16 = vrot.slane %v8921_v48, 4 }
 0x411   :  { %v931_v35 = vsel %vm897_vm3, %v8293_v34, 0.0 }
 0x412   :  { %7581 = vmatmul.mubr.msk.f32.vlgmr.msra.gmra.mxu0 %vm942_vm4, %v935_v33 }
 0x413   :  { %7590 = vmatprep.mubr.msk.f32.mxu0 %vm8706_vm0, %v8705_v3 }
 0x420   :  { %932 = vadd.xlane.f32.xlu1 %v931_v35 }
 0x431   :  { %598 = vrot.lane.b32.xlu1 %v8970_v61, %s8708_s6  ;;  %v1551_v61 = vrot.slane %v8948_v56, 4 }
 0x474   :  { %v927_v36 = vpop.xlane.xlu1 %926 }
 0x475   :  { %8294 = vrcp.f32 %v927_v36 }
 0x478   :  { %v9002_v37 = vpop.permute.xlu1 %596 }
 0x479   :  { %7589 = vmatpush3.msk.msra.mxu0 %vm946_vm2, %v9002_v37 }
 0x47a   :  { %v930_v39 = vpop.xlane.xlu0 %929  ;;  %7598 = vmatprep.subr.bf16.mxu0 %v8705_v3 }
 0x47b   :  { %8296 = vrcp.f32 %v930_v39 }
 0x47e   :  { %v9007_v41 = vpop.permute.xlu0 %594 }
 0x47f   :  { %7584 = vmatpush3.msk.msra.mxu1 %vm946_vm2, %v9007_v41  ;;  %v1899_v21 = vrot.slane %v9007_v41, 4 }
 0x480   :  { %7593 = vmatprep.subr.mxu1 %v8705_v3 }
 0x482   :  { %v8295_v42 = vpop.eup %8294 }
 0x483   :  { %v937_v43 = vmul.f32 %v8295_v42, %v8287_v24 }
 0x485   :  { %7586 = vmatmul.mubr.msk.f32.vlgmr.msra.gmra.mxu1 %vm942_vm4, %v937_v43 }
 0x486   :  { %7595 = vmatprep.mubr.msk.f32.mxu1 %vm8706_vm0, %v8705_v3 }
 0x488   :  { %v8297_v44 = vpop.eup %8296 }
 0x489   :  { %v939_v46 = vmul.f32 %v8297_v44, %v8289_v26 }
 0x48b   :  { %7591 = vmatmul.mubr.msk.f32.vlgmr.msra.gmra.mxu0 %vm942_vm4, %v939_v46 }
 0x48c   :  { %7599 = vmatpush3.bf16.msra.mxu0 %v9016_v45  ;;  %7602 = vmatprep.mubr.msk.bf16.mxu0 %vm8706_vm0, %v8705_v3 }
 0x48d   :  { %7600 = vmatprep.subr.bf16.mxu0 %v8705_v3 }
 0x490   :  { %7601 = vmatpush3.bf16.msra.mxu0 %v9021_v47 }
 0x491   :  { %7614 = vmatprep.subr.bf16.mxu0 %v8705_v3 }
 0x4a9   :  { %v933_v50 = vpop.xlane.xlu1 %932 }
 0x4aa   :  { %8298 = vrcp.f32 %v933_v50 }
 0x4ad   :  { %v9028_v51 = vpop.permute.xlu1 %598 }
 0x4ae   :  { %7594 = vmatpush3.msk.msra.mxu1 %vm946_vm2, %v9028_v51 }
 0x4af   :  { %7606 = vmatprep.subr.bf16.mxu1 %v8705_v3 }
 0x4b7   :  { %v8299_v52 = vpop.eup %8298 }
 0x4b8   :  { %v941_v58 = vmul.f32 %v8299_v52, %v8293_v34 }
 0x4ba   :  { %7596 = vmatmul.mubr.msk.f32.vlgmr.msra.gmra.mxu1 %vm942_vm4, %v941_v58 }
 0x4bb   :  { %7607 = vmatpush3.bf16.msra.mxu1 %v9034_v53  ;;  %7610 = vmatprep.mubr.msk.bf16.mxu1 %vm8706_vm0, %v8705_v3 }
 0x4bc   :  { %7608 = vmatprep.subr.bf16.mxu1 %v8705_v3 }
 0x4bf   :  { %7609 = vmatpush3.bf16.msra.mxu1 %v9042_v63 }
 0x4c0   :  { %7622 = vmatprep.subr.bf16.mxu1 %v8705_v3 }
 0x4d2   :  { %v1015_v0 = vpop.f32.mrf.mxu0 }
 0x4d3   :  { %v1244_v4 = vpack.c.bf16 %v1015_v0, %v1015_v0 }
 0x4d4   :  { %v7582_v5 = vpop.f32.mrf.mxu0 }
 0x4d5   :  { %7603 = vmatmul.mubr.msk.bf16.vlgmr.msra.gmra.mxu0 %vm600_vm1, %v1244_v4 }
 0x4d6   :  { %7615 = vmatpush3.bf16.msra.mxu0 %v9047_v1  ;;  %7618 = vmatprep.mubr.msk.bf16.mxu0 %vm8706_vm0, %v8705_v3 }
 0x4d7   :  { %7616 = vmatprep.subr.bf16.mxu0 %v8705_v3 }
 0x4da   :  { %7617 = vmatpush3.bf16.msra.mxu0 %v9052_v6 }
 0x4db   :  { %7630 = vmatprep.subr.mxu0 %v8705_v3 }
 0x545   :  { %v1090_v7 = vpop.f32.mrf.mxu1 }
 0x546   :  { %v1245_v9 = vpack.c.bf16 %v1090_v7, %v1090_v7 }
 0x547   :  { %v7587_v10 = vpop.f32.mrf.mxu1 }
 0x548   :  { %7611 = vmatmul.mubr.msk.bf16.vlgmr.msra.gmra.mxu1 %vm600_vm1, %v1245_v9 }
 0x549   :  { %7623 = vmatpush3.bf16.msra.mxu1 %v9060_v8  ;;  %7626 = vmatprep.mubr.msk.bf16.mxu1 %vm8706_vm0, %v8705_v3 }
 0x54a   :  { %7624 = vmatprep.subr.bf16.mxu1 %v8705_v3 }
 0x54b   :  { %v1165_v12 = vpop.f32.mrf.mxu0 }
 0x54c   :  { %v1246_v13 = vpack.c.bf16 %v1165_v12, %v1165_v12 }
 0x54d   :  { %v7592_v14 = vpop.f32.mrf.mxu0  ;;  %7625 = vmatpush3.bf16.msra.mxu1 %v9065_v11 }
 0x54e   :  { %7619 = vmatmul.mubr.msk.bf16.vlgmr.msra.gmra.mxu0 %vm600_vm1, %v1246_v13  ;;  %7635 = vmatprep.subr.mxu1 %v8705_v3 }
 0x54f   :  { %7631 = vmatpush3.xpose.msk.msra.mxu0 %vm600_vm1, %v1476_v15  ;;  %7632 = vmatprep.mubr.msk.f32.mxu0 %vm8706_vm0, %v8705_v3 }
 0x550   :  { %7640 = vmatprep.subr.mxu0 %v8705_v3 }
 0x556   :  { %7633 = vmatmul.mubr.msk.f32.vlgmr.msra.gmra.mxu0 %vm600_vm1, %v1475_v16 }
 0x557   :  { %7641 = vmatpush3.xpose.msk.msra.mxu0 %vm600_vm1, %v1628_v17  ;;  %7642 = vmatprep.mubr.msk.f32.mxu0 %vm8706_vm0, %v8705_v3 }
 0x558   :  { %7650 = vmatprep.subr.mxu0 %v8705_v3 }
 0x55a   :  { %7643 = vmatmul.mubr.msk.f32.vlgmr.msra.gmra.mxu0 %vm600_vm1, %v1627_v49 }
 0x55b   :  { %7651 = vmatpush3.msk.msra.mxu0 %vm946_vm2, %v1823_v18  ;;  %7652 = vmatprep.mubr.msk.f32.mxu0 %vm8706_vm0, %v8705_v3 }
 0x55c   :  { %7660 = vmatprep.subr.mxu0 %v8705_v3 }
 0x57a   :  { %v1240_v48 = vpop.f32.mrf.mxu1 }
 0x57b   :  { %v1247_v59 = vpack.c.bf16 %v1240_v48, %v1240_v48 }
 0x57c   :  { %v7597_v20 = vpop.f32.mrf.mxu1 }
 0x57d   :  { %7627 = vmatmul.mubr.msk.bf16.vlgmr.msra.gmra.mxu1 %vm600_vm1, %v1247_v59 }
 0x57e   :  { %7636 = vmatpush3.xpose.msk.msra.mxu1 %vm600_vm1, %v1552_v19  ;;  %7637 = vmatprep.mubr.msk.f32.mxu1 %vm8706_vm0, %v8705_v3 }
 0x57f   :  { %7645 = vmatprep.subr.mxu1 %v8705_v3 }
 0x585   :  { %7638 = vmatmul.mubr.msk.f32.vlgmr.msra.gmra.mxu1 %vm600_vm1, %v1551_v61 }
 0x586   :  { %7646 = vmatpush3.xpose.msk.msra.mxu1 %vm600_vm1, %v1704_v62  ;;  %7647 = vmatprep.mubr.msk.f32.mxu1 %vm8706_vm0, %v8705_v3 }
 0x587   :  { %7655 = vmatprep.subr.mxu1 %v8705_v3 }
 0x589   :  { %7648 = vmatmul.mubr.msk.f32.vlgmr.msra.gmra.mxu1 %vm600_vm1, %v1703_v54 }
 0x58a   :  { %7656 = vmatpush3.msk.msra.mxu1 %vm946_vm2, %v1899_v21  ;;  %7657 = vmatprep.mubr.msk.f32.mxu1 %vm8706_vm0, %v8705_v3 }
 0x58b   :  { %7665 = vmatprep.subr.mxu1 %v8705_v3 }
 0x595   :  { %v1297_v56 = vpop.f32.mrf.mxu0 }
 0x596   :  { %v1468_v60 = vsel %vm946_vm2, %v1297_v56, 0.0 }
 0x597   :  { %v7604_v57 = vpop.f32.mrf.mxu0 }
 0x599   :  { %v1300_v22 = vpop.f32.mrf.mxu0 }
 0x59b   :  { %v7605_v23 = vpop.f32.mrf.mxu0 }
 0x608   :  { %v1352_v24 = vpop.f32.mrf.mxu1 }
 0x609   :  { %v1469_v25 = vsel %vm946_vm2, %v1352_v24, 0.0 }
 0x60a   :  { %v1470_v26 = vadd.f32 %v1469_v25, %v1468_v60  ;;  %v7612_v27 = vpop.f32.mrf.mxu1 }
 0x60c   :  { %v1355_v28 = vpop.f32.mrf.mxu1 }
 0x60e   :  { %v1407_v29 = vpop.f32.mrf.mxu0  ;;  %v7613_v30 = vpop.f32.mrf.mxu1 }
 0x60f   :  { %v1471_v31 = vsel %vm946_vm2, %v1407_v29, 0.0  ;;  %v1975_v29 = vrot.slane %v9002_v37, 4 }
 0x610   :  { %v1472_v32 = vadd.f32 %v1471_v31, %v1470_v26  ;;  %v7620_v33 = vpop.f32.mrf.mxu0 }
 0x612   :  { %v1410_v34 = vpop.f32.mrf.mxu0 }
 0x614   :  { %v7621_v35 = vpop.f32.mrf.mxu0 }
 0x615   :  { %v2051_v35 = vrot.slane %v9028_v51, 4 }
 0x616   :  { %v1547_v36 = vpop.f32.mrf.mxu0 }
 0x617   :  { %v1779_v39 = vsel %vm897_vm3, %v1547_v36, -inf }
 0x618   :  { %1780 = vmax.xlane.f32.xlu0 %v1779_v39  ;;  %v7634_v41 = vpop.f32.mrf.mxu0 }
 0x61a   :  { %v1699_v42 = vpop.f32.mrf.mxu0 }
 0x61b   :  { %v1785_v43 = vsel %vm897_vm3, %v1699_v42, -inf }
 0x61c   :  { %1786 = vmax.xlane.f32.xlu0 %v1785_v43  ;;  %v7644_v44 = vpop.f32.mrf.mxu0 }
 0x63d   :  { %v1462_v46 = vpop.f32.mrf.mxu1 }
 0x63e   :  { %v1473_v50 = vsel %vm946_vm2, %v1462_v46, 0.0 }
 0x63f   :  { %v9118_v52 = vadd.f32 %v1473_v50, %v1472_v32  ;;  %v7628_v58 = vpop.f32.mrf.mxu1  ;;  %v8188_v50 = vld [vmem:[#allocation14 + $0x38] sm:$0xff]  }
 0x640   :  { %v8189_v58 = vld [vmem:[#allocation14 + $0x30] sm:$0xff]  }
 0x641   :  { %v1465_v0 = vpop.f32.mrf.mxu1 }
 0x642   :  { %v8192_v0 = vld [vmem:[#allocation14 + $0x18] sm:$0xff]  }
 0x643   :  { %v7629_v4 = vpop.f32.mrf.mxu1 }
 0x644   :  { %v8193_v4 = vld [vmem:[#allocation14 + $0x10] sm:$0xff]  }
 0x645   :  { %v1623_v5 = vpop.f32.mrf.mxu1 }
 0x646   :  { %v1782_v7 = vsel %vm897_vm3, %v1623_v5, -inf }
 0x647   :  { %1783 = vmax.xlane.f32.xlu1 %v1782_v7  ;;  %v7639_v9 = vpop.f32.mrf.mxu1  ;;  %v8195_v7 = vld [vmem:[#allocation14] sm:$0xff]  }
 0x649   :  { %v1775_v10 = vpop.f32.mrf.mxu1 }
 0x64a   :  { %v1788_v12 = vsel %vm897_vm3, %v1775_v10, -inf }
 0x64b   :  { %v7649_v13 = vpop.f32.mrf.mxu1  ;;  %1789 = vmax.xlane.f32.xlu0 %v1788_v12 }
 0x6a1   :  { %v1781_v14 = vpop.xlane.xlu0 %1780 }
 0x6a2   :  { %v1791_v15 = vsub.f32 %v1547_v36, %v1781_v14 }
 0x6a4   :  { %v1795_v16 = vmul.f32 1.442695, %v1791_v15 }
 0x6a5   :  { %v1787_v17 = vpop.xlane.xlu0 %1786 }
 0x6a6   :  { %8300 = vpow2.f32 %v1795_v16  ;;  %v1793_v49 = vsub.f32 %v1699_v42, %v1787_v17 }
 0x6a8   :  { %v1799_v18 = vmul.f32 1.442695, %v1793_v49 }
 0x6aa   :  { %8302 = vpow2.f32 %v1799_v18 }
 0x6b3   :  { %v8301_v48 = vpop.eup %8300 }
 0x6b4   :  { %v1803_v59 = vsel %vm897_vm3, %v8301_v48, 0.0 }
 0x6b5   :  { %1804 = vadd.xlane.f32.xlu1 %v1803_v59 }
 0x6b7   :  { %v8303_v19 = vpop.eup %8302 }
 0x6b8   :  { %v1809_v20 = vsel %vm897_vm3, %v8303_v19, 0.0 }
 0x6b9   :  { %1810 = vadd.xlane.f32.xlu1 %v1809_v20 }
 0x6d0   :  { %v1784_v61 = vpop.xlane.xlu1 %1783 }
 0x6d1   :  { %v1792_v62 = vsub.f32 %v1623_v5, %v1784_v61  ;;  %v8194_v5 = vld [vmem:[#allocation14 + $0x8] sm:$0xff]  }
 0x6d3   :  { %v1797_v54 = vmul.f32 1.442695, %v1792_v62 }
 0x6d4   :  { %v1790_v21 = vpop.xlane.xlu0 %1789 }
 0x6d5   :  { %8304 = vpow2.f32 %v1797_v54  ;;  %v1794_v56 = vsub.f32 %v1775_v10, %v1790_v21 }
 0x6d7   :  { %v1801_v57 = vmul.f32 1.442695, %v1794_v56 }
 0x6d9   :  { %8306 = vpow2.f32 %v1801_v57 }
 0x6e2   :  { %v8305_v22 = vpop.eup %8304 }
 0x6e3   :  { %v1806_v23 = vsel %vm897_vm3, %v8305_v22, 0.0 }
 0x6e4   :  { %1807 = vadd.xlane.f32.xlu0 %v1806_v23 }
 0x6e6   :  { %v8307_v24 = vpop.eup %8306 }
 0x6e7   :  { %v1812_v60 = vsel %vm897_vm3, %v8307_v24, 0.0 }
 0x6e8   :  { %1813 = vadd.xlane.f32.xlu0 %v1812_v60 }
 0x73e   :  { %v1805_v25 = vpop.xlane.xlu1 %1804 }
 0x73f   :  { %8308 = vrcp.f32 %v1805_v25 }
 0x742   :  { %v1811_v26 = vpop.xlane.xlu1 %1810 }
 0x743   :  { %8310 = vrcp.f32 %v1811_v26 }
 0x74c   :  { %v8309_v27 = vpop.eup %8308 }
 0x74d   :  { %v1816_v28 = vmul.f32 %v8309_v27, %v8301_v48 }
 0x74f   :  { %7653 = vmatmul.mubr.msk.f32.vlgmr.msra.gmra.mxu0 %vm942_vm4, %v1816_v28 }
 0x750   :  { %v8311_v30 = vpop.eup %8310  ;;  %7661 = vmatpush3.msk.msra.mxu0 %vm946_vm2, %v1975_v29  ;;  %7662 = vmatprep.mubr.msk.f32.mxu0 %vm8706_vm0, %v8705_v3  ;;  %v7143_v29 = vld [vmem:[#allocation15] ss:$0 sm:$0xff] }
 0x751   :  { %v1820_v31 = vmul.f32 %v8311_v30, %v8303_v19  ;;  %7670 = vmatprep.subr.bf16.mxu0 %v8705_v3 }
 0x753   :  { %7663 = vmatmul.mubr.msk.f32.vlgmr.msra.gmra.mxu0 %vm942_vm4, %v1820_v31 }
 0x754   :  { %7671 = vmatpush3.bf16.msra.mxu0 %v9016_v45  ;;  %7674 = vmatprep.mubr.msk.bf16.mxu0 %vm8706_vm0, %v8705_v3 }
 0x755   :  { %7672 = vmatprep.subr.bf16.mxu0 %v8705_v3 }
 0x758   :  { %7673 = vmatpush3.bf16.msra.mxu0 %v9021_v47 }
 0x759   :  { %7686 = vmatprep.subr.bf16.mxu0 %v8705_v3 }
 0x76d   :  { %v1808_v37 = vpop.xlane.xlu0 %1807 }
 0x76e   :  { %8312 = vrcp.f32 %v1808_v37 }
 0x771   :  { %v1814_v32 = vpop.xlane.xlu0 %1813 }
 0x772   :  { %8314 = vrcp.f32 %v1814_v32 }
 0x77b   :  { %v8313_v33 = vpop.eup %8312 }
 0x77c   :  { %v1818_v34 = vmul.f32 %v8313_v33, %v8305_v22 }
 0x77e   :  { %7658 = vmatmul.mubr.msk.f32.vlgmr.msra.gmra.mxu1 %vm942_vm4, %v1818_v34 }
 0x77f   :  { %v8315_v45 = vpop.eup %8314  ;;  %7666 = vmatpush3.msk.msra.mxu1 %vm946_vm2, %v2051_v35  ;;  %7667 = vmatprep.mubr.msk.f32.mxu1 %vm8706_vm0, %v8705_v3  ;;  %v9188_v35 = vld [vmem:[#allocation8] sm:$0xff] }
 0x780   :  { %v1822_v36 = vmul.f32 %v8315_v45, %v8307_v24  ;;  %7678 = vmatprep.subr.bf16.mxu1 %v8705_v3  ;;  %v7142_v24 = vld [vmem:[#allocation12] ss:$0 sm:$0xff] }
 0x782   :  { %7668 = vmatmul.mubr.msk.f32.vlgmr.msra.gmra.mxu1 %vm942_vm4, %v1822_v36 }
 0x783   :  { %7679 = vmatpush3.bf16.msra.mxu1 %v9034_v53  ;;  %7682 = vmatprep.mubr.msk.bf16.mxu1 %vm8706_vm0, %v8705_v3 }
 0x784   :  { %7680 = vmatprep.subr.bf16.mxu1 %v8705_v3 }
 0x787   :  { %7681 = vmatpush3.bf16.msra.mxu1 %v9042_v63 }
 0x788   :  { %7694 = vmatprep.subr.bf16.mxu1 %v8705_v3 }
 0x80f   :  { %v1895_v47 = vpop.f32.mrf.mxu0 }
 0x810   :  { %v2127_v51 = vpack.c.bf16 %v1895_v47, %v1895_v47  ;;  %v2597_v47 = vld [vmem:[%s9776_s7] sm:$0xff] }
 0x811   :  { %v7654_v39 = vpop.f32.mrf.mxu0 }
 0x812   :  { %7675 = vmatmul.mubr.msk.bf16.vlgmr.msra.gmra.mxu0 %vm600_vm1, %v2127_v51 }
 0x813   :  { %v2047_v41 = vpop.f32.mrf.mxu0  ;;  %7687 = vmatpush3.bf16.msra.mxu0 %v9047_v1  ;;  %7690 = vmatprep.mubr.msk.bf16.mxu0 %vm8706_vm0, %v8705_v3 }
 0x814   :  { %7688 = vmatprep.subr.bf16.mxu0 %v8705_v3  ;;  %v2129_v42 = vpack.c.bf16 %v2047_v41, %v2047_v41 }
 0x815   :  { %v7664_v53 = vpop.f32.mrf.mxu0 }
 0x817   :  { %7689 = vmatpush3.bf16.msra.mxu0 %v9052_v6 }
 0x818   :  { %7702 = vmatprep.subr.bf16.mxu0 %v8705_v3 }
 0x81a   :  { %7691 = vmatmul.mubr.msk.bf16.vlgmr.msra.gmra.mxu0 %vm600_vm1, %v2129_v42  ;;  %v8196_v42 = vld [vmem:[#allocation17 + $0xa8] ss:$12 sps:$4 sm:$0xff]  }
 0x81b   :  { %7718 = vmatprep.mubr.msk.bf16.mxu0 %vm8706_vm0, %v8705_v3  ;;  %7703 = vmatpush3.bf16.msra.mxu0 %v8188_v50  ;;  %v8207_v50 = vld [vmem:[#allocation17 + $0x80] ss:$12 sps:$4 sm:$0xff]  }
 0x81c   :  { %7704 = vmatprep.subr.bf16.mxu0 %v8705_v3 }
 0x81f   :  { %7705 = vmatpush3.bf16.msra.mxu0 %v8189_v58  ;;  %v8204_v58 = vld [vmem:[#allocation17 + $0x78] ss:$12 sps:$4 sm:$0xff]  }
 0x820   :  { %7706 = vmatprep.subr.bf16.mxu0 %v8705_v3 }
 0x83e   :  { %v1971_v63 = vpop.f32.mrf.mxu1 }
 0x83f   :  { %v2128_v43 = vpack.c.bf16 %v1971_v63, %v1971_v63  ;;  %v8198_v63 = vld [vmem:[#allocation17 + $0xac] ss:$12 sps:$4 sm:$0xff]  }
 0x840   :  { %v7659_v44 = vpop.f32.mrf.mxu1 }
 0x841   :  { %7683 = vmatmul.mubr.msk.bf16.vlgmr.msra.gmra.mxu1 %vm600_vm1, %v2128_v43  ;;  %v8199_v43 = vld [vmem:[#allocation17 + $0xb0] ss:$12 sps:$4 sm:$0xff]   ;;  %v8202_v44 = vld [vmem:[#allocation17 + $0x94] ss:$12 sps:$4 sm:$0xff]  }
 0x842   :  { %v2123_v1 = vpop.f32.mrf.mxu1  ;;  %7695 = vmatpush3.bf16.msra.mxu1 %v9060_v8  ;;  %7698 = vmatprep.mubr.msk.bf16.mxu1 %vm8706_vm0, %v8705_v3  ;;  %v8190_v8 = vld [vmem:[#allocation14 + $0x28] sm:$0xff]  }
 0x843   :  { %7696 = vmatprep.subr.bf16.mxu1 %v8705_v3  ;;  %v2130_v46 = vpack.c.bf16 %v2123_v1, %v2123_v1  ;;  %7707 = vmatpush3.bf16.msra.mxu0 %v8190_v8  ;;  %v8203_v1 = vld [vmem:[#allocation17 + $0x98] ss:$12 sps:$4 sm:$0xff]  }
 0x844   :  { %v7669_v6 = vpop.f32.mrf.mxu1  ;;  %7708 = vmatprep.subr.bf16.mxu0 %v8705_v3  ;;  %v8210_v8 = vld [vmem:[#allocation17 + $0x64] ss:$12 sps:$4 sm:$0xff]  }
 0x845   :  { %v8200_v6 = vld [vmem:[#allocation17 + $0x90] ss:$12 sps:$4 sm:$0xff]  }
 0x846   :  { %7697 = vmatpush3.bf16.msra.mxu1 %v9065_v11  ;;  %v8191_v11 = vld [vmem:[#allocation14 + $0x20] sm:$0xff]  }
 0x847   :  { %7722 = vmatprep.subr.mxu1 %v8705_v3  ;;  %7709 = vmatpush3.bf16.msra.mxu0 %v8191_v11  ;;  %v8211_v11 = vld [vmem:[#allocation17 + $0x68] ss:$12 sps:$4 sm:$0xff]  }
 0x848   :  { %7710 = vmatprep.subr.bf16.mxu0 %v8705_v3 }
 0x849   :  { %7699 = vmatmul.mubr.msk.bf16.vlgmr.msra.gmra.mxu1 %vm600_vm1, %v2130_v46  ;;  %v8206_v46 = vld [vmem:[#allocation17 + $0x7c] ss:$12 sps:$4 sm:$0xff]  }
 0x84a   :  { %7724 = vmatprep.mubr.msk.f32.mxu1 %vm8706_vm0, %v8705_v3 }
 0x84b   :  { %7711 = vmatpush3.bf16.msra.mxu0 %v8192_v0  ;;  %v8208_v0 = vld [vmem:[#allocation17 + $0x60] ss:$12 sps:$4 sm:$0xff]  }
 0x84c   :  { %7712 = vmatprep.subr.bf16.mxu0 %v8705_v3 }
 0x84f   :  { %7713 = vmatpush3.bf16.msra.mxu0 %v8193_v4  ;;  %v8214_v4 = vld [vmem:[#allocation17 + $0x4c] ss:$12 sps:$4 sm:$0xff]  }
 0x850   :  { %7714 = vmatprep.subr.bf16.mxu0 %v8705_v3 }
 0x853   :  { %7715 = vmatpush3.bf16.msra.mxu0 %v8194_v5  ;;  %v8215_v5 = vld [vmem:[#allocation17 + $0x50] ss:$12 sps:$4 sm:$0xff]  }
 0x854   :  { %7716 = vmatprep.subr.bf16.mxu0 %v8705_v3 }
 0x857   :  { %7717 = vmatpush3.bf16.msra.mxu0 %v8195_v7  ;;  %v8212_v7 = vld [vmem:[#allocation17 + $0x48] ss:$12 sps:$4 sm:$0xff]  }
 0x858   :  { %7732 = vmatprep.subr.bf16.mxu0 %v8705_v3 }
 0x8d2   :  { %v2168_v9 = vpop.f32.mrf.mxu0 }
 0x8d3   :  { %v2303_v59 = vsel %vm946_vm2, %v2168_v9, 0.0  ;;  %v8218_v9 = vld [vmem:[#allocation17 + $0x34] ss:$12 sps:$4 sm:$0xff]  }
 0x8d4   :  { %v7676_v10 = vpop.f32.mrf.mxu0 }
 0x8d5   :  { %v8219_v10 = vld [vmem:[#allocation17 + $0x38] ss:$12 sps:$4 sm:$0xff]  }
 0x8d6   :  { %v2171_v12 = vpop.f32.mrf.mxu0 }
 0x8d7   :  { %v8216_v12 = vld [vmem:[#allocation17 + $0x30] ss:$12 sps:$4 sm:$0xff]  }
 0x8d8   :  { %v7677_v13 = vpop.f32.mrf.mxu0 }
 0x8da   :  { %v2254_v14 = vpop.f32.mrf.mxu0 }
 0x8db   :  { %v2306_v62 = vsel %vm946_vm2, %v2254_v14, 0.0 }
 0x8dc   :  { %v7692_v15 = vpop.f32.mrf.mxu0 }
 0x8de   :  { %v2257_v16 = vpop.f32.mrf.mxu0 }
 0x8df   :  { %v8220_v16 = vld [vmem:[#allocation17 + $0x18] ss:$12 sps:$4 sm:$0xff]  }
 0x8e0   :  { %v7693_v17 = vpop.f32.mrf.mxu0 }
 0x8e1   :  { %v8222_v17 = vld [vmem:[#allocation17 + $0x1c] ss:$12 sps:$4 sm:$0xff]  }
 0x901   :  { %v2211_v49 = vpop.f32.mrf.mxu1 }
 0x902   :  { %v2304_v18 = vsel %vm946_vm2, %v2211_v49, 0.0  ;;  %v8223_v49 = vld [vmem:[#allocation17 + $0x20] ss:$12 sps:$4 sm:$0xff]  }
 0x903   :  { %v7684_v48 = vpop.f32.mrf.mxu1  ;;  %v2305_v19 = vadd.f32 %v2304_v18, %v2303_v59  ;;  %v2604_v59 = vld [vmem:[%s9777_s16] sm:$0xff] }
 0x904   :  { %v8226_v48 = vld [vmem:[#allocation17 + $0x4] ss:$12 sps:$4 sm:$0xff]  }
 0x905   :  { %v2214_v20 = vpop.f32.mrf.mxu1  ;;  %v2307_v21 = vadd.f32 %v2306_v62, %v2305_v19  ;;  %v8224_v19 = vld [vmem:[#allocation17] ss:$12 sps:$4 sm:$0xff]  }
 0x906   :  { %v8227_v20 = vld [vmem:[#allocation17 + $0x8] ss:$12 sps:$4 sm:$0xff]  }
 0x907   :  { %v7685_v61 = vpop.f32.mrf.mxu1 }
 0x909   :  { %v2297_v54 = vpop.f32.mrf.mxu1 }
 0x90a   :  { %v2308_v56 = vsel %vm946_vm2, %v2297_v54, 0.0 }
 0x90b   :  { %v2309_v57 = vadd.f32 %v2308_v56, %v2307_v21  ;;  %v7700_v22 = vpop.f32.mrf.mxu1 }
 0x90d   :  { %v2311_v23 = vrot.slane %v2309_v57, 4  ;;  %v2300_v60 = vpop.f32.mrf.mxu1 }
 0x90f   :  { %v2313_v25 = vsel %vm946_vm2, %v9118_v52, %v2311_v23  ;;  %v7701_v26 = vpop.f32.mrf.mxu1  ;;  %v2644_v23 = vld [vmem:[%s9778_s15] sm:$0x7] }
 0x910   :  { %v2321_v27 = vadd.f32 %v7142_v24, %v2313_v25  ;;  %v2649_v24 = vrot.slane %v2644_v23, %v8914_v38  ;;  %v2653_v60 = vrot.slane %v2644_v23, %v8917_v40 }
 0x912   :  { %v2322_v28 = vpack.c.bf16 %v2321_v27, %v2321_v27 }
 0x914   :  { %7719 = vmatmul.mubr.bf16.vlgmr.msra.gmra.mxu0 %v2322_v28 }
 0x915   :  { %7748 = vmatprep.mubr.msk.bf16.mxu0 %vm8706_vm0, %v8705_v3  ;;  %7733 = vmatpush3.bf16.msra.mxu0 %v8199_v43 }
 0x916   :  { %7734 = vmatprep.subr.bf16.mxu0 %v8705_v3 }
 0x919   :  { %7735 = vmatpush3.bf16.msra.mxu0 %v8203_v1 }
 0x91a   :  { %7736 = vmatprep.subr.bf16.mxu0 %v8705_v3 }
 0x91d   :  { %7737 = vmatpush3.bf16.msra.mxu0 %v8207_v50 }
 0x91e   :  { %7738 = vmatprep.subr.bf16.mxu0 %v8705_v3 }
 0x921   :  { %7739 = vmatpush3.bf16.msra.mxu0 %v8211_v11 }
 0x922   :  { %7740 = vmatprep.subr.bf16.mxu0 %v8705_v3 }
 0x925   :  { %7741 = vmatpush3.bf16.msra.mxu0 %v8215_v5 }
 0x926   :  { %7742 = vmatprep.subr.bf16.mxu0 %v8705_v3 }
 0x929   :  { %7743 = vmatpush3.bf16.msra.mxu0 %v8219_v10 }
 0x92a   :  { %7744 = vmatprep.subr.bf16.mxu0 %v8705_v3 }
 0x92d   :  { %7745 = vmatpush3.bf16.msra.mxu0 %v8223_v49 }
 0x92e   :  { %7746 = vmatprep.subr.bf16.mxu0 %v8705_v3 }
 0x931   :  { %7747 = vmatpush3.bf16.msra.mxu0 %v8227_v20 }
 0x932   :  { %7777 = vmatprep.subr.mxu0 %v8705_v3 }
 0x9d4   :  { %v2428_v30 = vpop.f32.mrf.mxu0 }
 0x9d5   :  { %v2429_v31 = vadd.f32 %v7143_v29, %v2428_v30 }
 0x9d6   :  { %v7720_v37 = vpop.f32.mrf.mxu0 }
 0x9d7   :  { %v2434_v32 = vmax.f32 %v2429_v31, 0.0 }
 0x9d8   :  { %v2431_v33 = vpop.f32.mrf.mxu0 }
 0x9d9   :  { %2435 = vadd.xlane.f32.xlu1 %v2434_v32 }
 0x9da   :  { %v7721_v34 = vpop.f32.mrf.mxu0 }
 0xa62   :  { %v2436_v52 = vpop.xlane.xlu1 %2435 }
 0xa63   :  { %7723 = vmatpush3.msra.mxu1 %v2436_v52 }
 0xa64   :  { %7725 = vmatmul.mubr.msk.f32.vlgmr.msra.gmra.mxu1 %vm2437_vm5, %v9188_v35  ;;  %7727 = vmatprep.subr.mxu1 %v8705_v3 }
 0xa65   :  { %7729 = vmatprep.mubr.msk.f32.mxu1 %vm8706_vm0, %v8705_v3 }
 0xb24   :  { %v2507_v45 = vpop.f32.mrf.mxu1 }
 0xb25   :  { %2513 = vperm.xlu0 %8146, %v2507_v45  }
 0xb26   :  { %v7726_v36 = vpop.f32.mrf.mxu1 }
 0xb29   :  { %2600 = vperm.xlu0 %8146, %v2597_v47  }
 0xba0   :  { %v2514_v51 = vpop.permute.xlu0 %2513 }
 0xba1   :  { %v9196_v39 = vsub.f32 %v2434_v32, %v2514_v51  ;;  %v2657_v51 = vrot.slane %v2644_v23, %v8946_v55 }
 0xba3   :  { %v2517_v41 = vmul.f32 %v9196_v39, %v9196_v39 }
 0xba4   :  { %v2601_v54 = vpop.permute.xlu0 %2600 }
 0xba5   :  { %2518 = vadd.xlane.f32.xlu1 %v2517_v41 }
 0xc2e   :  { %v2519_v53 = vpop.xlane.xlu1 %2518 }
 0xc2f   :  { %7728 = vmatpush3.msra.mxu1 %v2519_v53 }
 0xc30   :  { %7730 = vmatmul.mubr.msk.f32.vlgmr.msra.gmra.mxu1 %vm2437_vm5, %v9188_v35  ;;  %2789 = vmatprep.subr.bf16.mxu1 %v8198_v63 }
 0xc31   :  { %2821 = vmatprep.mubr.bf16.mxu1 %v8704_v2  ;;  %2790 = vmatpush1.bf16.msra.mxu1 %v8196_v42 }
 0xc32   :  { %2791 = vmatprep.subr.bf16.mxu1 %v8202_v44 }
 0xc35   :  { %2792 = vmatpush1.bf16.msra.mxu1 %v8200_v6 }
 0xc36   :  { %2793 = vmatprep.subr.bf16.mxu1 %v8206_v46 }
 0xc39   :  { %2794 = vmatpush1.bf16.msra.mxu1 %v8204_v58 }
 0xc3a   :  { %2795 = vmatprep.subr.bf16.mxu1 %v8210_v8 }
 0xc3d   :  { %2796 = vmatpush1.bf16.msra.mxu1 %v8208_v0 }
 0xc3e   :  { %2797 = vmatprep.subr.bf16.mxu1 %v8214_v4 }
 0xc41   :  { %2798 = vmatpush1.bf16.msra.mxu1 %v8212_v7 }
 0xc42   :  { %2799 = vmatprep.subr.bf16.mxu1 %v8218_v9 }
 0xc45   :  { %2800 = vmatpush1.bf16.msra.mxu1 %v8216_v12 }
 0xc46   :  { %2801 = vmatprep.subr.bf16.mxu1 %v8222_v17 }
 0xc49   :  { %2802 = vmatpush1.bf16.msra.mxu1 %v8220_v16 }
 0xc4a   :  { %2803 = vmatprep.subr.bf16.mxu1 %v8226_v48 }
 0xc4d   :  { %2804 = vmatpush1.bf16.msra.mxu1 %v8224_v19 }
 0xc4e   :  { %7752 = vmatprep.subr.mxu1 %v8705_v3 }
 0xcf0   :  { %v2586_v13 = vpop.f32.mrf.mxu1 }
 0xcf1   :  { %v2587_v14 = vadd.f32 1e-05, %v2586_v13 }
 0xcf2   :  { %v7731_v15 = vpop.f32.mrf.mxu1 }
 0xcf3   :  { %8316 = vrsqrt.f32 %v2587_v14 }
 0xd00   :  { %v8317_v18 = vpop.eup %8316 }
 0xd01   :  { %2593 = vperm.xlu1 %8147, %v8317_v18  }
 0xd05   :  { %2607 = vperm.xlu1 %8147, %v2604_v59  }
 0xd7c   :  { %v2594_v61 = vpop.permute.xlu1 %2593 }
 0xd7d   :  { %v2596_v62 = vmul.f32 %v2594_v61, %v9196_v39 }
 0xd7f   :  { %v2603_v21 = vmul.f32 %v2601_v54, %v2596_v62 }
 0xd80   :  { %v2608_v56 = vpop.permute.xlu1 %2607 }
 0xd81   :  { %v2610_v57 = vadd.f32 %v2608_v56, %v2603_v21 }
 0xd83   :  { %v2611_v22 = vpack.c.bf16 %v2610_v57, %v2610_v57 }
 0xd85   :  { %2822 = vmatmul.mubr.bf16.vlgmr.msra.gmra.mxu1 %v2611_v22  ;;  %7749 = vmatmul.mubr.bf16.vlgmr.msra.gmra.mxu0 %v2611_v22 }
 0xd86   :  { %7754 = vmatprep.mubr.msk.f32.mxu1 %vm8706_vm0, %v8705_v3  ;;  %7779 = vmatprep.mubr.msk.f32.mxu0 %vm8706_vm0, %v8705_v3 }
 0xe45   :  { %v2823_v25 = vpop.f32.mrf.mxu1  ;;  %v2864_v26 = vpop.f32.mrf.mxu0 }
 0xe46   :  { %v2824_v27 = vadd.f32 %v2823_v25, %v2649_v24  ;;  %v9272_v41 = vadd.f32 %v2864_v26, %v2657_v51  ;;  %v9326_v51 = vld [vmem:[#allocation18 + $0x18] sm:$0xff]  }
 0xe47   :  { %v2825_v28 = vpop.f32.mrf.mxu1  ;;  %v7750_v29 = vpop.f32.mrf.mxu0 }
 0xe48   :  { %v9221_v30 = vmul.f32 0.17677669, %v2824_v27  ;;  %v9223_v31 = vadd.f32 %v2825_v28, %v2653_v60 }
 0xe49   :  { %v2827_v37 = vpop.f32.mrf.mxu1  ;;  %v2867_v32 = vpop.f32.mrf.mxu0 }
 0xe4a   :  { %2895 = vrot.lane.b32.xlu0 %v9223_v31, %s8707_s30  ;;  %7753 = vmatpush3.xpose.msk.msra.mxu1 %vm600_vm1, %v9223_v31  ;;  %v9317_v37 = vld [vmem:[#allocation18 + $0x8] sm:$0xff]  }
 0xe4b   :  { %2888 = vrot.lane.b32.xlu1 %v9221_v30, %s8707_s30  ;;  %v2828_v33 = vpop.f32.mrf.mxu1  ;;  %v7751_v34 = vpop.f32.mrf.mxu0  ;;  %7757 = vmatprep.subr.mxu1 %v8705_v3 }
 0xe4c   :  { %v9322_v34 = vld [vmem:[#allocation18] sm:$0xff]  }
 0xe4d   :  { %7755 = vmatmul.mubr.msk.f32.vlgmr.msra.gmra.mxu1 %vm600_vm1, %v9221_v30 }
 0xe4e   :  { %2897 = vrot.lane.b32.xlu0 %v9223_v31, %s8692_s8  ;;  %7759 = vmatprep.mubr.msk.f32.mxu1 %vm8706_vm0, %v8705_v3 }
 0xe4f   :  { %2890 = vrot.lane.b32.xlu1 %v9221_v30, %s8692_s8 }
 0xe52   :  { %2899 = vrot.lane.b32.xlu0 %v9223_v31, %s8708_s6 }
 0xe53   :  { %2892 = vrot.lane.b32.xlu1 %v9221_v30, %s8708_s6 }
 0xebc   :  { %v9244_v52 = vpop.permute.xlu0 %2895 }
 0xebd   :  { %v9246_v45 = vpop.permute.xlu1 %2888  ;;  %7758 = vmatpush3.xpose.msk.msra.mxu1 %vm600_vm1, %v9244_v52 }
 0xebe   :  { %7762 = vmatprep.subr.mxu1 %v8705_v3 }
 0xec0   :  { %v9251_v36 = vpop.permute.xlu0 %2897  ;;  %7760 = vmatmul.mubr.msk.f32.vlgmr.msra.gmra.mxu1 %vm600_vm1, %v9246_v45 }
 0xec1   :  { %v9255_v47 = vpop.permute.xlu1 %2890  ;;  %7763 = vmatpush3.xpose.msk.msra.mxu1 %vm600_vm1, %v9251_v36  ;;  %7764 = vmatprep.mubr.msk.f32.mxu1 %vm8706_vm0, %v8705_v3 }
 0xec2   :  { %7767 = vmatprep.subr.mxu1 %v8705_v3 }
 0xec4   :  { %v9263_v39 = vpop.permute.xlu0 %2899  ;;  %7765 = vmatmul.mubr.msk.f32.vlgmr.msra.gmra.mxu1 %vm600_vm1, %v9255_v47 }
 0xec5   :  { %7768 = vmatpush3.xpose.msk.msra.mxu1 %vm600_vm1, %v9263_v39  ;;  %7769 = vmatprep.mubr.msk.f32.mxu1 %vm8706_vm0, %v8705_v3  ;;  %v9274_v53 = vpop.permute.xlu1 %2892 }
 0xec6   :  { %7772 = vmatprep.subr.mxu1 %v8705_v3 }
 0xec8   :  { %7770 = vmatmul.mubr.msk.f32.vlgmr.msra.gmra.mxu1 %vm600_vm1, %v9274_v53 }
 0xec9   :  { %7773 = vmatpush3.msk.msra.mxu1 %vm946_vm2, %v9272_v41  ;;  %7774 = vmatprep.mubr.msk.f32.mxu1 %vm8706_vm0, %v8705_v3 }
 0xeca   :  { %7782 = vmatprep.subr.mxu1 %v8705_v3 }
 0xf0d   :  { %v2978_v42 = vpop.f32.mrf.mxu1 }
 0xf0e   :  { %v3204_v63 = vsel %vm897_vm3, %v2978_v42, -inf }
 0xf0f   :  { %3205 = vmax.xlane.f32.xlu0 %v3204_v63  ;;  %v7756_v43 = vpop.f32.mrf.mxu1  ;;  %v9332_v63 = vld [vmem:[#allocation18 + $0x10] sm:$0xff]  }
 0xf80   :  { %v3052_v44 = vpop.f32.mrf.mxu1 }
 0xf81   :  { %v3207_v1 = vsel %vm897_vm3, %v3052_v44, -inf }
 0xf82   :  { %3208 = vmax.xlane.f32.xlu1 %v3207_v1  ;;  %v7761_v6 = vpop.f32.mrf.mxu1 }
 0xf84   :  { %v3126_v46 = vpop.f32.mrf.mxu1 }
 0xf85   :  { %v3210_v50 = vsel %vm897_vm3, %v3126_v46, -inf }
 0xf86   :  { %3211 = vmax.xlane.f32.xlu0 %v3210_v50  ;;  %v7766_v58 = vpop.f32.mrf.mxu1 }
 0xf87   :  { %v9351_v58 = vld [vmem:[#allocation18 + $0x38] sm:$0xff]  }
 0xf88   :  { %v3200_v8 = vpop.f32.mrf.mxu1 }
 0xf89   :  { %v3213_v11 = vsel %vm897_vm3, %v3200_v8, -inf }
 0xf8a   :  { %3214 = vmax.xlane.f32.xlu0 %v3213_v11  ;;  %v7771_v0 = vpop.f32.mrf.mxu1 }
 0xf93   :  { %2902 = vrot.lane.b32.xlu1 %v9272_v41, %s8707_s30 }
 0xf98   :  { %v3206_v4 = vpop.xlane.xlu0 %3205 }
 0xf99   :  { %v3216_v5 = vsub.f32 %v2978_v42, %v3206_v4  ;;  %v9355_v4 = vld [vmem:[#allocation18 + $0x30] sm:$0xff]  }
 0xf9b   :  { %v3220_v7 = vmul.f32 1.442695, %v3216_v5 }
 0xf9d   :  { %8318 = vpow2.f32 %v3220_v7 }
 0xfaa   :  { %v8319_v9 = vpop.eup %8318 }
 0xfab   :  { %v3228_v10 = vsel %vm897_vm3, %v8319_v9, 0.0 }
 0xfb7   :  { %3229 = vadd.xlane.f32.xlu1 %v3228_v10 }
0x100b   :  { %v3209_v12 = vpop.xlane.xlu1 %3208 }
0x100c   :  { %v3217_v13 = vsub.f32 %v3052_v44, %v3209_v12  ;;  %v9340_v44 = vld [vmem:[#allocation18 + $0x28] sm:$0xff]  }
0x100e   :  { %v3222_v14 = vmul.f32 1.442695, %v3217_v13  ;;  %v3856_v13 = vrot.slane %v9244_v52, 4  ;;  %v3855_v52 = vrot.slane %v9246_v45, 4 }
0x100f   :  { %v3212_v15 = vpop.xlane.xlu0 %3211  ;;  %v9290_v16 = vpop.permute.xlu1 %2902 }
0x1010   :  { %8320 = vpow2.f32 %v3222_v14  ;;  %v3218_v17 = vsub.f32 %v3126_v46, %v3212_v15  ;;  %7778 = vmatpush3.msk.msra.mxu0 %vm946_vm2, %v9290_v16  ;;  %v9344_v46 = vld [vmem:[#allocation18 + $0x20] sm:$0xff]   ;;  %v3932_v15 = vrot.slane %v9251_v36, 4  ;;  %v4007_v36 = vrot.slane %v9274_v53, 4 }
0x1011   :  { %7787 = vmatprep.subr.mxu0 %v8705_v3  ;;  %v4203_v45 = vrot.slane %v9290_v16, 4 }
0x1012   :  { %v3224_v49 = vmul.f32 1.442695, %v3218_v17  ;;  %v3931_v17 = vrot.slane %v9255_v47, 4 }
0x1013   :  { %v3215_v18 = vpop.xlane.xlu0 %3214 }
0x1014   :  { %8322 = vpow2.f32 %v3224_v49  ;;  %v3219_v48 = vsub.f32 %v3200_v8, %v3215_v18  ;;  %v4008_v49 = vrot.slane %v9263_v39, 4 }
0x1016   :  { %v3226_v59 = vmul.f32 1.442695, %v3219_v48 }
0x1018   :  { %8324 = vpow2.f32 %v3226_v59 }
0x101d   :  { %v8321_v19 = vpop.eup %8320 }
0x101e   :  { %v3231_v20 = vsel %vm897_vm3, %v8321_v19, 0.0 }
0x101f   :  { %3232 = vadd.xlane.f32.xlu0 %v3231_v20 }
0x1021   :  { %v8323_v61 = vpop.eup %8322 }
0x1022   :  { %v3234_v62 = vsel %vm897_vm3, %v8323_v61, 0.0 }
0x1023   :  { %3235 = vadd.xlane.f32.xlu1 %v3234_v62 }
0x1025   :  { %v8325_v54 = vpop.eup %8324 }
0x1026   :  { %v3237_v21 = vsel %vm897_vm3, %v8325_v54, 0.0 }
0x1027   :  { %3238 = vadd.xlane.f32.xlu0 %v3237_v21 }
0x1034   :  { %2906 = vrot.lane.b32.xlu1 %v9272_v41, %s8708_s6 }
0x103d   :  { %2904 = vrot.lane.b32.xlu0 %v9272_v41, %s8692_s8 }
0x1040   :  { %v3230_v56 = vpop.xlane.xlu1 %3229 }
0x1041   :  { %8326 = vrcp.f32 %v3230_v56 }
0x104e   :  { %v8327_v57 = vpop.eup %8326 }
0x104f   :  { %v3241_v22 = vmul.f32 %v8327_v57, %v8319_v9  ;;  %v3780_v9 = vrot.slane %v9223_v31, 4  ;;  %v3779_v31 = vrot.slane %v9221_v30, 4  ;;  %v4127_v30 = vrot.slane %v9272_v41, 4 }
0x1051   :  { %7775 = vmatmul.mubr.msk.f32.vlgmr.msra.gmra.mxu1 %vm942_vm4, %v3241_v22 }
0x1052   :  { %7784 = vmatprep.mubr.msk.f32.mxu1 %vm8706_vm0, %v8705_v3 }
0x10a8   :  { %v3233_v23 = vpop.xlane.xlu0 %3232 }
0x10a9   :  { %8328 = vrcp.f32 %v3233_v23 }
0x10ac   :  { %v3236_v24 = vpop.xlane.xlu1 %3235 }
0x10ad   :  { %8330 = vrcp.f32 %v3236_v24 }
0x10b0   :  { %v3239_v60 = vpop.xlane.xlu0 %3238  ;;  %v9310_v28 = vpop.permute.xlu1 %2906 }
0x10b1   :  { %8332 = vrcp.f32 %v3239_v60 }
0x10b4   :  { %v9305_v25 = vpop.permute.xlu0 %2904 }
0x10b5   :  { %7783 = vmatpush3.msk.msra.mxu1 %vm946_vm2, %v9305_v25 }
0x10b6   :  { %v8329_v26 = vpop.eup %8328  ;;  %7792 = vmatprep.subr.bf16.mxu1 %v8705_v3 }
0x10b7   :  { %v3243_v27 = vmul.f32 %v8329_v26, %v8321_v19 }
0x10b9   :  { %7780 = vmatmul.mubr.msk.f32.vlgmr.msra.gmra.mxu0 %vm942_vm4, %v3243_v27 }
0x10ba   :  { %v8331_v29 = vpop.eup %8330  ;;  %7788 = vmatpush3.msk.msra.mxu0 %vm946_vm2, %v9310_v28  ;;  %7789 = vmatprep.mubr.msk.f32.mxu0 %vm8706_vm0, %v8705_v3 }
0x10bb   :  { %v3245_v32 = vmul.f32 %v8331_v29, %v8323_v61  ;;  %7800 = vmatprep.subr.bf16.mxu0 %v8705_v3 }
0x10bd   :  { %7785 = vmatmul.mubr.msk.f32.vlgmr.msra.gmra.mxu1 %vm942_vm4, %v3245_v32 }
0x10be   :  { %v8333_v33 = vpop.eup %8332  ;;  %7793 = vmatpush3.bf16.msra.mxu1 %v9317_v37  ;;  %7796 = vmatprep.mubr.msk.bf16.mxu1 %vm8706_vm0, %v8705_v3 }
0x10bf   :  { %v3247_v42 = vmul.f32 %v8333_v33, %v8325_v54  ;;  %7794 = vmatprep.subr.bf16.mxu1 %v8705_v3 }
0x10c1   :  { %7790 = vmatmul.mubr.msk.f32.vlgmr.msra.gmra.mxu0 %vm942_vm4, %v3247_v42 }
0x10c2   :  { %7795 = vmatpush3.bf16.msra.mxu1 %v9322_v34  ;;  %7801 = vmatpush3.bf16.msra.mxu0 %v9326_v51 }
0x10c3   :  { %7802 = vmatprep.subr.bf16.mxu0 %v8705_v3  ;;  %7808 = vmatprep.subr.bf16.mxu1 %v8705_v3 }
0x10c4   :  { %7804 = vmatprep.mubr.msk.bf16.mxu0 %vm8706_vm0, %v8705_v3 }
0x10c6   :  { %7803 = vmatpush3.bf16.msra.mxu0 %v9332_v63 }
0x10c7   :  { %7816 = vmatprep.subr.bf16.mxu0 %v8705_v3 }
0x1111   :  { %v3319_v43 = vpop.f32.mrf.mxu1 }
0x1112   :  { %v3548_v1 = vpack.c.bf16 %v3319_v43, %v3319_v43 }
0x1113   :  { %v7776_v6 = vpop.f32.mrf.mxu1 }
0x1114   :  { %7797 = vmatmul.mubr.msk.bf16.vlgmr.msra.gmra.mxu1 %vm600_vm1, %v3548_v1 }
0x1115   :  { %7809 = vmatpush3.bf16.msra.mxu1 %v9340_v44  ;;  %7812 = vmatprep.mubr.msk.bf16.mxu1 %vm8706_vm0, %v8705_v3 }
0x1116   :  { %7810 = vmatprep.subr.bf16.mxu1 %v8705_v3 }
0x1119   :  { %7811 = vmatpush3.bf16.msra.mxu1 %v9344_v46 }
0x111a   :  { %7824 = vmatprep.subr.mxu1 %v8705_v3 }
0x1179   :  { %v3394_v50 = vpop.f32.mrf.mxu0 }
0x117a   :  { %v3549_v8 = vpack.c.bf16 %v3394_v50, %v3394_v50 }
0x117b   :  { %v7781_v11 = vpop.f32.mrf.mxu0 }
0x117c   :  { %7805 = vmatmul.mubr.msk.bf16.vlgmr.msra.gmra.mxu0 %vm600_vm1, %v3549_v8 }
0x117d   :  { %7817 = vmatpush3.bf16.msra.mxu0 %v9351_v58  ;;  %v3469_v0 = vpop.f32.mrf.mxu1  ;;  %7820 = vmatprep.mubr.msk.bf16.mxu0 %vm8706_vm0, %v8705_v3 }
0x117e   :  { %v3550_v5 = vpack.c.bf16 %v3469_v0, %v3469_v0  ;;  %7818 = vmatprep.subr.bf16.mxu0 %v8705_v3 }
0x117f   :  { %v7786_v7 = vpop.f32.mrf.mxu1 }
0x1180   :  { %7813 = vmatmul.mubr.msk.bf16.vlgmr.msra.gmra.mxu1 %vm600_vm1, %v3550_v5 }
0x1181   :  { %7819 = vmatpush3.bf16.msra.mxu0 %v9355_v4  ;;  %7825 = vmatpush3.xpose.msk.msra.mxu1 %vm600_vm1, %v3780_v9  ;;  %v3544_v10 = vpop.f32.mrf.mxu0 }
0x1182   :  { %v3551_v12 = vpack.c.bf16 %v3544_v10, %v3544_v10  ;;  %7829 = vmatprep.subr.mxu0 %v8705_v3  ;;  %7826 = vmatprep.mubr.msk.f32.mxu1 %vm8706_vm0, %v8705_v3 }
0x1183   :  { %v7791_v14 = vpop.f32.mrf.mxu0  ;;  %7834 = vmatprep.subr.mxu1 %v8705_v3 }
0x1184   :  { %7821 = vmatmul.mubr.msk.bf16.vlgmr.msra.gmra.mxu0 %vm600_vm1, %v3551_v12 }
0x1185   :  { %7830 = vmatpush3.xpose.msk.msra.mxu0 %vm600_vm1, %v3856_v13  ;;  %7831 = vmatprep.mubr.msk.f32.mxu0 %vm8706_vm0, %v8705_v3 }
0x1186   :  { %7839 = vmatprep.subr.mxu0 %v8705_v3 }
0x1188   :  { %7827 = vmatmul.mubr.msk.f32.vlgmr.msra.gmra.mxu1 %vm600_vm1, %v3779_v31 }
0x1189   :  { %7835 = vmatpush3.xpose.msk.msra.mxu1 %vm600_vm1, %v3932_v15  ;;  %7836 = vmatprep.mubr.msk.f32.mxu1 %vm8706_vm0, %v8705_v3 }
0x118a   :  { %7844 = vmatprep.subr.mxu1 %v8705_v3 }
0x118c   :  { %7832 = vmatmul.mubr.msk.f32.vlgmr.msra.gmra.mxu0 %vm600_vm1, %v3855_v52  ;;  %7837 = vmatmul.mubr.msk.f32.vlgmr.msra.gmra.mxu1 %vm600_vm1, %v3931_v17 }
0x118d   :  { %7840 = vmatpush3.xpose.msk.msra.mxu0 %vm600_vm1, %v4008_v49  ;;  %7845 = vmatpush3.msk.msra.mxu1 %vm946_vm2, %v4127_v30 }
0x118e   :  { %7841 = vmatprep.mubr.msk.f32.mxu0 %vm8706_vm0, %v8705_v3  ;;  %7849 = vmatprep.subr.mxu0 %v8705_v3 }
0x118f   :  { %7846 = vmatprep.mubr.msk.f32.mxu1 %vm8706_vm0, %v8705_v3  ;;  %7854 = vmatprep.subr.mxu1 %v8705_v3 }
0x1190   :  { %7842 = vmatmul.mubr.msk.f32.vlgmr.msra.gmra.mxu0 %vm600_vm1, %v4007_v36 }
0x1191   :  { %7850 = vmatpush3.msk.msra.mxu0 %vm946_vm2, %v4203_v45  ;;  %7851 = vmatprep.mubr.msk.f32.mxu0 %vm8706_vm0, %v8705_v3 }
0x1192   :  { %7859 = vmatprep.subr.mxu0 %v8705_v3 }
0x11d4   :  { %v3601_v47 = vpop.f32.mrf.mxu1 }
0x11d5   :  { %v3772_v16 = vsel %vm946_vm2, %v3601_v47, 0.0 }
0x11d6   :  { %v7798_v39 = vpop.f32.mrf.mxu1 }
0x11d8   :  { %v3604_v41 = vpop.f32.mrf.mxu1 }
0x11da   :  { %v7799_v53 = vpop.f32.mrf.mxu1 }
0x123c   :  { %v3656_v18 = vpop.f32.mrf.mxu0 }
0x123d   :  { %v3773_v48 = vsel %vm946_vm2, %v3656_v18, 0.0 }
0x123e   :  { %v3774_v59 = vadd.f32 %v3773_v48, %v3772_v16  ;;  %v7806_v19 = vpop.f32.mrf.mxu0 }
0x1240   :  { %v3659_v20 = vpop.f32.mrf.mxu0  ;;  %v3711_v61 = vpop.f32.mrf.mxu1 }
0x1241   :  { %v3775_v62 = vsel %vm946_vm2, %v3711_v61, 0.0 }
0x1242   :  { %v3776_v54 = vadd.f32 %v3775_v62, %v3774_v59  ;;  %v7807_v21 = vpop.f32.mrf.mxu0  ;;  %v7814_v56 = vpop.f32.mrf.mxu1 }
0x1243   :  { %v4279_v21 = vrot.slane %v9305_v25, 4 }
0x1244   :  { %v3714_v57 = vpop.f32.mrf.mxu1  ;;  %v3766_v22 = vpop.f32.mrf.mxu0 }
0x1245   :  { %v3777_v23 = vsel %vm946_vm2, %v3766_v22, 0.0  ;;  %v4355_v22 = vrot.slane %v9310_v28, 4 }
0x1246   :  { %v9406_v24 = vadd.f32 %v3777_v23, %v3776_v54  ;;  %v7815_v60 = vpop.f32.mrf.mxu1  ;;  %v7822_v26 = vpop.f32.mrf.mxu0 }
0x1248   :  { %v3769_v27 = vpop.f32.mrf.mxu0  ;;  %v3851_v29 = vpop.f32.mrf.mxu1 }
0x1249   :  { %v4083_v32 = vsel %vm897_vm3, %v3851_v29, -inf }
0x124a   :  { %4084 = vmax.xlane.f32.xlu1 %v4083_v32  ;;  %v7823_v33 = vpop.f32.mrf.mxu0  ;;  %v7828_v42 = vpop.f32.mrf.mxu1  ;;  %v8236_v32 = vld [vmem:[#allocation20 + $0x38] sm:$0xff]  }
0x124c   :  { %v3927_v43 = vpop.f32.mrf.mxu0  ;;  %v4003_v1 = vpop.f32.mrf.mxu1 }
0x124d   :  { %v4086_v6 = vsel %vm897_vm3, %v3927_v43, -inf  ;;  %v4089_v0 = vsel %vm897_vm3, %v4003_v1, -inf }
0x124e   :  { %v7838_v50 = vpop.f32.mrf.mxu1  ;;  %4087 = vmax.xlane.f32.xlu0 %v4086_v6  ;;  %v7833_v8 = vpop.f32.mrf.mxu0  ;;  %v8240_v6 = vld [vmem:[#allocation20 + $0x18] sm:$0xff]  }
0x124f   :  { %v8241_v50 = vld [vmem:[#allocation20 + $0x10] sm:$0xff]   ;;  %v8242_v8 = vld [vmem:[#allocation20 + $0x8] sm:$0xff]  }
0x1250   :  { %v4079_v11 = vpop.f32.mrf.mxu0 }
0x1251   :  { %v4092_v5 = vsel %vm897_vm3, %v4079_v11, -inf }
0x1252   :  { %4090 = vmax.xlane.f32.xlu0 %v4089_v0  ;;  %4093 = vmax.xlane.f32.xlu1 %v4092_v5  ;;  %v7843_v7 = vpop.f32.mrf.mxu0 }
0x12d3   :  { %v4085_v9 = vpop.xlane.xlu1 %4084 }
0x12d4   :  { %v4095_v10 = vsub.f32 %v3851_v29, %v4085_v9 }
0x12d6   :  { %v4099_v12 = vmul.f32 1.442695, %v4095_v10 }
0x12d7   :  { %v4088_v13 = vpop.xlane.xlu0 %4087 }
0x12d8   :  { %8334 = vpow2.f32 %v4099_v12  ;;  %v4096_v14 = vsub.f32 %v3927_v43, %v4088_v13 }
0x12da   :  { %v4101_v31 = vmul.f32 1.442695, %v4096_v14 }
0x12db   :  { %v4091_v15 = vpop.xlane.xlu0 %4090  ;;  %v4094_v52 = vpop.xlane.xlu1 %4093 }
0x12dc   :  { %8336 = vpow2.f32 %v4101_v31  ;;  %v4097_v17 = vsub.f32 %v4003_v1, %v4091_v15  ;;  %v4098_v49 = vsub.f32 %v4079_v11, %v4094_v52  ;;  %v8243_v11 = vld [vmem:[#allocation20] sm:$0xff]  }
0x12de   :  { %v4103_v30 = vmul.f32 1.442695, %v4097_v17  ;;  %v4105_v36 = vmul.f32 1.442695, %v4098_v49 }
0x12e0   :  { %8338 = vpow2.f32 %v4103_v30 }
0x12e1   :  { %8340 = vpow2.f32 %v4105_v36 }
0x12e5   :  { %v8335_v45 = vpop.eup %8334 }
0x12e6   :  { %v4107_v47 = vsel %vm897_vm3, %v8335_v45, 0.0 }
0x12e7   :  { %4108 = vadd.xlane.f32.xlu0 %v4107_v47 }
0x12e9   :  { %v8337_v39 = vpop.eup %8336 }
0x12ea   :  { %v4110_v41 = vsel %vm897_vm3, %v8337_v39, 0.0 }
0x12eb   :  { %4111 = vadd.xlane.f32.xlu1 %v4110_v41 }
0x12ed   :  { %v8339_v53 = vpop.eup %8338 }
0x12ee   :  { %v8341_v18 = vpop.eup %8340  ;;  %v4113_v16 = vsel %vm897_vm3, %v8339_v53, 0.0 }
0x12ef   :  { %4114 = vadd.xlane.f32.xlu0 %v4113_v16  ;;  %v4116_v48 = vsel %vm897_vm3, %v8341_v18, 0.0 }
0x12f0   :  { %4117 = vadd.xlane.f32.xlu1 %v4116_v48  ;;  %v7226_v48 = vld [vmem:[%s9779_s0] ss:$0 sm:$0xff] }
0x1370   :  { %v4109_v59 = vpop.xlane.xlu0 %4108 }
0x1371   :  { %8342 = vrcp.f32 %v4109_v59 }
0x1374   :  { %v4112_v19 = vpop.xlane.xlu1 %4111 }
0x1375   :  { %8344 = vrcp.f32 %v4112_v19 }
0x1378   :  { %v4115_v20 = vpop.xlane.xlu0 %4114 }
0x1379   :  { %8346 = vrcp.f32 %v4115_v20  ;;  %v4118_v61 = vpop.xlane.xlu1 %4117 }
0x137a   :  { %8348 = vrcp.f32 %v4118_v61 }
0x137e   :  { %v8343_v62 = vpop.eup %8342 }
0x137f   :  { %v4120_v54 = vmul.f32 %v8343_v62, %v8335_v45 }
0x1381   :  { %7847 = vmatmul.mubr.msk.f32.vlgmr.msra.gmra.mxu1 %vm942_vm4, %v4120_v54  ;;  %v7227_v54 = vld [vmem:[%s9780_s3] ss:$0 sm:$0xff] }
0x1382   :  { %v8345_v56 = vpop.eup %8344  ;;  %7855 = vmatpush3.msk.msra.mxu1 %vm946_vm2, %v4279_v21  ;;  %7856 = vmatprep.mubr.msk.f32.mxu1 %vm8706_vm0, %v8705_v3 }
0x1383   :  { %v4122_v57 = vmul.f32 %v8345_v56, %v8337_v39  ;;  %7864 = vmatprep.subr.bf16.mxu1 %v8705_v3 }
0x1385   :  { %7852 = vmatmul.mubr.msk.f32.vlgmr.msra.gmra.mxu0 %vm942_vm4, %v4122_v57 }
0x1386   :  { %v8347_v23 = vpop.eup %8346  ;;  %7860 = vmatpush3.msk.msra.mxu0 %vm946_vm2, %v4355_v22  ;;  %7861 = vmatprep.mubr.msk.f32.mxu0 %vm8706_vm0, %v8705_v3 }
0x1387   :  { %v8349_v25 = vpop.eup %8348  ;;  %v4124_v60 = vmul.f32 %v8347_v23, %v8339_v53  ;;  %7872 = vmatprep.subr.bf16.mxu0 %v8705_v3 }
0x1388   :  { %v4126_v26 = vmul.f32 %v8349_v25, %v8341_v18 }
0x1389   :  { %7857 = vmatmul.mubr.msk.f32.vlgmr.msra.gmra.mxu1 %vm942_vm4, %v4124_v60 }
0x138a   :  { %7862 = vmatmul.mubr.msk.f32.vlgmr.msra.gmra.mxu0 %vm942_vm4, %v4126_v26  ;;  %7865 = vmatpush3.bf16.msra.mxu1 %v9317_v37 }
0x138b   :  { %7866 = vmatprep.subr.bf16.mxu1 %v8705_v3  ;;  %7873 = vmatpush3.bf16.msra.mxu0 %v9326_v51 }
0x138c   :  { %7868 = vmatprep.mubr.msk.bf16.mxu1 %vm8706_vm0, %v8705_v3  ;;  %7874 = vmatprep.subr.bf16.mxu0 %v8705_v3 }
0x138d   :  { %7876 = vmatprep.mubr.msk.bf16.mxu0 %vm8706_vm0, %v8705_v3 }
0x138e   :  { %7867 = vmatpush3.bf16.msra.mxu1 %v9322_v34 }
0x138f   :  { %7880 = vmatprep.subr.bf16.mxu1 %v8705_v3  ;;  %7875 = vmatpush3.bf16.msra.mxu0 %v9332_v63 }
0x1390   :  { %7888 = vmatprep.subr.bf16.mxu0 %v8705_v3 }
0x1441   :  { %v4199_v28 = vpop.f32.mrf.mxu1 }
0x1442   :  { %v4431_v37 = vpack.c.bf16 %v4199_v28, %v4199_v28  ;;  %v4897_v28 = vld [vmem:[%s9781_s20] sm:$0xff] }
0x1443   :  { %v7848_v27 = vpop.f32.mrf.mxu1 }
0x1444   :  { %7869 = vmatmul.mubr.msk.bf16.vlgmr.msra.gmra.mxu1 %vm600_vm1, %v4431_v37  ;;  %v4904_v37 = vld [vmem:[%s9782_s12] sm:$0xff] }
0x1445   :  { %v4275_v51 = vpop.f32.mrf.mxu0  ;;  %7881 = vmatpush3.bf16.msra.mxu1 %v9340_v44  ;;  %7884 = vmatprep.mubr.msk.bf16.mxu1 %vm8706_vm0, %v8705_v3 }
0x1446   :  { %v4432_v29 = vpack.c.bf16 %v4275_v51, %v4275_v51  ;;  %7882 = vmatprep.subr.bf16.mxu1 %v8705_v3 }
0x1447   :  { %v7853_v34 = vpop.f32.mrf.mxu0 }
0x1448   :  { %7877 = vmatmul.mubr.msk.bf16.vlgmr.msra.gmra.mxu0 %vm600_vm1, %v4432_v29 }
0x1449   :  { %v4351_v63 = vpop.f32.mrf.mxu1  ;;  %7883 = vmatpush3.bf16.msra.mxu1 %v9344_v46  ;;  %7889 = vmatpush3.bf16.msra.mxu0 %v9351_v58  ;;  %v8237_v46 = vld [vmem:[#allocation20 + $0x30] sm:$0xff]   ;;  %v8238_v58 = vld [vmem:[#allocation20 + $0x28] sm:$0xff]  }
0x144a   :  { %v4433_v33 = vpack.c.bf16 %v4351_v63, %v4351_v63  ;;  %v4427_v42 = vpop.f32.mrf.mxu0  ;;  %7890 = vmatprep.subr.bf16.mxu0 %v8705_v3  ;;  %7892 = vmatprep.mubr.msk.bf16.mxu0 %vm8706_vm0, %v8705_v3  ;;  %v8244_v63 = vld [vmem:[#allocation21 + $0xa8] ss:$12 sps:$4 sm:$0xff]  }
0x144b   :  { %v7858_v44 = vpop.f32.mrf.mxu1  ;;  %7896 = vmatprep.subr.bf16.mxu1 %v8705_v3  ;;  %v4434_v1 = vpack.c.bf16 %v4427_v42, %v4427_v42  ;;  %v8250_v42 = vld [vmem:[#allocation21 + $0x94] ss:$12 sps:$4 sm:$0xff]  }
0x144c   :  { %v7863_v43 = vpop.f32.mrf.mxu0  ;;  %7885 = vmatmul.mubr.msk.bf16.vlgmr.msra.gmra.mxu1 %vm600_vm1, %v4433_v33  ;;  %v8247_v33 = vld [vmem:[#allocation21 + $0xb0] ss:$12 sps:$4 sm:$0xff]   ;;  %v8251_v44 = vld [vmem:[#allocation21 + $0x98] ss:$12 sps:$4 sm:$0xff]  }
0x144d   :  { %7891 = vmatpush3.bf16.msra.mxu0 %v9355_v4  ;;  %7897 = vmatpush3.bf16.msra.mxu1 %v8236_v32  ;;  %v8239_v4 = vld [vmem:[#allocation20 + $0x20] sm:$0xff]   ;;  %v8246_v32 = vld [vmem:[#allocation21 + $0xac] ss:$12 sps:$4 sm:$0xff]   ;;  %v8248_v43 = vld [vmem:[#allocation21 + $0x90] ss:$12 sps:$4 sm:$0xff]  }
0x144e   :  { %7898 = vmatprep.subr.bf16.mxu1 %v8705_v3  ;;  %7912 = vmatprep.mubr.msk.bf16.mxu1 %vm8706_vm0, %v8705_v3 }
0x144f   :  { %7916 = vmatprep.subr.mxu0 %v8705_v3 }
0x1450   :  { %7893 = vmatmul.mubr.msk.bf16.vlgmr.msra.gmra.mxu0 %vm600_vm1, %v4434_v1  ;;  %v8255_v1 = vld [vmem:[#allocation21 + $0x80] ss:$12 sps:$4 sm:$0xff]  }
0x1451   :  { %7899 = vmatpush3.bf16.msra.mxu1 %v8237_v46  ;;  %7918 = vmatprep.mubr.msk.f32.mxu0 %vm8706_vm0, %v8705_v3  ;;  %v8254_v46 = vld [vmem:[#allocation21 + $0x7c] ss:$12 sps:$4 sm:$0xff]  }
0x1452   :  { %7900 = vmatprep.subr.bf16.mxu1 %v8705_v3 }
0x1455   :  { %7901 = vmatpush3.bf16.msra.mxu1 %v8238_v58  ;;  %v8252_v58 = vld [vmem:[#allocation21 + $0x78] ss:$12 sps:$4 sm:$0xff]  }
0x1456   :  { %7902 = vmatprep.subr.bf16.mxu1 %v8705_v3 }
0x1459   :  { %7903 = vmatpush3.bf16.msra.mxu1 %v8239_v4  ;;  %v8256_v4 = vld [vmem:[#allocation21 + $0x60] ss:$12 sps:$4 sm:$0xff]  }
0x145a   :  { %7904 = vmatprep.subr.bf16.mxu1 %v8705_v3 }
0x145d   :  { %7905 = vmatpush3.bf16.msra.mxu1 %v8240_v6  ;;  %v8262_v6 = vld [vmem:[#allocation21 + $0x4c] ss:$12 sps:$4 sm:$0xff]  }
0x145e   :  { %7906 = vmatprep.subr.bf16.mxu1 %v8705_v3 }
0x1461   :  { %7907 = vmatpush3.bf16.msra.mxu1 %v8241_v50  ;;  %v8263_v50 = vld [vmem:[#allocation21 + $0x50] ss:$12 sps:$4 sm:$0xff]  }
0x1462   :  { %7908 = vmatprep.subr.bf16.mxu1 %v8705_v3 }
0x1465   :  { %7909 = vmatpush3.bf16.msra.mxu1 %v8242_v8  ;;  %v8260_v8 = vld [vmem:[#allocation21 + $0x48] ss:$12 sps:$4 sm:$0xff]  }
0x1466   :  { %7910 = vmatprep.subr.bf16.mxu1 %v8705_v3 }
0x1469   :  { %7911 = vmatpush3.bf16.msra.mxu1 %v8243_v11  ;;  %v8266_v11 = vld [vmem:[#allocation21 + $0x34] ss:$12 sps:$4 sm:$0xff]  }
0x146a   :  { %7926 = vmatprep.subr.bf16.mxu1 %v8705_v3 }
0x1504   :  { %v4472_v0 = vpop.f32.mrf.mxu1 }
0x1505   :  { %v4607_v15 = vsel %vm946_vm2, %v4472_v0, 0.0  ;;  %v8267_v0 = vld [vmem:[#allocation21 + $0x38] ss:$12 sps:$4 sm:$0xff]  }
0x1506   :  { %v7870_v5 = vpop.f32.mrf.mxu1 }
0x1507   :  { %v8264_v5 = vld [vmem:[#allocation21 + $0x30] ss:$12 sps:$4 sm:$0xff]  }
0x1508   :  { %v4475_v7 = vpop.f32.mrf.mxu1  ;;  %v4515_v9 = vpop.f32.mrf.mxu0 }
0x1509   :  { %v4608_v13 = vsel %vm946_vm2, %v4515_v9, 0.0 }
0x150a   :  { %v7871_v10 = vpop.f32.mrf.mxu1  ;;  %v7878_v12 = vpop.f32.mrf.mxu0  ;;  %v4609_v17 = vadd.f32 %v4608_v13, %v4607_v15  ;;  %v8268_v13 = vld [vmem:[#allocation21 + $0x18] ss:$12 sps:$4 sm:$0xff]  }
0x150b   :  { %v8270_v12 = vld [vmem:[#allocation21 + $0x1c] ss:$12 sps:$4 sm:$0xff]   ;;  %v8274_v15 = vld [vmem:[#allocation21 + $0x4] ss:$12 sps:$4 sm:$0xff]  }
0x150c   :  { %v4518_v14 = vpop.f32.mrf.mxu0  ;;  %v4558_v31 = vpop.f32.mrf.mxu1 }
0x150d   :  { %v4610_v52 = vsel %vm946_vm2, %v4558_v31, 0.0  ;;  %v8271_v14 = vld [vmem:[#allocation21 + $0x20] ss:$12 sps:$4 sm:$0xff]  }
0x150e   :  { %v7879_v49 = vpop.f32.mrf.mxu0  ;;  %v7886_v30 = vpop.f32.mrf.mxu1  ;;  %v4611_v36 = vadd.f32 %v4610_v52, %v4609_v17  ;;  %v8272_v52 = vld [vmem:[#allocation21] ss:$12 sps:$4 sm:$0xff]   ;;  %v8275_v17 = vld [vmem:[#allocation21 + $0x8] ss:$12 sps:$4 sm:$0xff]  }
0x1510   :  { %v4561_v45 = vpop.f32.mrf.mxu1  ;;  %v4601_v47 = vpop.f32.mrf.mxu0 }
0x1511   :  { %v4612_v39 = vsel %vm946_vm2, %v4601_v47, 0.0 }
0x1512   :  { %v4613_v41 = vadd.f32 %v4612_v39, %v4611_v36  ;;  %v7887_v53 = vpop.f32.mrf.mxu1  ;;  %v7894_v18 = vpop.f32.mrf.mxu0 }
0x1513   :  { %v4944_v53 = vld [vmem:[%s9783_s18] sm:$0x7] }
0x1514   :  { %v4615_v16 = vrot.slane %v4613_v41, 4  ;;  %v4604_v59 = vpop.f32.mrf.mxu0  ;;  %v4949_v18 = vrot.slane %v4944_v53, %v8914_v38 }
0x1516   :  { %v4617_v19 = vsel %vm946_vm2, %v9406_v24, %v4615_v16  ;;  %v7895_v20 = vpop.f32.mrf.mxu0  ;;  %v4953_v16 = vrot.slane %v4944_v53, %v8917_v40 }
0x1517   :  { %v4625_v61 = vadd.f32 %v7226_v48, %v4617_v19 }
0x1519   :  { %v4626_v62 = vpack.c.bf16 %v4625_v61, %v4625_v61 }
0x151b   :  { %7913 = vmatmul.mubr.bf16.vlgmr.msra.gmra.mxu1 %v4626_v62 }
0x151c   :  { %7942 = vmatprep.mubr.msk.bf16.mxu1 %vm8706_vm0, %v8705_v3  ;;  %7927 = vmatpush3.bf16.msra.mxu1 %v8247_v33 }
0x151d   :  { %7928 = vmatprep.subr.bf16.mxu1 %v8705_v3 }
0x1520   :  { %7929 = vmatpush3.bf16.msra.mxu1 %v8251_v44 }
0x1521   :  { %7930 = vmatprep.subr.bf16.mxu1 %v8705_v3 }
0x1524   :  { %7931 = vmatpush3.bf16.msra.mxu1 %v8255_v1 }
0x1525   :  { %7932 = vmatprep.subr.bf16.mxu1 %v8705_v3 }
0x15db   :  { %v4732_v21 = vpop.f32.mrf.mxu1 }
0x15dc   :  { %v4733_v56 = vadd.f32 %v7227_v54, %v4732_v21 }
0x15dd   :  { %v7914_v57 = vpop.f32.mrf.mxu1 }
0x15de   :  { %v4738_v22 = vmax.f32 %v4733_v56, 0.0 }
0x15df   :  { %v4735_v23 = vpop.f32.mrf.mxu1 }
0x15e0   :  { %4739 = vadd.xlane.f32.xlu0 %v4738_v22 }
0x15e1   :  { %v7915_v25 = vpop.f32.mrf.mxu1 }
0x1669   :  { %v4740_v60 = vpop.xlane.xlu0 %4739 }
0x166a   :  { %7917 = vmatpush3.msra.mxu0 %v4740_v60  ;;  %v4957_v60 = vrot.slane %v4944_v53, %v8946_v55 }
0x166b   :  { %7919 = vmatmul.mubr.msk.f32.vlgmr.msra.gmra.mxu0 %vm2437_vm5, %v9188_v35  ;;  %7921 = vmatprep.subr.mxu0 %v8705_v3 }
0x166c   :  { %7923 = vmatprep.mubr.msk.f32.mxu0 %vm8706_vm0, %v8705_v3 }
0x172b   :  { %v4807_v24 = vpop.f32.mrf.mxu0 }
0x172c   :  { %4813 = vperm.xlu1 %8147, %v4807_v24  }
0x172d   :  { %v7920_v26 = vpop.f32.mrf.mxu0 }
0x1730   :  { %4900 = vperm.xlu1 %8147, %v4897_v28  }
0x1734   :  { %4907 = vperm.xlu1 %8147, %v4904_v37  }
0x17a7   :  { %v4814_v27 = vpop.permute.xlu1 %4813 }
0x17a8   :  { %v9487_v51 = vsub.f32 %v4738_v22, %v4814_v27 }
0x17aa   :  { %v4817_v29 = vmul.f32 %v9487_v51, %v9487_v51 }
0x17ab   :  { %v4901_v49 = vpop.permute.xlu1 %4900 }
0x17ac   :  { %4818 = vadd.xlane.f32.xlu0 %v4817_v29 }
0x17af   :  { %v4908_v47 = vpop.permute.xlu1 %4907 }
0x1835   :  { %v4819_v34 = vpop.xlane.xlu0 %4818 }
0x1836   :  { %7922 = vmatpush3.msra.mxu0 %v4819_v34 }
0x1837   :  { %7924 = vmatmul.mubr.msk.f32.vlgmr.msra.gmra.mxu0 %vm2437_vm5, %v9188_v35  ;;  %5089 = vmatprep.subr.bf16.mxu0 %v8246_v32  ;;  %v8259_v35 = vld [vmem:[#allocation21 + $0x68] ss:$12 sps:$4 sm:$0xff]  }
0x1838   :  { %5121 = vmatprep.mubr.bf16.mxu0 %v8704_v2  ;;  %5090 = vmatpush1.bf16.msra.mxu0 %v8244_v63  ;;  %v8258_v2 = vld [vmem:[#allocation21 + $0x64] ss:$12 sps:$4 sm:$0xff]  }
0x1839   :  { %5091 = vmatprep.subr.bf16.mxu0 %v8250_v42  ;;  %7933 = vmatpush3.bf16.msra.mxu1 %v8259_v35 }
0x183a   :  { %7934 = vmatprep.subr.bf16.mxu1 %v8705_v3 }
0x183c   :  { %5092 = vmatpush1.bf16.msra.mxu0 %v8248_v43 }
0x183d   :  { %5093 = vmatprep.subr.bf16.mxu0 %v8254_v46  ;;  %7935 = vmatpush3.bf16.msra.mxu1 %v8263_v50 }
0x183e   :  { %7936 = vmatprep.subr.bf16.mxu1 %v8705_v3 }
0x1840   :  { %5094 = vmatpush1.bf16.msra.mxu0 %v8252_v58 }
0x1841   :  { %5095 = vmatprep.subr.bf16.mxu0 %v8258_v2  ;;  %7937 = vmatpush3.bf16.msra.mxu1 %v8267_v0 }
0x1842   :  { %7938 = vmatprep.subr.bf16.mxu1 %v8705_v3 }
0x1844   :  { %5096 = vmatpush1.bf16.msra.mxu0 %v8256_v4 }
0x1845   :  { %5097 = vmatprep.subr.bf16.mxu0 %v8262_v6  ;;  %7939 = vmatpush3.bf16.msra.mxu1 %v8271_v14 }
0x1846   :  { %7940 = vmatprep.subr.bf16.mxu1 %v8705_v3 }
0x1848   :  { %5098 = vmatpush1.bf16.msra.mxu0 %v8260_v8 }
0x1849   :  { %5099 = vmatprep.subr.bf16.mxu0 %v8266_v11  ;;  %7941 = vmatpush3.bf16.msra.mxu1 %v8275_v17 }
0x184a   :  { %7971 = vmatprep.subr.mxu1 %v8705_v3 }
0x184c   :  { %5100 = vmatpush1.bf16.msra.mxu0 %v8264_v5 }
0x184d   :  { %5101 = vmatprep.subr.bf16.mxu0 %v8270_v12 }
0x1850   :  { %5102 = vmatpush1.bf16.msra.mxu0 %v8268_v13 }
0x1851   :  { %5103 = vmatprep.subr.bf16.mxu0 %v8274_v15 }
0x1854   :  { %5104 = vmatpush1.bf16.msra.mxu0 %v8272_v52 }
0x1855   :  { %7946 = vmatprep.subr.mxu0 %v8705_v3 }
0x18f7   :  { %v4886_v7 = vpop.f32.mrf.mxu0 }
0x18f8   :  { %v4887_v9 = vadd.f32 1e-05, %v4886_v7 }
0x18f9   :  { %v7925_v10 = vpop.f32.mrf.mxu0 }
0x18fa   :  { %8350 = vrsqrt.f32 %v4887_v9 }
0x1907   :  { %v8351_v31 = vpop.eup %8350 }
0x1908   :  { %4893 = vperm.xlu0 %8146, %v8351_v31  }
0x1983   :  { %v4894_v30 = vpop.permute.xlu0 %4893 }
0x1984   :  { %v4896_v36 = vmul.f32 %v4894_v30, %v9487_v51 }
0x1986   :  { %v4903_v45 = vmul.f32 %v4901_v49, %v4896_v36 }
0x1988   :  { %v4910_v39 = vadd.f32 %v4908_v47, %v4903_v45 }
0x198a   :  { %v4911_v41 = vpack.c.bf16 %v4910_v39, %v4910_v39 }
0x198c   :  { %5122 = vmatmul.mubr.bf16.vlgmr.msra.gmra.mxu0 %v4911_v41  ;;  %7943 = vmatmul.mubr.bf16.vlgmr.msra.gmra.mxu1 %v4911_v41 }
0x198d   :  { %7948 = vmatprep.mubr.msk.f32.mxu0 %vm8706_vm0, %v8705_v3  ;;  %7973 = vmatprep.mubr.msk.f32.mxu1 %vm8706_vm0, %v8705_v3 }
0x1a4c   :  { %v5123_v48 = vpop.f32.mrf.mxu0  ;;  %v5164_v59 = vpop.f32.mrf.mxu1 }
0x1a4d   :  { %v5124_v19 = vadd.f32 %v5123_v48, %v4949_v18  ;;  %v9562_v26 = vadd.f32 %v5164_v59, %v4957_v60  ;;  %v9603_v18 = vld [vmem:[#allocation23 + $0x8] sm:$0xff]   ;;  %v9607_v48 = vld [vmem:[#allocation23] sm:$0xff]  }
0x1a4e   :  { %v5125_v20 = vpop.f32.mrf.mxu0  ;;  %v7944_v61 = vpop.f32.mrf.mxu1 }
0x1a4f   :  { %v9511_v62 = vmul.f32 0.17677669, %v5124_v19  ;;  %v9513_v54 = vadd.f32 %v5125_v20, %v4953_v16  ;;  %v9619_v61 = vld [vmem:[#allocation23 + $0x18] sm:$0xff]  }
0x1a50   :  { %v5127_v21 = vpop.f32.mrf.mxu0  ;;  %v5167_v56 = vpop.f32.mrf.mxu1 }
0x1a51   :  { %5195 = vrot.lane.b32.xlu1 %v9513_v54, %s8707_s30  ;;  %7947 = vmatpush3.xpose.msk.msra.mxu0 %vm600_vm1, %v9513_v54  ;;  %v9626_v56 = vld [vmem:[#allocation23 + $0x10] sm:$0xff]  }
0x1a52   :  { %5188 = vrot.lane.b32.xlu0 %v9511_v62, %s8707_s30  ;;  %v5128_v38 = vpop.f32.mrf.mxu0  ;;  %v7945_v40 = vpop.f32.mrf.mxu1  ;;  %7951 = vmatprep.subr.mxu0 %v8705_v3 }
0x1a53   :  { %v9630_v40 = vld [vmem:[#allocation23 + $0x28] sm:$0xff]  }
0x1a54   :  { %7949 = vmatmul.mubr.msk.f32.vlgmr.msra.gmra.mxu0 %vm600_vm1, %v9511_v62 }
0x1a55   :  { %5197 = vrot.lane.b32.xlu1 %v9513_v54, %s8692_s8  ;;  %7953 = vmatprep.mubr.msk.f32.mxu0 %vm8706_vm0, %v8705_v3 }
0x1a56   :  { %5190 = vrot.lane.b32.xlu0 %v9511_v62, %s8692_s8 }
0x1a59   :  { %5199 = vrot.lane.b32.xlu1 %v9513_v54, %s8708_s6 }
0x1a5a   :  { %5192 = vrot.lane.b32.xlu0 %v9511_v62, %s8708_s6 }
0x1ac3   :  { %v9534_v57 = vpop.permute.xlu1 %5195 }
0x1ac4   :  { %v9536_v22 = vpop.permute.xlu0 %5188  ;;  %7952 = vmatpush3.xpose.msk.msra.mxu0 %vm600_vm1, %v9534_v57 }
0x1ac5   :  { %7956 = vmatprep.subr.mxu0 %v8705_v3 }
0x1ac7   :  { %v9541_v23 = vpop.permute.xlu1 %5197  ;;  %7954 = vmatmul.mubr.msk.f32.vlgmr.msra.gmra.mxu0 %vm600_vm1, %v9536_v22 }
0x1ac8   :  { %v9545_v25 = vpop.permute.xlu0 %5190  ;;  %7957 = vmatpush3.xpose.msk.msra.mxu0 %vm600_vm1, %v9541_v23  ;;  %7958 = vmatprep.mubr.msk.f32.mxu0 %vm8706_vm0, %v8705_v3 }
0x1ac9   :  { %7961 = vmatprep.subr.mxu0 %v8705_v3 }
0x1acb   :  { %v9553_v24 = vpop.permute.xlu1 %5199  ;;  %7959 = vmatmul.mubr.msk.f32.vlgmr.msra.gmra.mxu0 %vm600_vm1, %v9545_v25 }
0x1acc   :  { %7962 = vmatpush3.xpose.msk.msra.mxu0 %vm600_vm1, %v9553_v24  ;;  %7963 = vmatprep.mubr.msk.f32.mxu0 %vm8706_vm0, %v8705_v3  ;;  %v9564_v28 = vpop.permute.xlu0 %5192 }
0x1acd   :  { %7966 = vmatprep.subr.mxu0 %v8705_v3 }
0x1acf   :  { %7964 = vmatmul.mubr.msk.f32.vlgmr.msra.gmra.mxu0 %vm600_vm1, %v9564_v28 }
0x1ad0   :  { %7967 = vmatpush3.msk.msra.mxu0 %vm946_vm2, %v9562_v26  ;;  %7968 = vmatprep.mubr.msk.f32.mxu0 %vm8706_vm0, %v8705_v3 }
0x1ad1   :  { %7976 = vmatprep.subr.mxu0 %v8705_v3 }
0x1b14   :  { %v5278_v55 = vpop.f32.mrf.mxu0 }
0x1b15   :  { %v5504_v37 = vsel %vm897_vm3, %v5278_v55, -inf }
0x1b16   :  { %5505 = vmax.xlane.f32.xlu1 %v5504_v37  ;;  %v7950_v27 = vpop.f32.mrf.mxu0  ;;  %v9634_v37 = vld [vmem:[#allocation23 + $0x20] sm:$0xff]  }
0x1b87   :  { %v5352_v51 = vpop.f32.mrf.mxu0 }
0x1b88   :  { %v5507_v29 = vsel %vm897_vm3, %v5352_v51, -inf }
0x1b89   :  { %5508 = vmax.xlane.f32.xlu0 %v5507_v29  ;;  %v7955_v34 = vpop.f32.mrf.mxu0 }
0x1b8b   :  { %v5426_v63 = vpop.f32.mrf.mxu0 }
0x1b8c   :  { %v5510_v32 = vsel %vm897_vm3, %v5426_v63, -inf }
0x1b8d   :  { %5511 = vmax.xlane.f32.xlu0 %v5510_v32  ;;  %v7960_v33 = vpop.f32.mrf.mxu0 }
0x1b8e   :  { %v9648_v33 = vld [vmem:[#allocation23 + $0x30] sm:$0xff]  }
0x1b8f   :  { %v5500_v42 = vpop.f32.mrf.mxu0 }
0x1b90   :  { %v5513_v44 = vsel %vm897_vm3, %v5500_v42, -inf }
0x1b91   :  { %5514 = vmax.xlane.f32.xlu1 %v5513_v44  ;;  %v7965_v43 = vpop.f32.mrf.mxu0  ;;  %v6080_v44 = vrot.slane %v9513_v54, 4  ;;  %v6231_v54 = vrot.slane %v9545_v25, 4  ;;  %v6155_v25 = vrot.slane %v9536_v22, 4 }
0x1b92   :  { %v6079_v43 = vrot.slane %v9511_v62, 4 }
0x1b9f   :  { %v5506_v46 = vpop.xlane.xlu1 %5505 }
0x1ba0   :  { %v5516_v1 = vsub.f32 %v5278_v55, %v5506_v46  ;;  %v6232_v46 = vrot.slane %v9541_v23, 4 }
0x1ba2   :  { %v5520_v58 = vmul.f32 1.442695, %v5516_v1  ;;  %v6427_v1 = vrot.slane %v9562_v26, 4 }
0x1ba4   :  { %8352 = vpow2.f32 %v5520_v58  ;;  %v6156_v58 = vrot.slane %v9534_v57, 4  ;;  %v6307_v57 = vrot.slane %v9564_v28, 4 }
0x1bb1   :  { %v8353_v2 = vpop.eup %8352 }
0x1bb2   :  { %v5528_v35 = vsel %vm897_vm3, %v8353_v2, 0.0 }
0x1bb3   :  { %5529 = vadd.xlane.f32.xlu0 %v5528_v35 }
0x1c12   :  { %v5509_v4 = vpop.xlane.xlu0 %5508 }
0x1c13   :  { %v5517_v6 = vsub.f32 %v5352_v51, %v5509_v4  ;;  %v9641_v51 = vld [vmem:[#allocation23 + $0x38] sm:$0xff]  }
0x1c15   :  { %v5522_v50 = vmul.f32 1.442695, %v5517_v6 }
0x1c16   :  { %v5512_v8 = vpop.xlane.xlu0 %5511 }
0x1c17   :  { %8354 = vpow2.f32 %v5522_v50  ;;  %v5518_v11 = vsub.f32 %v5426_v63, %v5512_v8 }
0x1c19   :  { %v5524_v0 = vmul.f32 1.442695, %v5518_v11 }
0x1c1a   :  { %v5515_v13 = vpop.xlane.xlu1 %5514 }
0x1c1b   :  { %8356 = vpow2.f32 %v5524_v0  ;;  %v5519_v14 = vsub.f32 %v5500_v42, %v5515_v13 }
0x1c1d   :  { %v5526_v31 = vmul.f32 1.442695, %v5519_v14 }
0x1c24   :  { %v8355_v5 = vpop.eup %8354 }
0x1c25   :  { %v5531_v7 = vsel %vm897_vm3, %v8355_v5, 0.0 }
0x1c26   :  { %5532 = vadd.xlane.f32.xlu1 %v5531_v7 }
0x1c28   :  { %v8357_v9 = vpop.eup %8356 }
0x1c29   :  { %v5534_v10 = vsel %vm897_vm3, %v8357_v9, 0.0 }
0x1c2a   :  { %5535 = vadd.xlane.f32.xlu0 %v5534_v10 }
0x1c37   :  { %5204 = vrot.lane.b32.xlu1 %v9562_v26, %s8692_s8  ;;  %s9784_s8 = sld [smem:[#allocation41_spill]] }
0x1c3c   :  { %v5530_v12 = vpop.xlane.xlu0 %5529 }
0x1c3d   :  { %8358 = vrcp.f32 %v5530_v12 }
0x1c3e   :  { %8360 = vpow2.f32 %v5526_v31 }
0x1c40   :  { %5202 = vrot.lane.b32.xlu0 %v9562_v26, %s8707_s30 }
0x1c4a   :  { %v8359_v15 = vpop.eup %8358 }
0x1c4b   :  { %v5541_v52 = vmul.f32 %v8359_v15, %v8353_v2  ;;  %v8361_v17 = vpop.eup %8360 }
0x1c4c   :  { %v5537_v49 = vsel %vm897_vm3, %v8361_v17, 0.0 }
0x1c4d   :  { %7969 = vmatmul.mubr.msk.f32.vlgmr.msra.gmra.mxu0 %vm942_vm4, %v5541_v52 }
0x1c4e   :  { %7978 = vmatprep.mubr.msk.f32.mxu0 %vm8706_vm0, %v8705_v3 }
0x1c5b   :  { %5538 = vadd.xlane.f32.xlu1 %v5537_v49 }
0x1c6c   :  { %5206 = vrot.lane.b32.xlu1 %v9562_v26, %s8708_s6  ;;  %v6308_v26 = vrot.slane %v9553_v24, 4 }
0x1caf   :  { %v5533_v30 = vpop.xlane.xlu1 %5532 }
0x1cb0   :  { %8362 = vrcp.f32 %v5533_v30 }
0x1cb3   :  { %v5536_v36 = vpop.xlane.xlu0 %5535  ;;  %v9590_v45 = vpop.permute.xlu1 %5204 }
0x1cb4   :  { %8364 = vrcp.f32 %v5536_v36  ;;  %7977 = vmatpush3.msk.msra.mxu0 %vm946_vm2, %v9590_v45 }
0x1cb5   :  { %7986 = vmatprep.subr.bf16.mxu0 %v8705_v3 }
0x1cb7   :  { %v9595_v47 = vpop.permute.xlu0 %5202 }
0x1cb8   :  { %7972 = vmatpush3.msk.msra.mxu1 %vm946_vm2, %v9595_v47  ;;  %v6503_v35 = vrot.slane %v9595_v47, 4 }
0x1cb9   :  { %7981 = vmatprep.subr.mxu1 %v8705_v3 }
0x1cbd   :  { %v8363_v39 = vpop.eup %8362 }
0x1cbe   :  { %v5543_v41 = vmul.f32 %v8363_v39, %v8355_v5 }
0x1cc0   :  { %7974 = vmatmul.mubr.msk.f32.vlgmr.msra.gmra.mxu1 %vm942_vm4, %v5543_v41 }
0x1cc1   :  { %v8365_v53 = vpop.eup %8364  ;;  %7983 = vmatprep.mubr.msk.f32.mxu1 %vm8706_vm0, %v8705_v3 }
0x1cc2   :  { %v5545_v16 = vmul.f32 %v8365_v53, %v8357_v9 }
0x1cc4   :  { %7979 = vmatmul.mubr.msk.f32.vlgmr.msra.gmra.mxu0 %vm942_vm4, %v5545_v16 }
0x1cc5   :  { %7987 = vmatpush3.bf16.msra.mxu0 %v9603_v18  ;;  %7990 = vmatprep.mubr.msk.bf16.mxu0 %vm8706_vm0, %v8705_v3 }
0x1cc6   :  { %7988 = vmatprep.subr.bf16.mxu0 %v8705_v3 }
0x1cc9   :  { %7989 = vmatpush3.bf16.msra.mxu0 %v9607_v48 }
0x1cca   :  { %8002 = vmatprep.subr.bf16.mxu0 %v8705_v3 }
0x1ce4   :  { %v5539_v59 = vpop.xlane.xlu1 %5538 }
0x1ce5   :  { %8366 = vrcp.f32 %v5539_v59 }
0x1ce8   :  { %v9614_v19 = vpop.permute.xlu1 %5206 }
0x1ce9   :  { %7982 = vmatpush3.msk.msra.mxu1 %vm946_vm2, %v9614_v19 }
0x1cea   :  { %7994 = vmatprep.subr.bf16.mxu1 %v8705_v3 }
0x1cf2   :  { %v8367_v20 = vpop.eup %8366 }
0x1cf3   :  { %v5547_v21 = vmul.f32 %v8367_v20, %v8361_v17 }
0x1cf5   :  { %7984 = vmatmul.mubr.msk.f32.vlgmr.msra.gmra.mxu1 %vm942_vm4, %v5547_v21 }
0x1cf6   :  { %7995 = vmatpush3.bf16.msra.mxu1 %v9619_v61  ;;  %7998 = vmatprep.mubr.msk.bf16.mxu1 %vm8706_vm0, %v8705_v3 }
0x1cf7   :  { %7996 = vmatprep.subr.bf16.mxu1 %v8705_v3 }
0x1cfa   :  { %7997 = vmatpush3.bf16.msra.mxu1 %v9626_v56 }
0x1cfb   :  { %8010 = vmatprep.subr.bf16.mxu1 %v8705_v3 }
0x1d0d   :  { %v5619_v38 = vpop.f32.mrf.mxu0 }
0x1d0e   :  { %v5848_v60 = vpack.c.bf16 %v5619_v38, %v5619_v38 }
0x1d0f   :  { %v7970_v55 = vpop.f32.mrf.mxu0 }
0x1d10   :  { %7991 = vmatmul.mubr.msk.bf16.vlgmr.msra.gmra.mxu0 %vm600_vm1, %v5848_v60 }
0x1d11   :  { %8003 = vmatpush3.bf16.msra.mxu0 %v9630_v40  ;;  %8006 = vmatprep.mubr.msk.bf16.mxu0 %vm8706_vm0, %v8705_v3 }
0x1d12   :  { %8004 = vmatprep.subr.bf16.mxu0 %v8705_v3 }
0x1d15   :  { %8005 = vmatpush3.bf16.msra.mxu0 %v9634_v37 }
0x1d16   :  { %8018 = vmatprep.subr.mxu0 %v8705_v3 }
0x1d80   :  { %v5694_v27 = vpop.f32.mrf.mxu1 }
0x1d81   :  { %v5849_v29 = vpack.c.bf16 %v5694_v27, %v5694_v27 }
0x1d82   :  { %v7975_v34 = vpop.f32.mrf.mxu1 }
0x1d83   :  { %7999 = vmatmul.mubr.msk.bf16.vlgmr.msra.gmra.mxu1 %vm600_vm1, %v5849_v29 }
0x1d84   :  { %v5769_v63 = vpop.f32.mrf.mxu0  ;;  %8011 = vmatpush3.bf16.msra.mxu1 %v9641_v51  ;;  %8014 = vmatprep.mubr.msk.bf16.mxu1 %vm8706_vm0, %v8705_v3 }
0x1d85   :  { %v5850_v32 = vpack.c.bf16 %v5769_v63, %v5769_v63  ;;  %8012 = vmatprep.subr.bf16.mxu1 %v8705_v3 }
0x1d86   :  { %v7980_v42 = vpop.f32.mrf.mxu0 }
0x1d87   :  { %8007 = vmatmul.mubr.msk.bf16.vlgmr.msra.gmra.mxu0 %vm600_vm1, %v5850_v32 }
0x1d88   :  { %8019 = vmatpush3.xpose.msk.msra.mxu0 %vm600_vm1, %v6080_v44  ;;  %8020 = vmatprep.mubr.msk.f32.mxu0 %vm8706_vm0, %v8705_v3 }
0x1d89   :  { %8028 = vmatprep.subr.mxu0 %v8705_v3  ;;  %8013 = vmatpush3.bf16.msra.mxu1 %v9648_v33 }
0x1d8a   :  { %8023 = vmatprep.subr.mxu1 %v8705_v3 }
0x1d8f   :  { %8021 = vmatmul.mubr.msk.f32.vlgmr.msra.gmra.mxu0 %vm600_vm1, %v6079_v43 }
0x1d90   :  { %8029 = vmatpush3.xpose.msk.msra.mxu0 %vm600_vm1, %v6232_v46  ;;  %8030 = vmatprep.mubr.msk.f32.mxu0 %vm8706_vm0, %v8705_v3 }
0x1d91   :  { %8038 = vmatprep.subr.mxu0 %v8705_v3 }
0x1d93   :  { %8031 = vmatmul.mubr.msk.f32.vlgmr.msra.gmra.mxu0 %vm600_vm1, %v6231_v54 }
0x1d94   :  { %8039 = vmatpush3.msk.msra.mxu0 %vm946_vm2, %v6427_v1  ;;  %8040 = vmatprep.mubr.msk.f32.mxu0 %vm8706_vm0, %v8705_v3 }
0x1d95   :  { %8048 = vmatprep.subr.mxu0 %v8705_v3 }
0x1db5   :  { %v5844_v62 = vpop.f32.mrf.mxu1 }
0x1db6   :  { %v5851_v23 = vpack.c.bf16 %v5844_v62, %v5844_v62 }
0x1db7   :  { %v7985_v2 = vpop.f32.mrf.mxu1 }
0x1db8   :  { %8015 = vmatmul.mubr.msk.bf16.vlgmr.msra.gmra.mxu1 %vm600_vm1, %v5851_v23 }
0x1db9   :  { %8024 = vmatpush3.xpose.msk.msra.mxu1 %vm600_vm1, %v6156_v58  ;;  %8025 = vmatprep.mubr.msk.f32.mxu1 %vm8706_vm0, %v8705_v3 }
0x1dba   :  { %8033 = vmatprep.subr.mxu1 %v8705_v3 }
0x1dc0   :  { %8026 = vmatmul.mubr.msk.f32.vlgmr.msra.gmra.mxu1 %vm600_vm1, %v6155_v25 }
0x1dc1   :  { %8034 = vmatpush3.xpose.msk.msra.mxu1 %vm600_vm1, %v6308_v26  ;;  %8035 = vmatprep.mubr.msk.f32.mxu1 %vm8706_vm0, %v8705_v3 }
0x1dc2   :  { %8043 = vmatprep.subr.mxu1 %v8705_v3 }
0x1dc4   :  { %8036 = vmatmul.mubr.msk.f32.vlgmr.msra.gmra.mxu1 %vm600_vm1, %v6307_v57 }
0x1dc5   :  { %8044 = vmatpush3.msk.msra.mxu1 %vm946_vm2, %v6503_v35  ;;  %8045 = vmatprep.mubr.msk.f32.mxu1 %vm8706_vm0, %v8705_v3 }
0x1dc6   :  { %8053 = vmatprep.subr.mxu1 %v8705_v3 }
0x1dd0   :  { %v5901_v22 = vpop.f32.mrf.mxu0 }
0x1dd1   :  { %v6072_v28 = vsel %vm946_vm2, %v5901_v22, 0.0 }
0x1dd2   :  { %v7992_v24 = vpop.f32.mrf.mxu0 }
0x1dd4   :  { %v5904_v4 = vpop.f32.mrf.mxu0 }
0x1dd6   :  { %v7993_v6 = vpop.f32.mrf.mxu0 }
0x1e43   :  { %v5956_v50 = vpop.f32.mrf.mxu1 }
0x1e44   :  { %v6073_v8 = vsel %vm946_vm2, %v5956_v50, 0.0 }
0x1e45   :  { %v6074_v11 = vadd.f32 %v6073_v8, %v6072_v28  ;;  %v8000_v0 = vpop.f32.mrf.mxu1  ;;  %v6579_v8 = vrot.slane %v9590_v45, 4 }
0x1e47   :  { %v5959_v5 = vpop.f32.mrf.mxu1  ;;  %v6011_v7 = vpop.f32.mrf.mxu0 }
0x1e48   :  { %v6075_v9 = vsel %vm946_vm2, %v6011_v7, 0.0 }
0x1e49   :  { %v6076_v10 = vadd.f32 %v6075_v9, %v6074_v11  ;;  %v8001_v12 = vpop.f32.mrf.mxu1  ;;  %v8008_v13 = vpop.f32.mrf.mxu0 }
0x1e4b   :  { %v6014_v14 = vpop.f32.mrf.mxu0 }
0x1e4d   :  { %v8009_v31 = vpop.f32.mrf.mxu0 }
0x1e4f   :  { %v6151_v15 = vpop.f32.mrf.mxu0 }
0x1e50   :  { %v6383_v52 = vsel %vm897_vm3, %v6151_v15, -inf }
0x1e51   :  { %6384 = vmax.xlane.f32.xlu0 %v6383_v52  ;;  %v8022_v17 = vpop.f32.mrf.mxu0 }
0x1e53   :  { %v6303_v49 = vpop.f32.mrf.mxu0 }
0x1e54   :  { %v6389_v30 = vsel %vm897_vm3, %v6303_v49, -inf }
0x1e55   :  { %6390 = vmax.xlane.f32.xlu0 %v6389_v30  ;;  %v8032_v36 = vpop.f32.mrf.mxu0 }
0x1e78   :  { %v6066_v47 = vpop.f32.mrf.mxu1 }
0x1e79   :  { %v6077_v39 = vsel %vm946_vm2, %v6066_v47, 0.0 }
0x1e7a   :  { %v9698_v41 = vadd.f32 %v6077_v39, %v6076_v10  ;;  %v8016_v53 = vpop.f32.mrf.mxu1  ;;  %v6655_v10 = vrot.slane %v9614_v19, 4 }
0x1e7c   :  { %v6069_v16 = vpop.f32.mrf.mxu1 }
0x1e7e   :  { %v8017_v59 = vpop.f32.mrf.mxu1 }
0x1e80   :  { %v6227_v20 = vpop.f32.mrf.mxu1 }
0x1e81   :  { %v6386_v21 = vsel %vm897_vm3, %v6227_v20, -inf }
0x1e82   :  { %6387 = vmax.xlane.f32.xlu1 %v6386_v21  ;;  %v8027_v38 = vpop.f32.mrf.mxu1 }
0x1e84   :  { %v6379_v60 = vpop.f32.mrf.mxu1 }
0x1e85   :  { %v6392_v55 = vsel %vm897_vm3, %v6379_v60, -inf }
0x1e86   :  { %v8037_v27 = vpop.f32.mrf.mxu1  ;;  %6393 = vmax.xlane.f32.xlu0 %v6392_v55 }
0x1eda   :  { %v6385_v29 = vpop.xlane.xlu0 %6384 }
0x1edb   :  { %v6395_v34 = vsub.f32 %v6151_v15, %v6385_v29 }
0x1edd   :  { %v6399_v63 = vmul.f32 1.442695, %v6395_v34 }
0x1ede   :  { %v6391_v32 = vpop.xlane.xlu0 %6390 }
0x1edf   :  { %8368 = vpow2.f32 %v6399_v63  ;;  %v6397_v42 = vsub.f32 %v6303_v49, %v6391_v32 }
0x1ee1   :  { %v6403_v44 = vmul.f32 1.442695, %v6397_v42 }
0x1ee3   :  { %8370 = vpow2.f32 %v6403_v44 }
0x1eec   :  { %v8369_v43 = vpop.eup %8368 }
0x1eed   :  { %v6407_v46 = vsel %vm897_vm3, %v8369_v43, 0.0 }
0x1eee   :  { %6408 = vadd.xlane.f32.xlu1 %v6407_v46 }
0x1ef0   :  { %v8371_v54 = vpop.eup %8370 }
0x1ef1   :  { %v6413_v1 = vsel %vm897_vm3, %v8371_v54, 0.0 }
0x1ef2   :  { %6414 = vadd.xlane.f32.xlu1 %v6413_v1  ;;  %v7311_v1 = vld [vmem:[%s9785_s23] ss:$0 sm:$0xff] }
0x1f0b   :  { %v6388_v62 = vpop.xlane.xlu1 %6387 }
0x1f0c   :  { %v6396_v23 = vsub.f32 %v6227_v20, %v6388_v62 }
0x1f0e   :  { %v6401_v58 = vmul.f32 1.442695, %v6396_v23 }
0x1f0f   :  { %v6394_v2 = vpop.xlane.xlu0 %6393 }
0x1f10   :  { %8372 = vpow2.f32 %v6401_v58  ;;  %v6398_v25 = vsub.f32 %v6379_v60, %v6394_v2  ;;  %v7312_v58 = vld [vmem:[#allocation2] ss:$0 sm:$0xff] }
0x1f12   :  { %v6405_v26 = vmul.f32 1.442695, %v6398_v25 }
0x1f14   :  { %8374 = vpow2.f32 %v6405_v26  ;;  %v6946_v26 = vld [vmem:[%s8850_s29] sm:$0xff] }
0x1f1d   :  { %v8373_v57 = vpop.eup %8372 }
0x1f1e   :  { %v6410_v35 = vsel %vm897_vm3, %v8373_v57, 0.0 }
0x1f1f   :  { %6411 = vadd.xlane.f32.xlu0 %v6410_v35 }
0x1f21   :  { %v8375_v22 = vpop.eup %8374 }
0x1f22   :  { %v6416_v24 = vsel %vm897_vm3, %v8375_v22, 0.0 }
0x1f23   :  { %6417 = vadd.xlane.f32.xlu0 %v6416_v24  ;;  %v7313_v24 = vld [vmem:[#allocation3] ss:$0 sm:$0xff] }
0x1f77   :  { %v6409_v4 = vpop.xlane.xlu1 %6408 }
0x1f78   :  { %8376 = vrcp.f32 %v6409_v4 }
0x1f7b   :  { %v6415_v6 = vpop.xlane.xlu1 %6414 }
0x1f7c   :  { %8378 = vrcp.f32 %v6415_v6 }
0x1f85   :  { %v8377_v50 = vpop.eup %8376 }
0x1f86   :  { %v6420_v28 = vmul.f32 %v8377_v50, %v8369_v43  ;;  %v7310_v43 = vld [vmem:[%s9784_s8] ss:$0 sm:$0xff] }
0x1f88   :  { %8041 = vmatmul.mubr.msk.f32.vlgmr.msra.gmra.mxu0 %vm942_vm4, %v6420_v28 }
0x1f89   :  { %v8379_v11 = vpop.eup %8378  ;;  %8049 = vmatpush3.msk.msra.mxu0 %vm946_vm2, %v6579_v8  ;;  %8050 = vmatprep.mubr.msk.f32.mxu0 %vm8706_vm0, %v8705_v3 }
0x1f8a   :  { %v6424_v0 = vmul.f32 %v8379_v11, %v8371_v54  ;;  %8058 = vmatprep.subr.bf16.mxu0 %v8705_v3 }
0x1f8c   :  { %8051 = vmatmul.mubr.msk.f32.vlgmr.msra.gmra.mxu0 %vm942_vm4, %v6424_v0 }
0x1f8d   :  { %8059 = vmatpush3.bf16.msra.mxu0 %v9603_v18  ;;  %8062 = vmatprep.mubr.msk.bf16.mxu0 %vm8706_vm0, %v8705_v3 }
0x1f8e   :  { %8060 = vmatprep.subr.bf16.mxu0 %v8705_v3 }
0x1f91   :  { %8061 = vmatpush3.bf16.msra.mxu0 %v9607_v48 }
0x1f92   :  { %8074 = vmatprep.subr.bf16.mxu0 %v8705_v3 }
0x1fa8   :  { %v6412_v45 = vpop.xlane.xlu0 %6411 }
0x1fa9   :  { %8380 = vrcp.f32 %v6412_v45 }
0x1fac   :  { %v6418_v5 = vpop.xlane.xlu0 %6417 }
0x1fad   :  { %8382 = vrcp.f32 %v6418_v5 }
0x1fb6   :  { %v8381_v7 = vpop.eup %8380 }
0x1fb7   :  { %v6422_v9 = vmul.f32 %v8381_v7, %v8373_v57 }
0x1fb9   :  { %8046 = vmatmul.mubr.msk.f32.vlgmr.msra.gmra.mxu1 %vm942_vm4, %v6422_v9 }
0x1fba   :  { %v8383_v18 = vpop.eup %8382  ;;  %8054 = vmatpush3.msk.msra.mxu1 %vm946_vm2, %v6655_v10  ;;  %8055 = vmatprep.mubr.msk.f32.mxu1 %vm8706_vm0, %v8705_v3 }
0x1fbb   :  { %v6426_v12 = vmul.f32 %v8383_v18, %v8375_v22  ;;  %8066 = vmatprep.subr.bf16.mxu1 %v8705_v3  ;;  %v6945_v22 = vld [vmem:[#allocation9] sm:$0x3] }
0x1fbd   :  { %8056 = vmatmul.mubr.msk.f32.vlgmr.msra.gmra.mxu1 %vm942_vm4, %v6426_v12 }
0x1fbe   :  { %8067 = vmatpush3.bf16.msra.mxu1 %v9619_v61  ;;  %8070 = vmatprep.mubr.msk.bf16.mxu1 %vm8706_vm0, %v8705_v3 }
0x1fbf   :  { %8068 = vmatprep.subr.bf16.mxu1 %v8705_v3 }
0x1fc2   :  { %8069 = vmatpush3.bf16.msra.mxu1 %v9626_v56 }
0x1fc3   :  { %8082 = vmatprep.subr.bf16.mxu1 %v8705_v3 }
0x2048   :  { %v6499_v48 = vpop.f32.mrf.mxu0 }
0x2049   :  { %v6731_v19 = vpack.c.bf16 %v6499_v48, %v6499_v48 }
0x204a   :  { %v8042_v13 = vpop.f32.mrf.mxu0 }
0x204b   :  { %8063 = vmatmul.mubr.msk.bf16.vlgmr.msra.gmra.mxu0 %vm600_vm1, %v6731_v19 }
0x204c   :  { %v6651_v14 = vpop.f32.mrf.mxu0  ;;  %8075 = vmatpush3.bf16.msra.mxu0 %v9630_v40  ;;  %8078 = vmatprep.mubr.msk.bf16.mxu0 %vm8706_vm0, %v8705_v3 }
0x204d   :  { %8076 = vmatprep.subr.bf16.mxu0 %v8705_v3  ;;  %v6733_v31 = vpack.c.bf16 %v6651_v14, %v6651_v14 }
0x204e   :  { %v8052_v61 = vpop.f32.mrf.mxu0 }
0x2050   :  { %8077 = vmatpush3.bf16.msra.mxu0 %v9634_v37 }
0x2051   :  { %8090 = vmatprep.subr.mxu0 %v8705_v3 }
0x2053   :  { %8079 = vmatmul.mubr.msk.bf16.vlgmr.msra.gmra.mxu0 %vm600_vm1, %v6733_v31 }
0x2054   :  { %8092 = vmatprep.mubr.msk.f32.mxu0 %vm8706_vm0, %v8705_v3 }
0x2079   :  { %v6575_v56 = vpop.f32.mrf.mxu1 }
0x207a   :  { %v6732_v15 = vpack.c.bf16 %v6575_v56, %v6575_v56 }
0x207b   :  { %v8047_v52 = vpop.f32.mrf.mxu1 }
0x207c   :  { %8071 = vmatmul.mubr.msk.bf16.vlgmr.msra.gmra.mxu1 %vm600_vm1, %v6732_v15 }
0x207d   :  { %v6727_v40 = vpop.f32.mrf.mxu1  ;;  %8083 = vmatpush3.bf16.msra.mxu1 %v9641_v51  ;;  %8086 = vmatprep.mubr.msk.bf16.mxu1 %vm8706_vm0, %v8705_v3 }
0x207e   :  { %8084 = vmatprep.subr.bf16.mxu1 %v8705_v3  ;;  %v6734_v17 = vpack.c.bf16 %v6727_v40, %v6727_v40 }
0x207f   :  { %v8057_v37 = vpop.f32.mrf.mxu1 }
0x2081   :  { %8085 = vmatpush3.bf16.msra.mxu1 %v9648_v33 }
0x2084   :  { %8087 = vmatmul.mubr.msk.bf16.vlgmr.msra.gmra.mxu1 %vm600_vm1, %v6734_v17 }
0x210b   :  { %v6772_v49 = vpop.f32.mrf.mxu0 }
0x210c   :  { %v6907_v3 = vsel %vm946_vm2, %v6772_v49, 0.0 }
0x210d   :  { %v8064_v30 = vpop.f32.mrf.mxu0 }
0x210f   :  { %v6775_v36 = vpop.f32.mrf.mxu0 }
0x2111   :  { %v8065_v47 = vpop.f32.mrf.mxu0 }
0x2113   :  { %v6858_v39 = vpop.f32.mrf.mxu0 }
0x2114   :  { %v6910_v55 = vsel %vm946_vm2, %v6858_v39, 0.0 }
0x2115   :  { %v8080_v53 = vpop.f32.mrf.mxu0 }
0x2117   :  { %v6861_v16 = vpop.f32.mrf.mxu0 }
0x2119   :  { %v8081_v59 = vpop.f32.mrf.mxu0 }
0x213c   :  { %v6815_v51 = vpop.f32.mrf.mxu1 }
0x213d   :  { %v6908_v20 = vsel %vm946_vm2, %v6815_v51, 0.0 }
0x213e   :  { %v8072_v21 = vpop.f32.mrf.mxu1  ;;  %v6909_v33 = vadd.f32 %v6908_v20, %v6907_v3 }
0x2140   :  { %v6818_v38 = vpop.f32.mrf.mxu1  ;;  %v6911_v29 = vadd.f32 %v6910_v55, %v6909_v33 }
0x2142   :  { %v8073_v60 = vpop.f32.mrf.mxu1 }
0x2144   :  { %v6901_v27 = vpop.f32.mrf.mxu1 }
0x2145   :  { %v6912_v34 = vsel %vm946_vm2, %v6901_v27, 0.0 }
0x2146   :  { %v6913_v63 = vadd.f32 %v6912_v34, %v6911_v29  ;;  %v8088_v32 = vpop.f32.mrf.mxu1 }
0x2148   :  { %v6915_v42 = vrot.slane %v6913_v63, 4  ;;  %v6904_v44 = vpop.f32.mrf.mxu1 }
0x214a   :  { %v8089_v46 = vpop.f32.mrf.mxu1  ;;  %v6917_v54 = vsel %vm946_vm2, %v9698_v41, %v6915_v42 }
0x214b   :  { %v6925_v62 = vadd.f32 %v7310_v43, %v6917_v54 }
0x214d   :  { %v6933_v23 = vmul.f32 %v7311_v1, %v6925_v62 }
0x214f   :  { %6934 = vadd.xlane.f32.xlu1 %v6933_v23 }
0x21d8   :  { %v6935_v2 = vpop.xlane.xlu1 %6934 }
0x21d9   :  { %v6943_v25 = vadd.f32 %v7312_v58, %v6935_v2 }
0x21db   :  { %v6944_v57 = vmax.f32 %v6943_v25, 0.0 }
0x21dd   :  { %v6947_v35 = vmul.f32 %v6946_v26, %v6944_v57 }
0x21df   :  { %8091 = vmatpush3.msra.mxu0 %v6947_v35 }
0x21e0   :  { %8093 = vmatmul.mubr.msk.f32.vlgmr.msra.gmra.mxu0 %vm2437_vm5, %v6945_v22 }
0x22a0   :  { %v7024_v4 = vpop.f32.mrf.mxu0 }
0x22a1   :  { %v7025_v6 = vadd.f32 %v7313_v24, %v7024_v4 }
0x22a2   :  { %v8094_v41 = vpop.f32.mrf.mxu0 }
0x22a3   :  { %7029 = vst.msk [vmem:[%s8855_s27] sm:$0x3] %vm7028_vm6, %v7025_v6 }
0x22a4   :  { %7034 = vsyncpa [#allocation5], 1 }
0x22a5   :  { %7035 = vsyncpa [#allocation7], 1 }
0x22a6   :  { %7036 = vsyncpa [#allocation10], 1 }
0x22a7   :  { %7037 = vsyncpa [#allocation13], 1 }
0x22a8   :  { %7038 = vsyncpa [#allocation16], 1 }
0x22a9   :  { %7039 = vsyncpa [#allocation19], 1 }
0x22aa   :  { %7040 = vsyncpa [#allocation22], 1 }

</bundles_post_ra>
